<compile_context>
chip_gen: v7x
topology: tpu7x:2x2x1
jax: 0.10.0
libtpu: 0.0.40
codegen_flags: <defaults>
</compile_context>

<pallas_src>
import functools

import numpy as np
import jax
import jax.numpy as jnp
from jax.experimental import pallas as pl
from jax.experimental.pallas import tpu as pltpu


# ------------------------------------------------------------------
# Host-side constant builders (numpy, run once at head construction)
# ------------------------------------------------------------------
def _interp_matrix(n_in, n_out):
    """align_corners=True linear interpolation matrix (n_out, n_in)."""
    i = np.arange(n_out)
    if n_out == 1:
        src = np.zeros((1,), np.float64)
    else:
        src = i * (n_in - 1) / (n_out - 1)
    i0 = np.clip(np.floor(src).astype(np.int64), 0, n_in - 1)
    i1 = np.minimum(i0 + 1, n_in - 1)
    frac = (src - i0).astype(np.float32)
    A = np.zeros((n_out, n_in), np.float32)
    A[np.arange(n_out), i0] += 1.0 - frac
    A[np.arange(n_out), i1] += frac
    return A


def _height_taps(H):
    """Static 2-tap blend (i0, i1, frac) for align_corners=True x2 upsample."""
    H2 = 2 * H
    if H2 == 1:
        src = np.zeros((1,), np.float64)
    else:
        src = np.arange(H2) * (H - 1) / (H2 - 1)
    i0 = np.clip(np.floor(src).astype(np.int64), 0, H - 1)
    i1 = np.minimum(i0 + 1, H - 1)
    f = src - i0
    return (tuple(int(v) for v in i0),
            tuple(int(v) for v in i1),
            tuple(float(v) for v in f))


def _conv_masks(H, W, K):
    """(K*K, H*W) 0/1 masks selecting in-bounds taps for a 'same' KxK conv."""
    pad = K // 2
    h = np.arange(H)[:, None]
    w = np.arange(W)[None, :]
    m = np.zeros((K * K, H * W), np.float32)
    for dh in range(K):
        for dw in range(K):
            a, b = dh - pad, dw - pad
            valid = (h + a >= 0) & (h + a < H) & (w + b >= 0) & (w + b < W)
            m[dh * K + dw] = valid.reshape(-1).astype(np.float32)
    return m


def _pack_conv_weight(w_oihw, cout_pad, cin_pad):
    """OIHW conv weight -> (cout_pad, K*K*cin_pad); tap t = dh*K+dw block."""
    cout, cin, kh, kw = w_oihw.shape
    w = np.asarray(w_oihw, np.float32)
    out = np.zeros((cout_pad, kh * kw, cin_pad), np.float32)
    for dh in range(kh):
        for dw in range(kw):
            out[:cout, dh * kw + dw, :cin] = w[:, :, dh, dw]
    return out.reshape(cout_pad, kh * kw * cin_pad)


# ------------------------------------------------------------------
# Fused kernel: conv5x5+ReLU -> separable bilinear x2 -> conv3x3+ReLU -> conv3x3
# ------------------------------------------------------------------
def _head_kernel(x_ref, wr1_ref, m1_ref, awT_ref, wr2_ref, m2_ref, wr3_ref,
                 ym_ref, pred_ref, up_ref, *,
                 C, C8, H, W, K1, K2, bb, i0h, i1h, fh):
    P = H * W
    H2, W2 = 2 * H, 2 * W
    P2 = H2 * W2
    n1 = bb * P          # lanes of conv1-stage activations (bb images concat.)
    n2 = bb * P2         # lanes of post-upsample activations

    def conv(act, w_ref, mask_ref, K, row_len, n, relu):
        """'Same' KxK conv in tap-accumulate form; act is (C8, n) lane-flat."""
        pad = K // 2
        wv = w_ref[...]                                   # (C8, K*K*C8)
        acc = None
        for dh in range(K):
            for dw in range(K):
                t = dh * K + dw
                s = (dh - pad) * row_len + (dw - pad)
                if s == 0:
                    blk = act                             # centre tap: always in-bounds
                else:
                    blk = (pltpu.roll(act, shift=(-s) % n, axis=1)
                           * mask_ref[t:t + 1, :])
                term = jnp.dot(wv[:, t * C8:(t + 1) * C8], blk,
                               preferred_element_type=jnp.float32)
                acc = term if acc is None else acc + term
        return jnp.maximum(acc, 0.0) if relu else acc

    # ---- assemble the lane-flat, channel-padded input: (C8, bb*P) ----
    if bb == 1:
        xv = x_ref[0]
    else:
        xv = jnp.concatenate([x_ref[b] for b in range(bb)], axis=1)
    if C8 > C:
        xv = jnp.concatenate(
            [xv, jnp.zeros((C8 - C, n1), dtype=xv.dtype)], axis=0)

    # ---- conv_1: 5x5, pad 2, ReLU ----
    ym = conv(xv, wr1_ref, m1_ref, K1, W, n1, relu=True)          # (C8, bb*P)
    for b in range(bb):                                           # full (8,128)-aligned stores
        ym_ref[b] = ym[:, b * P:(b + 1) * P].astype(ym_ref.dtype)

    # ---- bilinear x2 upsample, align_corners=True (separable, no big operator) ----
    awT = awT_ref[...]                                            # (W, 2W)
    wrows = []                                                    # per (b, h): (C8, 2W)
    for b in range(bb):
        for h in range(H):
            row = ym[:, b * P + h * W: b * P + (h + 1) * W]
            wrows.append(jnp.dot(row, awT, preferred_element_type=jnp.float32))

    def out_row(b, hp):
        r0 = wrows[b * H + i0h[hp]]
        if fh[hp] < 1e-9 or i0h[hp] == i1h[hp]:
            return r0
        r1 = wrows[b * H + i1h[hp]]
        return (1.0 - fh[hp]) * r0 + fh[hp] * r1

    # group output rows so stores into the up scratch are 128-lane aligned
    if W2 <= 128 and 128 % W2 == 0 and H2 % (128 // W2) == 0:
        rg = 128 // W2
    else:
        rg = 1
    for b in range(bb):
        for hp0 in range(0, H2, rg):
            rows = [out_row(b, hp) for hp in range(hp0, hp0 + rg)]
            val = rows[0] if rg == 1 else jnp.concatenate(rows, axis=1)
            up_ref[:, b * P2 + hp0 * W2: b * P2 + (hp0 + rg) * W2] = val

    up = up_ref[...]                                              # (C8, bb*P2)

    # ---- conv_2: 3x3, pad 1, ReLU ----
    hmid = conv(up, wr2_ref, m2_ref, K2, W2, n2, relu=True)

    # ---- pred: 3x3, pad 1, no activation (only output channel 0 is real) ----
    pv = conv(hmid, wr3_ref, m2_ref, K2, W2, n2, relu=False)
    for b in range(bb):
        pred_ref[b] = pv[0:1, b * P2:(b + 1) * P2].astype(pred_ref.dtype)


def _pick_items_per_step(B):
    # Pack items per grid step to amortise fixed per-step overhead, but keep
    # the grid length even when possible so v7x's two TensorCores get work.
    for d in (4, 2):
        if B % d == 0 and (B // d) % 2 == 0:
            return d
    return 1


# ------------------------------------------------------------------
# Wrapper: packs constants once, returns a jitted NCHW -> (ym, pred) apply
# ------------------------------------------------------------------
def make_depth_prediction_head(w1_oihw, w2_oihw, w3_oihw, H, W):
    w1 = np.asarray(w1_oihw, np.float32)
    w2 = np.asarray(w2_oihw, np.float32)
    w3 = np.asarray(w3_oihw, np.float32)
    C = w1.shape[1]
    K1, K2 = w1.shape[2], w2.shape[2]
    assert w1.shape == (C, C, K1, K1)
    assert w2.shape == (C, C, K2, K2)
    assert w3.shape == (1, C, K2, K2)

    C8 = ((C + 7) // 8) * 8
    P, H2, W2, P2 = H * W, 2 * H, 2 * W, 4 * H * W

    wr1 = jnp.asarray(_pack_conv_weight(w1, C8, C8))    # (C8, K1*K1*C8)
    wr2 = jnp.asarray(_pack_conv_weight(w2, C8, C8))    # (C8, K2*K2*C8)
    wr3 = jnp.asarray(_pack_conv_weight(w3, C8, C8))    # (C8, K2*K2*C8)
    m1 = jnp.asarray(_conv_masks(H, W, K1))             # (K1*K1, P)
    m2 = jnp.asarray(_conv_masks(H2, W2, K2))           # (K2*K2, P2)
    awT = jnp.asarray(_interp_matrix(W, W2).T)          # (W, 2W) width interp
    i0h, i1h, fh = _height_taps(H)                      # static height taps

    @jax.jit
    def apply(x_nchw):
        B = x_nchw.shape[0]
        bb = _pick_items_per_step(B)
        x_flat = x_nchw.astype(jnp.float32).reshape(B, C, P)   # free reshape, no pad
        m1b = m1 if bb == 1 else jnp.tile(m1, (1, bb))
        m2b = m2 if bb == 1 else jnp.tile(m2, (1, bb))

        kernel = functools.partial(
            _head_kernel, C=C, C8=C8, H=H, W=W, K1=K1, K2=K2, bb=bb,
            i0h=i0h, i1h=i1h, fh=fh)

        # explicit VMEM budget: double-buffered tiles + the single up scratch
        tile_elems = (bb * C * P + C8 * K1 * K1 * C8 + K1 * K1 * bb * P
                      + W * W2 + 2 * C8 * K2 * K2 * C8 + K2 * K2 * bb * P2
                      + bb * C8 * P + bb * P2)
        vmem_bytes = (2 * tile_elems + C8 * bb * P2) * 4
        vmem_limit = int(min(96 * 2 ** 20, max(8 * 2 ** 20, 4 * vmem_bytes)))

        flops = (B * 2 * C8 * C8 * (K1 * K1 * P + 2 * K2 * K2 * P2)
                 + B * (2 * C8 * H * W * W2 + 3 * C8 * P2))
        bytes_accessed = 4 * (B * (C * P + C8 * P + P2)
                              + wr1.size + wr2.size + wr3.size
                              + m1b.size + m2b.size + awT.size)

        ym_flat, pred_flat = pl.pallas_call(
            kernel,
            out_shape=(jax.ShapeDtypeStruct((B, C8, P), jnp.float32),
                       jax.ShapeDtypeStruct((B, 1, P2), jnp.float32)),
            grid=(B // bb,),
            in_specs=[
                pl.BlockSpec((bb, C, P), lambda g: (g, 0, 0)),          # x
                pl.BlockSpec((C8, K1 * K1 * C8), lambda g: (0, 0)),     # conv1 weights
                pl.BlockSpec((K1 * K1, bb * P), lambda g: (0, 0)),      # conv1 masks
                pl.BlockSpec((W, W2), lambda g: (0, 0)),                # width interp
                pl.BlockSpec((C8, K2 * K2 * C8), lambda g: (0, 0)),     # conv2 weights
                pl.BlockSpec((K2 * K2, bb * P2), lambda g: (0, 0)),     # conv2/3 masks
                pl.BlockSpec((C8, K2 * K2 * C8), lambda g: (0, 0)),     # pred weights
            ],
            out_specs=(pl.BlockSpec((bb, C8, P), lambda g: (g, 0, 0)),  # ym (padded C)
                       pl.BlockSpec((bb, 1, P2), lambda g: (g, 0, 0))),  # pred
            scratch_shapes=[pltpu.VMEM((C8, bb * P2), jnp.float32)],    # upsampled act
            compiler_params=pltpu.CompilerParams(
                dimension_semantics=("parallel",),
                vmem_limit_bytes=vmem_limit),
            cost_estimate=pl.CostEstimate(
                flops=int(flops), transcendentals=0,
                bytes_accessed=int(bytes_accessed)),
        )(x_flat, wr1, m1b, awT, wr2, m2b, wr3)

        ym = ym_flat[:, :C, :].reshape(B, C, H, W)
        pred = pred_flat.reshape(B, 1, H2, W2)
        return ym, pred

    return apply


# ------------------------------------------------------------------
# Pure-JAX reference (sanity check)
# ------------------------------------------------------------------
def _reference(x_nchw, w1, w2, w3):
    dn = ("NCHW", "OIHW", "NCHW")

    def conv(x, w, relu):
        y = jax.lax.conv_general_dilated(x, w, (1, 1), "SAME", dimension_numbers=dn)
        return jnp.maximum(y, 0.0) if relu else y

    ym = conv(x_nchw, w1, True)
    B, C, H, W = ym.shape
    ah = jnp.asarray(_interp_matrix(H, 2 * H))
    aw = jnp.asarray(_interp_matrix(W, 2 * W))
    up = jnp.einsum("Hh,bchw->bcHw", ah, ym)
    up = jnp.einsum("Ww,bchw->bchW", aw, up)
    h = conv(up, w2, True)
    out = conv(h, w3, False)
    return ym, out


if __name__ == "__main__":
    B, C, H, W = 2, 4, 16, 16
    key = jax.random.PRNGKey(0)
    kx, k1, k2, k3, kx2 = jax.random.split(key, 5)

    # PyTorch-native layouts: NCHW input, OIHW weights, bias=False per module.
    x = jax.random.normal(kx, (B, C, H, W), dtype=jnp.float32)
    w1 = 0.1 * jax.random.normal(k1, (C, C, 5, 5), dtype=jnp.float32)
    w2 = 0.1 * jax.random.normal(k2, (C, C, 3, 3), dtype=jnp.float32)
    w3 = 0.1 * jax.random.normal(k3, (1, C, 3, 3), dtype=jnp.float32)

    head = make_depth_prediction_head(w1, w2, w3, H, W)

    ym, pred = head(x)
    jax.block_until_ready((ym, pred))
    assert ym.shape == (B, C, H, W)
    assert pred.shape == (B, 1, 2 * H, 2 * W)

    ym_ref, pred_ref = _reference(x, w1, w2, w3)
    np.testing.assert_allclose(np.asarray(ym), np.asarray(ym_ref), rtol=1e-3, atol=1e-3)
    np.testing.assert_allclose(np.asarray(pred), np.asarray(pred_ref), rtol=1e-3, atol=1e-3)

    # Also exercise the multi-item-per-grid-step path (2 items packed per step).
    x4 = jax.random.normal(kx2, (4, C, H, W), dtype=jnp.float32)
    ym4, pred4 = head(x4)
    jax.block_until_ready((ym4, pred4))
    ym4_ref, pred4_ref = _reference(x4, w1, w2, w3)
    np.testing.assert_allclose(np.asarray(ym4), np.asarray(ym4_ref), rtol=1e-3, atol=1e-3)
    np.testing.assert_allclose(np.asarray(pred4), np.asarray(pred4_ref), rtol=1e-3, atol=1e-3)

    print("KERNEL_OK")
</pallas_src>

<mosaic_0001>
module attributes {stable_mosaic.version = 11 : i64} {
  func.func @_head_kernel(%arg0: i32, %arg1: memref<1x4x256xf32, #tpu.memory_space<vmem>>, %arg2: memref<8x200xf32, #tpu.memory_space<vmem>>, %arg3: memref<25x256xf32, #tpu.memory_space<vmem>>, %arg4: memref<16x32xf32, #tpu.memory_space<vmem>>, %arg5: memref<8x72xf32, #tpu.memory_space<vmem>>, %arg6: memref<9x1024xf32, #tpu.memory_space<vmem>>, %arg7: memref<8x72xf32, #tpu.memory_space<vmem>>, %arg8: memref<1x8x256xf32, #tpu.memory_space<vmem>>, %arg9: memref<1x1x1024xf32, #tpu.memory_space<vmem>>, %arg10: memref<8x1024xf32, #tpu.memory_space<vmem>>) attributes {dimension_semantics = [#tpu.dimension_semantics<parallel>], iteration_bounds = array<i64: 2>, scalar_prefetch = 0 : i64, scratch_operands = 1 : i64, tpu.core_type = #tpu.core_type<tc>, window_params = [{transform_indices = @transform_0, window_bounds = array<i64: 1, 4, 256>}, {pipeline_mode = #tpu.pipeline_mode<synchronous>, transform_indices = @transform_1, window_bounds = array<i64: 8, 200>}, {pipeline_mode = #tpu.pipeline_mode<synchronous>, transform_indices = @transform_2, window_bounds = array<i64: 25, 256>}, {pipeline_mode = #tpu.pipeline_mode<synchronous>, transform_indices = @transform_3, window_bounds = array<i64: 16, 32>}, {pipeline_mode = #tpu.pipeline_mode<synchronous>, transform_indices = @transform_4, window_bounds = array<i64: 8, 72>}, {pipeline_mode = #tpu.pipeline_mode<synchronous>, transform_indices = @transform_5, window_bounds = array<i64: 9, 1024>}, {pipeline_mode = #tpu.pipeline_mode<synchronous>, transform_indices = @transform_6, window_bounds = array<i64: 8, 72>}, {transform_indices = @transform_7, window_bounds = array<i64: 1, 8, 256>}, {transform_indices = @transform_8, window_bounds = array<i64: 1, 1, 1024>}]} {
    %c0 = arith.constant 0 : index
    %c0_0 = arith.constant 0 : index
    %c0_1 = arith.constant 0 : index
    %0 = vector.load %arg1[%c0, %c0_0, %c0_1] : memref<1x4x256xf32, #tpu.memory_space<vmem>>, vector<1x4x256xf32>
    %1 = vector.shape_cast %0 : vector<1x4x256xf32> to vector<4x256xf32>
    %cst = arith.constant 0.000000e+00 : f32
    %2 = vector.broadcast %cst : f32 to vector<4x256xf32>
    %3 = tpu.concatenate %1, %2 in 0 : vector<4x256xf32>, vector<4x256xf32> -> vector<8x256xf32>
    %c0_2 = arith.constant 0 : index
    %c0_3 = arith.constant 0 : index
    %4 = vector.load %arg2[%c0_2, %c0_3] : memref<8x200xf32, #tpu.memory_space<vmem>>, vector<8x200xf32>
    %c34_i32 = arith.constant 34 : i32
    %5 = tpu.dynamic_rotate %3 by %c34_i32 dim 1 : vector<8x256xf32>, i32 -> vector<8x256xf32>
    %c0_4 = arith.constant 0 : index
    %c0_5 = arith.constant 0 : index
    %6 = vector.load %arg3[%c0_4, %c0_5] : memref<25x256xf32, #tpu.memory_space<vmem>>, vector<1x256xf32>
    %7 = vector.broadcast %6 : vector<1x256xf32> to vector<8x256xf32>
    %8 = arith.mulf %5, %7 : vector<8x256xf32>
    %9 = vector.extract_strided_slice %4 {offsets = [0, 0], sizes = [8, 8], strides = [1, 1]} : vector<8x200xf32> to vector<8x8xf32>
    %cst_6 = arith.constant dense<0.000000e+00> : vector<8x256xf32>
    %10 = tpu.matmul %9, %8, %cst_6 {dimension_numbers = #tpu.dot_dimension_numbers<[1], [0], [0], [1], [0, 0, 1, 1], [], []>} : vector<8x8xf32>, vector<8x256xf32>, vector<8x256xf32> -> vector<8x256xf32>
    %c33_i32 = arith.constant 33 : i32
    %11 = tpu.dynamic_rotate %3 by %c33_i32 dim 1 : vector<8x256xf32>, i32 -> vector<8x256xf32>
    %c1 = arith.constant 1 : index
    %c0_7 = arith.constant 0 : index
    %12 = vector.load %arg3[%c1, %c0_7] : memref<25x256xf32, #tpu.memory_space<vmem>>, vector<1x256xf32>
    %13 = vector.broadcast %12 : vector<1x256xf32> to vector<8x256xf32>
    %14 = arith.mulf %11, %13 : vector<8x256xf32>
    %15 = vector.extract_strided_slice %4 {offsets = [0, 8], sizes = [8, 8], strides = [1, 1]} : vector<8x200xf32> to vector<8x8xf32>
    %cst_8 = arith.constant dense<0.000000e+00> : vector<8x256xf32>
    %16 = tpu.matmul %15, %14, %cst_8 {dimension_numbers = #tpu.dot_dimension_numbers<[1], [0], [0], [1], [0, 0, 1, 1], [], []>} : vector<8x8xf32>, vector<8x256xf32>, vector<8x256xf32> -> vector<8x256xf32>
    %17 = arith.addf %10, %16 : vector<8x256xf32>
    %c32_i32 = arith.constant 32 : i32
    %18 = tpu.dynamic_rotate %3 by %c32_i32 dim 1 : vector<8x256xf32>, i32 -> vector<8x256xf32>
    %c2 = arith.constant 2 : index
    %c0_9 = arith.constant 0 : index
    %19 = vector.load %arg3[%c2, %c0_9] : memref<25x256xf32, #tpu.memory_space<vmem>>, vector<1x256xf32>
    %20 = vector.broadcast %19 : vector<1x256xf32> to vector<8x256xf32>
    %21 = arith.mulf %18, %20 : vector<8x256xf32>
    %22 = vector.extract_strided_slice %4 {offsets = [0, 16], sizes = [8, 8], strides = [1, 1]} : vector<8x200xf32> to vector<8x8xf32>
    %cst_10 = arith.constant dense<0.000000e+00> : vector<8x256xf32>
    %23 = tpu.matmul %22, %21, %cst_10 {dimension_numbers = #tpu.dot_dimension_numbers<[1], [0], [0], [1], [0, 0, 1, 1], [], []>} : vector<8x8xf32>, vector<8x256xf32>, vector<8x256xf32> -> vector<8x256xf32>
    %24 = arith.addf %17, %23 : vector<8x256xf32>
    %c31_i32 = arith.constant 31 : i32
    %25 = tpu.dynamic_rotate %3 by %c31_i32 dim 1 : vector<8x256xf32>, i32 -> vector<8x256xf32>
    %c3 = arith.constant 3 : index
    %c0_11 = arith.constant 0 : index
    %26 = vector.load %arg3[%c3, %c0_11] : memref<25x256xf32, #tpu.memory_space<vmem>>, vector<1x256xf32>
    %27 = vector.broadcast %26 : vector<1x256xf32> to vector<8x256xf32>
    %28 = arith.mulf %25, %27 : vector<8x256xf32>
    %29 = vector.extract_strided_slice %4 {offsets = [0, 24], sizes = [8, 8], strides = [1, 1]} : vector<8x200xf32> to vector<8x8xf32>
    %cst_12 = arith.constant dense<0.000000e+00> : vector<8x256xf32>
    %30 = tpu.matmul %29, %28, %cst_12 {dimension_numbers = #tpu.dot_dimension_numbers<[1], [0], [0], [1], [0, 0, 1, 1], [], []>} : vector<8x8xf32>, vector<8x256xf32>, vector<8x256xf32> -> vector<8x256xf32>
    %31 = arith.addf %24, %30 : vector<8x256xf32>
    %c30_i32 = arith.constant 30 : i32
    %32 = tpu.dynamic_rotate %3 by %c30_i32 dim 1 : vector<8x256xf32>, i32 -> vector<8x256xf32>
    %c4 = arith.constant 4 : index
    %c0_13 = arith.constant 0 : index
    %33 = vector.load %arg3[%c4, %c0_13] : memref<25x256xf32, #tpu.memory_space<vmem>>, vector<1x256xf32>
    %34 = vector.broadcast %33 : vector<1x256xf32> to vector<8x256xf32>
    %35 = arith.mulf %32, %34 : vector<8x256xf32>
    %36 = vector.extract_strided_slice %4 {offsets = [0, 32], sizes = [8, 8], strides = [1, 1]} : vector<8x200xf32> to vector<8x8xf32>
    %cst_14 = arith.constant dense<0.000000e+00> : vector<8x256xf32>
    %37 = tpu.matmul %36, %35, %cst_14 {dimension_numbers = #tpu.dot_dimension_numbers<[1], [0], [0], [1], [0, 0, 1, 1], [], []>} : vector<8x8xf32>, vector<8x256xf32>, vector<8x256xf32> -> vector<8x256xf32>
    %38 = arith.addf %31, %37 : vector<8x256xf32>
    %c18_i32 = arith.constant 18 : i32
    %39 = tpu.dynamic_rotate %3 by %c18_i32 dim 1 : vector<8x256xf32>, i32 -> vector<8x256xf32>
    %c5 = arith.constant 5 : index
    %c0_15 = arith.constant 0 : index
    %40 = vector.load %arg3[%c5, %c0_15] : memref<25x256xf32, #tpu.memory_space<vmem>>, vector<1x256xf32>
    %41 = vector.broadcast %40 : vector<1x256xf32> to vector<8x256xf32>
    %42 = arith.mulf %39, %41 : vector<8x256xf32>
    %43 = vector.extract_strided_slice %4 {offsets = [0, 40], sizes = [8, 8], strides = [1, 1]} : vector<8x200xf32> to vector<8x8xf32>
    %cst_16 = arith.constant dense<0.000000e+00> : vector<8x256xf32>
    %44 = tpu.matmul %43, %42, %cst_16 {dimension_numbers = #tpu.dot_dimension_numbers<[1], [0], [0], [1], [0, 0, 1, 1], [], []>} : vector<8x8xf32>, vector<8x256xf32>, vector<8x256xf32> -> vector<8x256xf32>
    %45 = arith.addf %38, %44 : vector<8x256xf32>
    %c17_i32 = arith.constant 17 : i32
    %46 = tpu.dynamic_rotate %3 by %c17_i32 dim 1 : vector<8x256xf32>, i32 -> vector<8x256xf32>
    %c6 = arith.constant 6 : index
    %c0_17 = arith.constant 0 : index
    %47 = vector.load %arg3[%c6, %c0_17] : memref<25x256xf32, #tpu.memory_space<vmem>>, vector<1x256xf32>
    %48 = vector.broadcast %47 : vector<1x256xf32> to vector<8x256xf32>
    %49 = arith.mulf %46, %48 : vector<8x256xf32>
    %50 = vector.extract_strided_slice %4 {offsets = [0, 48], sizes = [8, 8], strides = [1, 1]} : vector<8x200xf32> to vector<8x8xf32>
    %cst_18 = arith.constant dense<0.000000e+00> : vector<8x256xf32>
    %51 = tpu.matmul %50, %49, %cst_18 {dimension_numbers = #tpu.dot_dimension_numbers<[1], [0], [0], [1], [0, 0, 1, 1], [], []>} : vector<8x8xf32>, vector<8x256xf32>, vector<8x256xf32> -> vector<8x256xf32>
    %52 = arith.addf %45, %51 : vector<8x256xf32>
    %c16_i32 = arith.constant 16 : i32
    %53 = tpu.dynamic_rotate %3 by %c16_i32 dim 1 : vector<8x256xf32>, i32 -> vector<8x256xf32>
    %c7 = arith.constant 7 : index
    %c0_19 = arith.constant 0 : index
    %54 = vector.load %arg3[%c7, %c0_19] : memref<25x256xf32, #tpu.memory_space<vmem>>, vector<1x256xf32>
    %55 = vector.broadcast %54 : vector<1x256xf32> to vector<8x256xf32>
    %56 = arith.mulf %53, %55 : vector<8x256xf32>
    %57 = vector.extract_strided_slice %4 {offsets = [0, 56], sizes = [8, 8], strides = [1, 1]} : vector<8x200xf32> to vector<8x8xf32>
    %cst_20 = arith.constant dense<0.000000e+00> : vector<8x256xf32>
    %58 = tpu.matmul %57, %56, %cst_20 {dimension_numbers = #tpu.dot_dimension_numbers<[1], [0], [0], [1], [0, 0, 1, 1], [], []>} : vector<8x8xf32>, vector<8x256xf32>, vector<8x256xf32> -> vector<8x256xf32>
    %59 = arith.addf %52, %58 : vector<8x256xf32>
    %c15_i32 = arith.constant 15 : i32
    %60 = tpu.dynamic_rotate %3 by %c15_i32 dim 1 : vector<8x256xf32>, i32 -> vector<8x256xf32>
    %c8 = arith.constant 8 : index
    %c0_21 = arith.constant 0 : index
    %61 = vector.load %arg3[%c8, %c0_21] : memref<25x256xf32, #tpu.memory_space<vmem>>, vector<1x256xf32>
    %62 = vector.broadcast %61 : vector<1x256xf32> to vector<8x256xf32>
    %63 = arith.mulf %60, %62 : vector<8x256xf32>
    %64 = vector.extract_strided_slice %4 {offsets = [0, 64], sizes = [8, 8], strides = [1, 1]} : vector<8x200xf32> to vector<8x8xf32>
    %cst_22 = arith.constant dense<0.000000e+00> : vector<8x256xf32>
    %65 = tpu.matmul %64, %63, %cst_22 {dimension_numbers = #tpu.dot_dimension_numbers<[1], [0], [0], [1], [0, 0, 1, 1], [], []>} : vector<8x8xf32>, vector<8x256xf32>, vector<8x256xf32> -> vector<8x256xf32>
    %66 = arith.addf %59, %65 : vector<8x256xf32>
    %c14_i32 = arith.constant 14 : i32
    %67 = tpu.dynamic_rotate %3 by %c14_i32 dim 1 : vector<8x256xf32>, i32 -> vector<8x256xf32>
    %c9 = arith.constant 9 : index
    %c0_23 = arith.constant 0 : index
    %68 = vector.load %arg3[%c9, %c0_23] : memref<25x256xf32, #tpu.memory_space<vmem>>, vector<1x256xf32>
    %69 = vector.broadcast %68 : vector<1x256xf32> to vector<8x256xf32>
    %70 = arith.mulf %67, %69 : vector<8x256xf32>
    %71 = vector.extract_strided_slice %4 {offsets = [0, 72], sizes = [8, 8], strides = [1, 1]} : vector<8x200xf32> to vector<8x8xf32>
    %cst_24 = arith.constant dense<0.000000e+00> : vector<8x256xf32>
    %72 = tpu.matmul %71, %70, %cst_24 {dimension_numbers = #tpu.dot_dimension_numbers<[1], [0], [0], [1], [0, 0, 1, 1], [], []>} : vector<8x8xf32>, vector<8x256xf32>, vector<8x256xf32> -> vector<8x256xf32>
    %73 = arith.addf %66, %72 : vector<8x256xf32>
    %c2_i32 = arith.constant 2 : i32
    %74 = tpu.dynamic_rotate %3 by %c2_i32 dim 1 : vector<8x256xf32>, i32 -> vector<8x256xf32>
    %c10 = arith.constant 10 : index
    %c0_25 = arith.constant 0 : index
    %75 = vector.load %arg3[%c10, %c0_25] : memref<25x256xf32, #tpu.memory_space<vmem>>, vector<1x256xf32>
    %76 = vector.broadcast %75 : vector<1x256xf32> to vector<8x256xf32>
    %77 = arith.mulf %74, %76 : vector<8x256xf32>
    %78 = vector.extract_strided_slice %4 {offsets = [0, 80], sizes = [8, 8], strides = [1, 1]} : vector<8x200xf32> to vector<8x8xf32>
    %cst_26 = arith.constant dense<0.000000e+00> : vector<8x256xf32>
    %79 = tpu.matmul %78, %77, %cst_26 {dimension_numbers = #tpu.dot_dimension_numbers<[1], [0], [0], [1], [0, 0, 1, 1], [], []>} : vector<8x8xf32>, vector<8x256xf32>, vector<8x256xf32> -> vector<8x256xf32>
    %80 = arith.addf %73, %79 : vector<8x256xf32>
    %c1_i32 = arith.constant 1 : i32
    %81 = tpu.dynamic_rotate %3 by %c1_i32 dim 1 : vector<8x256xf32>, i32 -> vector<8x256xf32>
    %c11 = arith.constant 11 : index
    %c0_27 = arith.constant 0 : index
    %82 = vector.load %arg3[%c11, %c0_27] : memref<25x256xf32, #tpu.memory_space<vmem>>, vector<1x256xf32>
    %83 = vector.broadcast %82 : vector<1x256xf32> to vector<8x256xf32>
    %84 = arith.mulf %81, %83 : vector<8x256xf32>
    %85 = vector.extract_strided_slice %4 {offsets = [0, 88], sizes = [8, 8], strides = [1, 1]} : vector<8x200xf32> to vector<8x8xf32>
    %cst_28 = arith.constant dense<0.000000e+00> : vector<8x256xf32>
    %86 = tpu.matmul %85, %84, %cst_28 {dimension_numbers = #tpu.dot_dimension_numbers<[1], [0], [0], [1], [0, 0, 1, 1], [], []>} : vector<8x8xf32>, vector<8x256xf32>, vector<8x256xf32> -> vector<8x256xf32>
    %87 = arith.addf %80, %86 : vector<8x256xf32>
    %88 = vector.extract_strided_slice %4 {offsets = [0, 96], sizes = [8, 8], strides = [1, 1]} : vector<8x200xf32> to vector<8x8xf32>
    %cst_29 = arith.constant dense<0.000000e+00> : vector<8x256xf32>
    %89 = tpu.matmul %88, %3, %cst_29 {dimension_numbers = #tpu.dot_dimension_numbers<[1], [0], [0], [1], [0, 0, 1, 1], [], []>} : vector<8x8xf32>, vector<8x256xf32>, vector<8x256xf32> -> vector<8x256xf32>
    %90 = arith.addf %87, %89 : vector<8x256xf32>
    %c255_i32 = arith.constant 255 : i32
    %91 = tpu.dynamic_rotate %3 by %c255_i32 dim 1 : vector<8x256xf32>, i32 -> vector<8x256xf32>
    %c13 = arith.constant 13 : index
    %c0_30 = arith.constant 0 : index
    %92 = vector.load %arg3[%c13, %c0_30] : memref<25x256xf32, #tpu.memory_space<vmem>>, vector<1x256xf32>
    %93 = vector.broadcast %92 : vector<1x256xf32> to vector<8x256xf32>
    %94 = arith.mulf %91, %93 : vector<8x256xf32>
    %95 = vector.extract_strided_slice %4 {offsets = [0, 104], sizes = [8, 8], strides = [1, 1]} : vector<8x200xf32> to vector<8x8xf32>
    %cst_31 = arith.constant dense<0.000000e+00> : vector<8x256xf32>
    %96 = tpu.matmul %95, %94, %cst_31 {dimension_numbers = #tpu.dot_dimension_numbers<[1], [0], [0], [1], [0, 0, 1, 1], [], []>} : vector<8x8xf32>, vector<8x256xf32>, vector<8x256xf32> -> vector<8x256xf32>
    %97 = arith.addf %90, %96 : vector<8x256xf32>
    %c254_i32 = arith.constant 254 : i32
    %98 = tpu.dynamic_rotate %3 by %c254_i32 dim 1 : vector<8x256xf32>, i32 -> vector<8x256xf32>
    %c14 = arith.constant 14 : index
    %c0_32 = arith.constant 0 : index
    %99 = vector.load %arg3[%c14, %c0_32] : memref<25x256xf32, #tpu.memory_space<vmem>>, vector<1x256xf32>
    %100 = vector.broadcast %99 : vector<1x256xf32> to vector<8x256xf32>
    %101 = arith.mulf %98, %100 : vector<8x256xf32>
    %102 = vector.extract_strided_slice %4 {offsets = [0, 112], sizes = [8, 8], strides = [1, 1]} : vector<8x200xf32> to vector<8x8xf32>
    %cst_33 = arith.constant dense<0.000000e+00> : vector<8x256xf32>
    %103 = tpu.matmul %102, %101, %cst_33 {dimension_numbers = #tpu.dot_dimension_numbers<[1], [0], [0], [1], [0, 0, 1, 1], [], []>} : vector<8x8xf32>, vector<8x256xf32>, vector<8x256xf32> -> vector<8x256xf32>
    %104 = arith.addf %97, %103 : vector<8x256xf32>
    %c242_i32 = arith.constant 242 : i32
    %105 = tpu.dynamic_rotate %3 by %c242_i32 dim 1 : vector<8x256xf32>, i32 -> vector<8x256xf32>
    %c15 = arith.constant 15 : index
    %c0_34 = arith.constant 0 : index
    %106 = vector.load %arg3[%c15, %c0_34] : memref<25x256xf32, #tpu.memory_space<vmem>>, vector<1x256xf32>
    %107 = vector.broadcast %106 : vector<1x256xf32> to vector<8x256xf32>
    %108 = arith.mulf %105, %107 : vector<8x256xf32>
    %109 = vector.extract_strided_slice %4 {offsets = [0, 120], sizes = [8, 8], strides = [1, 1]} : vector<8x200xf32> to vector<8x8xf32>
    %cst_35 = arith.constant dense<0.000000e+00> : vector<8x256xf32>
    %110 = tpu.matmul %109, %108, %cst_35 {dimension_numbers = #tpu.dot_dimension_numbers<[1], [0], [0], [1], [0, 0, 1, 1], [], []>} : vector<8x8xf32>, vector<8x256xf32>, vector<8x256xf32> -> vector<8x256xf32>
    %111 = arith.addf %104, %110 : vector<8x256xf32>
    %c241_i32 = arith.constant 241 : i32
    %112 = tpu.dynamic_rotate %3 by %c241_i32 dim 1 : vector<8x256xf32>, i32 -> vector<8x256xf32>
    %c16 = arith.constant 16 : index
    %c0_36 = arith.constant 0 : index
    %113 = vector.load %arg3[%c16, %c0_36] : memref<25x256xf32, #tpu.memory_space<vmem>>, vector<1x256xf32>
    %114 = vector.broadcast %113 : vector<1x256xf32> to vector<8x256xf32>
    %115 = arith.mulf %112, %114 : vector<8x256xf32>
    %116 = vector.extract_strided_slice %4 {offsets = [0, 128], sizes = [8, 8], strides = [1, 1]} : vector<8x200xf32> to vector<8x8xf32>
    %cst_37 = arith.constant dense<0.000000e+00> : vector<8x256xf32>
    %117 = tpu.matmul %116, %115, %cst_37 {dimension_numbers = #tpu.dot_dimension_numbers<[1], [0], [0], [1], [0, 0, 1, 1], [], []>} : vector<8x8xf32>, vector<8x256xf32>, vector<8x256xf32> -> vector<8x256xf32>
    %118 = arith.addf %111, %117 : vector<8x256xf32>
    %c240_i32 = arith.constant 240 : i32
    %119 = tpu.dynamic_rotate %3 by %c240_i32 dim 1 : vector<8x256xf32>, i32 -> vector<8x256xf32>
    %c17 = arith.constant 17 : index
    %c0_38 = arith.constant 0 : index
    %120 = vector.load %arg3[%c17, %c0_38] : memref<25x256xf32, #tpu.memory_space<vmem>>, vector<1x256xf32>
    %121 = vector.broadcast %120 : vector<1x256xf32> to vector<8x256xf32>
    %122 = arith.mulf %119, %121 : vector<8x256xf32>
    %123 = vector.extract_strided_slice %4 {offsets = [0, 136], sizes = [8, 8], strides = [1, 1]} : vector<8x200xf32> to vector<8x8xf32>
    %cst_39 = arith.constant dense<0.000000e+00> : vector<8x256xf32>
    %124 = tpu.matmul %123, %122, %cst_39 {dimension_numbers = #tpu.dot_dimension_numbers<[1], [0], [0], [1], [0, 0, 1, 1], [], []>} : vector<8x8xf32>, vector<8x256xf32>, vector<8x256xf32> -> vector<8x256xf32>
    %125 = arith.addf %118, %124 : vector<8x256xf32>
    %c239_i32 = arith.constant 239 : i32
    %126 = tpu.dynamic_rotate %3 by %c239_i32 dim 1 : vector<8x256xf32>, i32 -> vector<8x256xf32>
    %c18 = arith.constant 18 : index
    %c0_40 = arith.constant 0 : index
    %127 = vector.load %arg3[%c18, %c0_40] : memref<25x256xf32, #tpu.memory_space<vmem>>, vector<1x256xf32>
    %128 = vector.broadcast %127 : vector<1x256xf32> to vector<8x256xf32>
    %129 = arith.mulf %126, %128 : vector<8x256xf32>
    %130 = vector.extract_strided_slice %4 {offsets = [0, 144], sizes = [8, 8], strides = [1, 1]} : vector<8x200xf32> to vector<8x8xf32>
    %cst_41 = arith.constant dense<0.000000e+00> : vector<8x256xf32>
    %131 = tpu.matmul %130, %129, %cst_41 {dimension_numbers = #tpu.dot_dimension_numbers<[1], [0], [0], [1], [0, 0, 1, 1], [], []>} : vector<8x8xf32>, vector<8x256xf32>, vector<8x256xf32> -> vector<8x256xf32>
    %132 = arith.addf %125, %131 : vector<8x256xf32>
    %c238_i32 = arith.constant 238 : i32
    %133 = tpu.dynamic_rotate %3 by %c238_i32 dim 1 : vector<8x256xf32>, i32 -> vector<8x256xf32>
    %c19 = arith.constant 19 : index
    %c0_42 = arith.constant 0 : index
    %134 = vector.load %arg3[%c19, %c0_42] : memref<25x256xf32, #tpu.memory_space<vmem>>, vector<1x256xf32>
    %135 = vector.broadcast %134 : vector<1x256xf32> to vector<8x256xf32>
    %136 = arith.mulf %133, %135 : vector<8x256xf32>
    %137 = vector.extract_strided_slice %4 {offsets = [0, 152], sizes = [8, 8], strides = [1, 1]} : vector<8x200xf32> to vector<8x8xf32>
    %cst_43 = arith.constant dense<0.000000e+00> : vector<8x256xf32>
    %138 = tpu.matmul %137, %136, %cst_43 {dimension_numbers = #tpu.dot_dimension_numbers<[1], [0], [0], [1], [0, 0, 1, 1], [], []>} : vector<8x8xf32>, vector<8x256xf32>, vector<8x256xf32> -> vector<8x256xf32>
    %139 = arith.addf %132, %138 : vector<8x256xf32>
    %c226_i32 = arith.constant 226 : i32
    %140 = tpu.dynamic_rotate %3 by %c226_i32 dim 1 : vector<8x256xf32>, i32 -> vector<8x256xf32>
    %c20 = arith.constant 20 : index
    %c0_44 = arith.constant 0 : index
    %141 = vector.load %arg3[%c20, %c0_44] : memref<25x256xf32, #tpu.memory_space<vmem>>, vector<1x256xf32>
    %142 = vector.broadcast %141 : vector<1x256xf32> to vector<8x256xf32>
    %143 = arith.mulf %140, %142 : vector<8x256xf32>
    %144 = vector.extract_strided_slice %4 {offsets = [0, 160], sizes = [8, 8], strides = [1, 1]} : vector<8x200xf32> to vector<8x8xf32>
    %cst_45 = arith.constant dense<0.000000e+00> : vector<8x256xf32>
    %145 = tpu.matmul %144, %143, %cst_45 {dimension_numbers = #tpu.dot_dimension_numbers<[1], [0], [0], [1], [0, 0, 1, 1], [], []>} : vector<8x8xf32>, vector<8x256xf32>, vector<8x256xf32> -> vector<8x256xf32>
    %146 = arith.addf %139, %145 : vector<8x256xf32>
    %c225_i32 = arith.constant 225 : i32
    %147 = tpu.dynamic_rotate %3 by %c225_i32 dim 1 : vector<8x256xf32>, i32 -> vector<8x256xf32>
    %c21 = arith.constant 21 : index
    %c0_46 = arith.constant 0 : index
    %148 = vector.load %arg3[%c21, %c0_46] : memref<25x256xf32, #tpu.memory_space<vmem>>, vector<1x256xf32>
    %149 = vector.broadcast %148 : vector<1x256xf32> to vector<8x256xf32>
    %150 = arith.mulf %147, %149 : vector<8x256xf32>
    %151 = vector.extract_strided_slice %4 {offsets = [0, 168], sizes = [8, 8], strides = [1, 1]} : vector<8x200xf32> to vector<8x8xf32>
    %cst_47 = arith.constant dense<0.000000e+00> : vector<8x256xf32>
    %152 = tpu.matmul %151, %150, %cst_47 {dimension_numbers = #tpu.dot_dimension_numbers<[1], [0], [0], [1], [0, 0, 1, 1], [], []>} : vector<8x8xf32>, vector<8x256xf32>, vector<8x256xf32> -> vector<8x256xf32>
    %153 = arith.addf %146, %152 : vector<8x256xf32>
    %c224_i32 = arith.constant 224 : i32
    %154 = tpu.dynamic_rotate %3 by %c224_i32 dim 1 : vector<8x256xf32>, i32 -> vector<8x256xf32>
    %c22 = arith.constant 22 : index
    %c0_48 = arith.constant 0 : index
    %155 = vector.load %arg3[%c22, %c0_48] : memref<25x256xf32, #tpu.memory_space<vmem>>, vector<1x256xf32>
    %156 = vector.broadcast %155 : vector<1x256xf32> to vector<8x256xf32>
    %157 = arith.mulf %154, %156 : vector<8x256xf32>
    %158 = vector.extract_strided_slice %4 {offsets = [0, 176], sizes = [8, 8], strides = [1, 1]} : vector<8x200xf32> to vector<8x8xf32>
    %cst_49 = arith.constant dense<0.000000e+00> : vector<8x256xf32>
    %159 = tpu.matmul %158, %157, %cst_49 {dimension_numbers = #tpu.dot_dimension_numbers<[1], [0], [0], [1], [0, 0, 1, 1], [], []>} : vector<8x8xf32>, vector<8x256xf32>, vector<8x256xf32> -> vector<8x256xf32>
    %160 = arith.addf %153, %159 : vector<8x256xf32>
    %c223_i32 = arith.constant 223 : i32
    %161 = tpu.dynamic_rotate %3 by %c223_i32 dim 1 : vector<8x256xf32>, i32 -> vector<8x256xf32>
    %c23 = arith.constant 23 : index
    %c0_50 = arith.constant 0 : index
    %162 = vector.load %arg3[%c23, %c0_50] : memref<25x256xf32, #tpu.memory_space<vmem>>, vector<1x256xf32>
    %163 = vector.broadcast %162 : vector<1x256xf32> to vector<8x256xf32>
    %164 = arith.mulf %161, %163 : vector<8x256xf32>
    %165 = vector.extract_strided_slice %4 {offsets = [0, 184], sizes = [8, 8], strides = [1, 1]} : vector<8x200xf32> to vector<8x8xf32>
    %cst_51 = arith.constant dense<0.000000e+00> : vector<8x256xf32>
    %166 = tpu.matmul %165, %164, %cst_51 {dimension_numbers = #tpu.dot_dimension_numbers<[1], [0], [0], [1], [0, 0, 1, 1], [], []>} : vector<8x8xf32>, vector<8x256xf32>, vector<8x256xf32> -> vector<8x256xf32>
    %167 = arith.addf %160, %166 : vector<8x256xf32>
    %c222_i32 = arith.constant 222 : i32
    %168 = tpu.dynamic_rotate %3 by %c222_i32 dim 1 : vector<8x256xf32>, i32 -> vector<8x256xf32>
    %c24 = arith.constant 24 : index
    %c0_52 = arith.constant 0 : index
    %169 = vector.load %arg3[%c24, %c0_52] : memref<25x256xf32, #tpu.memory_space<vmem>>, vector<1x256xf32>
    %170 = vector.broadcast %169 : vector<1x256xf32> to vector<8x256xf32>
    %171 = arith.mulf %168, %170 : vector<8x256xf32>
    %172 = vector.extract_strided_slice %4 {offsets = [0, 192], sizes = [8, 8], strides = [1, 1]} : vector<8x200xf32> to vector<8x8xf32>
    %cst_53 = arith.constant dense<0.000000e+00> : vector<8x256xf32>
    %173 = tpu.matmul %172, %171, %cst_53 {dimension_numbers = #tpu.dot_dimension_numbers<[1], [0], [0], [1], [0, 0, 1, 1], [], []>} : vector<8x8xf32>, vector<8x256xf32>, vector<8x256xf32> -> vector<8x256xf32>
    %174 = arith.addf %167, %173 : vector<8x256xf32>
    %cst_54 = arith.constant 0.000000e+00 : f32
    %175 = vector.broadcast %cst_54 : f32 to vector<8x256xf32>
    %176 = arith.maximumf %174, %175 : vector<8x256xf32>
    %c0_55 = arith.constant 0 : index
    %c0_56 = arith.constant 0 : index
    %c0_57 = arith.constant 0 : index
    %177 = vector.load %arg8[%c0_55, %c0_56, %c0_57] : memref<1x8x256xf32, #tpu.memory_space<vmem>>, vector<1x8x256xf32>
    %178 = vector.shape_cast %177 : vector<1x8x256xf32> to vector<8x256xf32>
    %179 = vector.shape_cast %176 : vector<8x256xf32> to vector<1x8x256xf32>
    tpu.vector_store %arg8[%c0_55, %c0_56, %c0_57], %179 {strides = array<i32>} : memref<1x8x256xf32, #tpu.memory_space<vmem>>, vector<1x8x256xf32>,
    %c0_58 = arith.constant 0 : index
    %c0_59 = arith.constant 0 : index
    %180 = vector.load %arg4[%c0_58, %c0_59] : memref<16x32xf32, #tpu.memory_space<vmem>>, vector<16x32xf32>
    %181 = vector.extract_strided_slice %176 {offsets = [0, 0], sizes = [8, 16], strides = [1, 1]} : vector<8x256xf32> to vector<8x16xf32>
    %cst_60 = arith.constant dense<0.000000e+00> : vector<8x32xf32>
    %182 = tpu.matmul %181, %180, %cst_60 {dimension_numbers = #tpu.dot_dimension_numbers<[1], [0], [0], [1], [0, 0, 1, 1], [], []>} : vector<8x16xf32>, vector<16x32xf32>, vector<8x32xf32> -> vector<8x32xf32>
    %183 = vector.extract_strided_slice %176 {offsets = [0, 16], sizes = [8, 16], strides = [1, 1]} : vector<8x256xf32> to vector<8x16xf32>
    %cst_61 = arith.constant dense<0.000000e+00> : vector<8x32xf32>
    %184 = tpu.matmul %183, %180, %cst_61 {dimension_numbers = #tpu.dot_dimension_numbers<[1], [0], [0], [1], [0, 0, 1, 1], [], []>} : vector<8x16xf32>, vector<16x32xf32>, vector<8x32xf32> -> vector<8x32xf32>
    %185 = vector.extract_strided_slice %176 {offsets = [0, 32], sizes = [8, 16], strides = [1, 1]} : vector<8x256xf32> to vector<8x16xf32>
    %cst_62 = arith.constant dense<0.000000e+00> : vector<8x32xf32>
    %186 = tpu.matmul %185, %180, %cst_62 {dimension_numbers = #tpu.dot_dimension_numbers<[1], [0], [0], [1], [0, 0, 1, 1], [], []>} : vector<8x16xf32>, vector<16x32xf32>, vector<8x32xf32> -> vector<8x32xf32>
    %187 = vector.extract_strided_slice %176 {offsets = [0, 48], sizes = [8, 16], strides = [1, 1]} : vector<8x256xf32> to vector<8x16xf32>
    %cst_63 = arith.constant dense<0.000000e+00> : vector<8x32xf32>
    %188 = tpu.matmul %187, %180, %cst_63 {dimension_numbers = #tpu.dot_dimension_numbers<[1], [0], [0], [1], [0, 0, 1, 1], [], []>} : vector<8x16xf32>, vector<16x32xf32>, vector<8x32xf32> -> vector<8x32xf32>
    %189 = vector.extract_strided_slice %176 {offsets = [0, 64], sizes = [8, 16], strides = [1, 1]} : vector<8x256xf32> to vector<8x16xf32>
    %cst_64 = arith.constant dense<0.000000e+00> : vector<8x32xf32>
    %190 = tpu.matmul %189, %180, %cst_64 {dimension_numbers = #tpu.dot_dimension_numbers<[1], [0], [0], [1], [0, 0, 1, 1], [], []>} : vector<8x16xf32>, vector<16x32xf32>, vector<8x32xf32> -> vector<8x32xf32>
    %191 = vector.extract_strided_slice %176 {offsets = [0, 80], sizes = [8, 16], strides = [1, 1]} : vector<8x256xf32> to vector<8x16xf32>
    %cst_65 = arith.constant dense<0.000000e+00> : vector<8x32xf32>
    %192 = tpu.matmul %191, %180, %cst_65 {dimension_numbers = #tpu.dot_dimension_numbers<[1], [0], [0], [1], [0, 0, 1, 1], [], []>} : vector<8x16xf32>, vector<16x32xf32>, vector<8x32xf32> -> vector<8x32xf32>
    %193 = vector.extract_strided_slice %176 {offsets = [0, 96], sizes = [8, 16], strides = [1, 1]} : vector<8x256xf32> to vector<8x16xf32>
    %cst_66 = arith.constant dense<0.000000e+00> : vector<8x32xf32>
    %194 = tpu.matmul %193, %180, %cst_66 {dimension_numbers = #tpu.dot_dimension_numbers<[1], [0], [0], [1], [0, 0, 1, 1], [], []>} : vector<8x16xf32>, vector<16x32xf32>, vector<8x32xf32> -> vector<8x32xf32>
    %195 = vector.extract_strided_slice %176 {offsets = [0, 112], sizes = [8, 16], strides = [1, 1]} : vector<8x256xf32> to vector<8x16xf32>
    %cst_67 = arith.constant dense<0.000000e+00> : vector<8x32xf32>
    %196 = tpu.matmul %195, %180, %cst_67 {dimension_numbers = #tpu.dot_dimension_numbers<[1], [0], [0], [1], [0, 0, 1, 1], [], []>} : vector<8x16xf32>, vector<16x32xf32>, vector<8x32xf32> -> vector<8x32xf32>
    %197 = vector.extract_strided_slice %176 {offsets = [0, 128], sizes = [8, 16], strides = [1, 1]} : vector<8x256xf32> to vector<8x16xf32>
    %cst_68 = arith.constant dense<0.000000e+00> : vector<8x32xf32>
    %198 = tpu.matmul %197, %180, %cst_68 {dimension_numbers = #tpu.dot_dimension_numbers<[1], [0], [0], [1], [0, 0, 1, 1], [], []>} : vector<8x16xf32>, vector<16x32xf32>, vector<8x32xf32> -> vector<8x32xf32>
    %199 = vector.extract_strided_slice %176 {offsets = [0, 144], sizes = [8, 16], strides = [1, 1]} : vector<8x256xf32> to vector<8x16xf32>
    %cst_69 = arith.constant dense<0.000000e+00> : vector<8x32xf32>
    %200 = tpu.matmul %199, %180, %cst_69 {dimension_numbers = #tpu.dot_dimension_numbers<[1], [0], [0], [1], [0, 0, 1, 1], [], []>} : vector<8x16xf32>, vector<16x32xf32>, vector<8x32xf32> -> vector<8x32xf32>
    %201 = vector.extract_strided_slice %176 {offsets = [0, 160], sizes = [8, 16], strides = [1, 1]} : vector<8x256xf32> to vector<8x16xf32>
    %cst_70 = arith.constant dense<0.000000e+00> : vector<8x32xf32>
    %202 = tpu.matmul %201, %180, %cst_70 {dimension_numbers = #tpu.dot_dimension_numbers<[1], [0], [0], [1], [0, 0, 1, 1], [], []>} : vector<8x16xf32>, vector<16x32xf32>, vector<8x32xf32> -> vector<8x32xf32>
    %203 = vector.extract_strided_slice %176 {offsets = [0, 176], sizes = [8, 16], strides = [1, 1]} : vector<8x256xf32> to vector<8x16xf32>
    %cst_71 = arith.constant dense<0.000000e+00> : vector<8x32xf32>
    %204 = tpu.matmul %203, %180, %cst_71 {dimension_numbers = #tpu.dot_dimension_numbers<[1], [0], [0], [1], [0, 0, 1, 1], [], []>} : vector<8x16xf32>, vector<16x32xf32>, vector<8x32xf32> -> vector<8x32xf32>
    %205 = vector.extract_strided_slice %176 {offsets = [0, 192], sizes = [8, 16], strides = [1, 1]} : vector<8x256xf32> to vector<8x16xf32>
    %cst_72 = arith.constant dense<0.000000e+00> : vector<8x32xf32>
    %206 = tpu.matmul %205, %180, %cst_72 {dimension_numbers = #tpu.dot_dimension_numbers<[1], [0], [0], [1], [0, 0, 1, 1], [], []>} : vector<8x16xf32>, vector<16x32xf32>, vector<8x32xf32> -> vector<8x32xf32>
    %207 = vector.extract_strided_slice %176 {offsets = [0, 208], sizes = [8, 16], strides = [1, 1]} : vector<8x256xf32> to vector<8x16xf32>
    %cst_73 = arith.constant dense<0.000000e+00> : vector<8x32xf32>
    %208 = tpu.matmul %207, %180, %cst_73 {dimension_numbers = #tpu.dot_dimension_numbers<[1], [0], [0], [1], [0, 0, 1, 1], [], []>} : vector<8x16xf32>, vector<16x32xf32>, vector<8x32xf32> -> vector<8x32xf32>
    %209 = vector.extract_strided_slice %176 {offsets = [0, 224], sizes = [8, 16], strides = [1, 1]} : vector<8x256xf32> to vector<8x16xf32>
    %cst_74 = arith.constant dense<0.000000e+00> : vector<8x32xf32>
    %210 = tpu.matmul %209, %180, %cst_74 {dimension_numbers = #tpu.dot_dimension_numbers<[1], [0], [0], [1], [0, 0, 1, 1], [], []>} : vector<8x16xf32>, vector<16x32xf32>, vector<8x32xf32> -> vector<8x32xf32>
    %211 = vector.extract_strided_slice %176 {offsets = [0, 240], sizes = [8, 16], strides = [1, 1]} : vector<8x256xf32> to vector<8x16xf32>
    %cst_75 = arith.constant dense<0.000000e+00> : vector<8x32xf32>
    %212 = tpu.matmul %211, %180, %cst_75 {dimension_numbers = #tpu.dot_dimension_numbers<[1], [0], [0], [1], [0, 0, 1, 1], [], []>} : vector<8x16xf32>, vector<16x32xf32>, vector<8x32xf32> -> vector<8x32xf32>
    %cst_76 = arith.constant 5.161290e-01 : f32
    %213 = vector.broadcast %cst_76 : f32 to vector<8x32xf32>
    %214 = arith.mulf %213, %182 : vector<8x32xf32>
    %cst_77 = arith.constant 0.483870953 : f32
    %215 = vector.broadcast %cst_77 : f32 to vector<8x32xf32>
    %216 = arith.mulf %215, %184 : vector<8x32xf32>
    %217 = arith.addf %214, %216 : vector<8x32xf32>
    %cst_78 = arith.constant 0.0322580636 : f32
    %218 = vector.broadcast %cst_78 : f32 to vector<8x32xf32>
    %219 = arith.mulf %218, %182 : vector<8x32xf32>
    %cst_79 = arith.constant 0.967741906 : f32
    %220 = vector.broadcast %cst_79 : f32 to vector<8x32xf32>
    %221 = arith.mulf %220, %184 : vector<8x32xf32>
    %222 = arith.addf %219, %221 : vector<8x32xf32>
    %cst_80 = arith.constant 0.54838711 : f32
    %223 = vector.broadcast %cst_80 : f32 to vector<8x32xf32>
    %224 = arith.mulf %223, %184 : vector<8x32xf32>
    %cst_81 = arith.constant 0.45161289 : f32
    %225 = vector.broadcast %cst_81 : f32 to vector<8x32xf32>
    %226 = arith.mulf %225, %186 : vector<8x32xf32>
    %227 = arith.addf %224, %226 : vector<8x32xf32>
    %228 = tpu.concatenate %182, %217, %222, %227 in 1 : vector<8x32xf32>, vector<8x32xf32>, vector<8x32xf32>, vector<8x32xf32> -> vector<8x128xf32>
    %c0_82 = arith.constant 0 : index
    %c0_83 = arith.constant 0 : index
    %229 = vector.load %arg10[%c0_82, %c0_83] : memref<8x1024xf32, #tpu.memory_space<vmem>>, vector<8x128xf32>
    tpu.vector_store %arg10[%c0_82, %c0_83], %228 {strides = array<i32>} : memref<8x1024xf32, #tpu.memory_space<vmem>>, vector<8x128xf32>,
    %cst_84 = arith.constant 0.0645161271 : f32
    %230 = vector.broadcast %cst_84 : f32 to vector<8x32xf32>
    %231 = arith.mulf %230, %184 : vector<8x32xf32>
    %cst_85 = arith.constant 0.935483872 : f32
    %232 = vector.broadcast %cst_85 : f32 to vector<8x32xf32>
    %233 = arith.mulf %232, %186 : vector<8x32xf32>
    %234 = arith.addf %231, %233 : vector<8x32xf32>
    %cst_86 = arith.constant 0.580645144 : f32
    %235 = vector.broadcast %cst_86 : f32 to vector<8x32xf32>
    %236 = arith.mulf %235, %186 : vector<8x32xf32>
    %cst_87 = arith.constant 0.419354826 : f32
    %237 = vector.broadcast %cst_87 : f32 to vector<8x32xf32>
    %238 = arith.mulf %237, %188 : vector<8x32xf32>
    %239 = arith.addf %236, %238 : vector<8x32xf32>
    %cst_88 = arith.constant 0.0967741906 : f32
    %240 = vector.broadcast %cst_88 : f32 to vector<8x32xf32>
    %241 = arith.mulf %240, %186 : vector<8x32xf32>
    %cst_89 = arith.constant 0.903225779 : f32
    %242 = vector.broadcast %cst_89 : f32 to vector<8x32xf32>
    %243 = arith.mulf %242, %188 : vector<8x32xf32>
    %244 = arith.addf %241, %243 : vector<8x32xf32>
    %cst_90 = arith.constant 0.612903237 : f32
    %245 = vector.broadcast %cst_90 : f32 to vector<8x32xf32>
    %246 = arith.mulf %245, %188 : vector<8x32xf32>
    %cst_91 = arith.constant 0.387096763 : f32
    %247 = vector.broadcast %cst_91 : f32 to vector<8x32xf32>
    %248 = arith.mulf %247, %190 : vector<8x32xf32>
    %249 = arith.addf %246, %248 : vector<8x32xf32>
    %250 = tpu.concatenate %234, %239, %244, %249 in 1 : vector<8x32xf32>, vector<8x32xf32>, vector<8x32xf32>, vector<8x32xf32> -> vector<8x128xf32>
    %c0_92 = arith.constant 0 : index
    %c128 = arith.constant 128 : index
    %251 = vector.load %arg10[%c0_92, %c128] : memref<8x1024xf32, #tpu.memory_space<vmem>>, vector<8x128xf32>
    tpu.vector_store %arg10[%c0_92, %c128], %250 {strides = array<i32>} : memref<8x1024xf32, #tpu.memory_space<vmem>>, vector<8x128xf32>,
    %cst_93 = arith.constant 0.129032254 : f32
    %252 = vector.broadcast %cst_93 : f32 to vector<8x32xf32>
    %253 = arith.mulf %252, %188 : vector<8x32xf32>
    %cst_94 = arith.constant 0.870967745 : f32
    %254 = vector.broadcast %cst_94 : f32 to vector<8x32xf32>
    %255 = arith.mulf %254, %190 : vector<8x32xf32>
    %256 = arith.addf %253, %255 : vector<8x32xf32>
    %cst_95 = arith.constant 0.645161271 : f32
    %257 = vector.broadcast %cst_95 : f32 to vector<8x32xf32>
    %258 = arith.mulf %257, %190 : vector<8x32xf32>
    %cst_96 = arith.constant 0.354838699 : f32
    %259 = vector.broadcast %cst_96 : f32 to vector<8x32xf32>
    %260 = arith.mulf %259, %192 : vector<8x32xf32>
    %261 = arith.addf %258, %260 : vector<8x32xf32>
    %cst_97 = arith.constant 0.161290318 : f32
    %262 = vector.broadcast %cst_97 : f32 to vector<8x32xf32>
    %263 = arith.mulf %262, %190 : vector<8x32xf32>
    %cst_98 = arith.constant 0.838709652 : f32
    %264 = vector.broadcast %cst_98 : f32 to vector<8x32xf32>
    %265 = arith.mulf %264, %192 : vector<8x32xf32>
    %266 = arith.addf %263, %265 : vector<8x32xf32>
    %cst_99 = arith.constant 0.677419364 : f32
    %267 = vector.broadcast %cst_99 : f32 to vector<8x32xf32>
    %268 = arith.mulf %267, %192 : vector<8x32xf32>
    %cst_100 = arith.constant 0.322580636 : f32
    %269 = vector.broadcast %cst_100 : f32 to vector<8x32xf32>
    %270 = arith.mulf %269, %194 : vector<8x32xf32>
    %271 = arith.addf %268, %270 : vector<8x32xf32>
    %272 = tpu.concatenate %256, %261, %266, %271 in 1 : vector<8x32xf32>, vector<8x32xf32>, vector<8x32xf32>, vector<8x32xf32> -> vector<8x128xf32>
    %c0_101 = arith.constant 0 : index
    %c256 = arith.constant 256 : index
    %273 = vector.load %arg10[%c0_101, %c256] : memref<8x1024xf32, #tpu.memory_space<vmem>>, vector<8x128xf32>
    tpu.vector_store %arg10[%c0_101, %c256], %272 {strides = array<i32>} : memref<8x1024xf32, #tpu.memory_space<vmem>>, vector<8x128xf32>,
    %cst_102 = arith.constant 0.193548381 : f32
    %274 = vector.broadcast %cst_102 : f32 to vector<8x32xf32>
    %275 = arith.mulf %274, %192 : vector<8x32xf32>
    %cst_103 = arith.constant 0.806451618 : f32
    %276 = vector.broadcast %cst_103 : f32 to vector<8x32xf32>
    %277 = arith.mulf %276, %194 : vector<8x32xf32>
    %278 = arith.addf %275, %277 : vector<8x32xf32>
    %cst_104 = arith.constant 0.709677398 : f32
    %279 = vector.broadcast %cst_104 : f32 to vector<8x32xf32>
    %280 = arith.mulf %279, %194 : vector<8x32xf32>
    %cst_105 = arith.constant 0.290322572 : f32
    %281 = vector.broadcast %cst_105 : f32 to vector<8x32xf32>
    %282 = arith.mulf %281, %196 : vector<8x32xf32>
    %283 = arith.addf %280, %282 : vector<8x32xf32>
    %cst_106 = arith.constant 0.225806445 : f32
    %284 = vector.broadcast %cst_106 : f32 to vector<8x32xf32>
    %285 = arith.mulf %284, %194 : vector<8x32xf32>
    %cst_107 = arith.constant 0.774193525 : f32
    %286 = vector.broadcast %cst_107 : f32 to vector<8x32xf32>
    %287 = arith.mulf %286, %196 : vector<8x32xf32>
    %288 = arith.addf %285, %287 : vector<8x32xf32>
    %cst_108 = arith.constant 0.741935492 : f32
    %289 = vector.broadcast %cst_108 : f32 to vector<8x32xf32>
    %290 = arith.mulf %289, %196 : vector<8x32xf32>
    %cst_109 = arith.constant 0.258064508 : f32
    %291 = vector.broadcast %cst_109 : f32 to vector<8x32xf32>
    %292 = arith.mulf %291, %198 : vector<8x32xf32>
    %293 = arith.addf %290, %292 : vector<8x32xf32>
    %294 = tpu.concatenate %278, %283, %288, %293 in 1 : vector<8x32xf32>, vector<8x32xf32>, vector<8x32xf32>, vector<8x32xf32> -> vector<8x128xf32>
    %c0_110 = arith.constant 0 : index
    %c384 = arith.constant 384 : index
    %295 = vector.load %arg10[%c0_110, %c384] : memref<8x1024xf32, #tpu.memory_space<vmem>>, vector<8x128xf32>
    tpu.vector_store %arg10[%c0_110, %c384], %294 {strides = array<i32>} : memref<8x1024xf32, #tpu.memory_space<vmem>>, vector<8x128xf32>,
    %cst_111 = arith.constant 0.258064508 : f32
    %296 = vector.broadcast %cst_111 : f32 to vector<8x32xf32>
    %297 = arith.mulf %296, %196 : vector<8x32xf32>
    %cst_112 = arith.constant 0.741935492 : f32
    %298 = vector.broadcast %cst_112 : f32 to vector<8x32xf32>
    %299 = arith.mulf %298, %198 : vector<8x32xf32>
    %300 = arith.addf %297, %299 : vector<8x32xf32>
    %cst_113 = arith.constant 0.774193525 : f32
    %301 = vector.broadcast %cst_113 : f32 to vector<8x32xf32>
    %302 = arith.mulf %301, %198 : vector<8x32xf32>
    %cst_114 = arith.constant 0.225806445 : f32
    %303 = vector.broadcast %cst_114 : f32 to vector<8x32xf32>
    %304 = arith.mulf %303, %200 : vector<8x32xf32>
    %305 = arith.addf %302, %304 : vector<8x32xf32>
    %cst_115 = arith.constant 0.290322572 : f32
    %306 = vector.broadcast %cst_115 : f32 to vector<8x32xf32>
    %307 = arith.mulf %306, %198 : vector<8x32xf32>
    %cst_116 = arith.constant 0.709677398 : f32
    %308 = vector.broadcast %cst_116 : f32 to vector<8x32xf32>
    %309 = arith.mulf %308, %200 : vector<8x32xf32>
    %310 = arith.addf %307, %309 : vector<8x32xf32>
    %cst_117 = arith.constant 0.806451618 : f32
    %311 = vector.broadcast %cst_117 : f32 to vector<8x32xf32>
    %312 = arith.mulf %311, %200 : vector<8x32xf32>
    %cst_118 = arith.constant 0.193548381 : f32
    %313 = vector.broadcast %cst_118 : f32 to vector<8x32xf32>
    %314 = arith.mulf %313, %202 : vector<8x32xf32>
    %315 = arith.addf %312, %314 : vector<8x32xf32>
    %316 = tpu.concatenate %300, %305, %310, %315 in 1 : vector<8x32xf32>, vector<8x32xf32>, vector<8x32xf32>, vector<8x32xf32> -> vector<8x128xf32>
    %c0_119 = arith.constant 0 : index
    %c512 = arith.constant 512 : index
    %317 = vector.load %arg10[%c0_119, %c512] : memref<8x1024xf32, #tpu.memory_space<vmem>>, vector<8x128xf32>
    tpu.vector_store %arg10[%c0_119, %c512], %316 {strides = array<i32>} : memref<8x1024xf32, #tpu.memory_space<vmem>>, vector<8x128xf32>,
    %cst_120 = arith.constant 0.322580636 : f32
    %318 = vector.broadcast %cst_120 : f32 to vector<8x32xf32>
    %319 = arith.mulf %318, %200 : vector<8x32xf32>
    %cst_121 = arith.constant 0.677419364 : f32
    %320 = vector.broadcast %cst_121 : f32 to vector<8x32xf32>
    %321 = arith.mulf %320, %202 : vector<8x32xf32>
    %322 = arith.addf %319, %321 : vector<8x32xf32>
    %cst_122 = arith.constant 0.838709652 : f32
    %323 = vector.broadcast %cst_122 : f32 to vector<8x32xf32>
    %324 = arith.mulf %323, %202 : vector<8x32xf32>
    %cst_123 = arith.constant 0.161290318 : f32
    %325 = vector.broadcast %cst_123 : f32 to vector<8x32xf32>
    %326 = arith.mulf %325, %204 : vector<8x32xf32>
    %327 = arith.addf %324, %326 : vector<8x32xf32>
    %cst_124 = arith.constant 0.354838699 : f32
    %328 = vector.broadcast %cst_124 : f32 to vector<8x32xf32>
    %329 = arith.mulf %328, %202 : vector<8x32xf32>
    %cst_125 = arith.constant 0.645161271 : f32
    %330 = vector.broadcast %cst_125 : f32 to vector<8x32xf32>
    %331 = arith.mulf %330, %204 : vector<8x32xf32>
    %332 = arith.addf %329, %331 : vector<8x32xf32>
    %cst_126 = arith.constant 0.870967745 : f32
    %333 = vector.broadcast %cst_126 : f32 to vector<8x32xf32>
    %334 = arith.mulf %333, %204 : vector<8x32xf32>
    %cst_127 = arith.constant 0.129032254 : f32
    %335 = vector.broadcast %cst_127 : f32 to vector<8x32xf32>
    %336 = arith.mulf %335, %206 : vector<8x32xf32>
    %337 = arith.addf %334, %336 : vector<8x32xf32>
    %338 = tpu.concatenate %322, %327, %332, %337 in 1 : vector<8x32xf32>, vector<8x32xf32>, vector<8x32xf32>, vector<8x32xf32> -> vector<8x128xf32>
    %c0_128 = arith.constant 0 : index
    %c640 = arith.constant 640 : index
    %339 = vector.load %arg10[%c0_128, %c640] : memref<8x1024xf32, #tpu.memory_space<vmem>>, vector<8x128xf32>
    tpu.vector_store %arg10[%c0_128, %c640], %338 {strides = array<i32>} : memref<8x1024xf32, #tpu.memory_space<vmem>>, vector<8x128xf32>,
    %cst_129 = arith.constant 0.387096763 : f32
    %340 = vector.broadcast %cst_129 : f32 to vector<8x32xf32>
    %341 = arith.mulf %340, %204 : vector<8x32xf32>
    %cst_130 = arith.constant 0.612903237 : f32
    %342 = vector.broadcast %cst_130 : f32 to vector<8x32xf32>
    %343 = arith.mulf %342, %206 : vector<8x32xf32>
    %344 = arith.addf %341, %343 : vector<8x32xf32>
    %cst_131 = arith.constant 0.903225779 : f32
    %345 = vector.broadcast %cst_131 : f32 to vector<8x32xf32>
    %346 = arith.mulf %345, %206 : vector<8x32xf32>
    %cst_132 = arith.constant 0.0967741906 : f32
    %347 = vector.broadcast %cst_132 : f32 to vector<8x32xf32>
    %348 = arith.mulf %347, %208 : vector<8x32xf32>
    %349 = arith.addf %346, %348 : vector<8x32xf32>
    %cst_133 = arith.constant 0.419354826 : f32
    %350 = vector.broadcast %cst_133 : f32 to vector<8x32xf32>
    %351 = arith.mulf %350, %206 : vector<8x32xf32>
    %cst_134 = arith.constant 0.580645144 : f32
    %352 = vector.broadcast %cst_134 : f32 to vector<8x32xf32>
    %353 = arith.mulf %352, %208 : vector<8x32xf32>
    %354 = arith.addf %351, %353 : vector<8x32xf32>
    %cst_135 = arith.constant 0.935483872 : f32
    %355 = vector.broadcast %cst_135 : f32 to vector<8x32xf32>
    %356 = arith.mulf %355, %208 : vector<8x32xf32>
    %cst_136 = arith.constant 0.0645161271 : f32
    %357 = vector.broadcast %cst_136 : f32 to vector<8x32xf32>
    %358 = arith.mulf %357, %210 : vector<8x32xf32>
    %359 = arith.addf %356, %358 : vector<8x32xf32>
    %360 = tpu.concatenate %344, %349, %354, %359 in 1 : vector<8x32xf32>, vector<8x32xf32>, vector<8x32xf32>, vector<8x32xf32> -> vector<8x128xf32>
    %c0_137 = arith.constant 0 : index
    %c768 = arith.constant 768 : index
    %361 = vector.load %arg10[%c0_137, %c768] : memref<8x1024xf32, #tpu.memory_space<vmem>>, vector<8x128xf32>
    tpu.vector_store %arg10[%c0_137, %c768], %360 {strides = array<i32>} : memref<8x1024xf32, #tpu.memory_space<vmem>>, vector<8x128xf32>,
    %cst_138 = arith.constant 0.45161289 : f32
    %362 = vector.broadcast %cst_138 : f32 to vector<8x32xf32>
    %363 = arith.mulf %362, %208 : vector<8x32xf32>
    %cst_139 = arith.constant 0.54838711 : f32
    %364 = vector.broadcast %cst_139 : f32 to vector<8x32xf32>
    %365 = arith.mulf %364, %210 : vector<8x32xf32>
    %366 = arith.addf %363, %365 : vector<8x32xf32>
    %cst_140 = arith.constant 0.967741906 : f32
    %367 = vector.broadcast %cst_140 : f32 to vector<8x32xf32>
    %368 = arith.mulf %367, %210 : vector<8x32xf32>
    %cst_141 = arith.constant 0.0322580636 : f32
    %369 = vector.broadcast %cst_141 : f32 to vector<8x32xf32>
    %370 = arith.mulf %369, %212 : vector<8x32xf32>
    %371 = arith.addf %368, %370 : vector<8x32xf32>
    %cst_142 = arith.constant 0.483870953 : f32
    %372 = vector.broadcast %cst_142 : f32 to vector<8x32xf32>
    %373 = arith.mulf %372, %210 : vector<8x32xf32>
    %cst_143 = arith.constant 5.161290e-01 : f32
    %374 = vector.broadcast %cst_143 : f32 to vector<8x32xf32>
    %375 = arith.mulf %374, %212 : vector<8x32xf32>
    %376 = arith.addf %373, %375 : vector<8x32xf32>
    %377 = tpu.concatenate %366, %371, %376, %212 in 1 : vector<8x32xf32>, vector<8x32xf32>, vector<8x32xf32>, vector<8x32xf32> -> vector<8x128xf32>
    %c0_144 = arith.constant 0 : index
    %c896 = arith.constant 896 : index
    %378 = vector.load %arg10[%c0_144, %c896] : memref<8x1024xf32, #tpu.memory_space<vmem>>, vector<8x128xf32>
    tpu.vector_store %arg10[%c0_144, %c896], %377 {strides = array<i32>} : memref<8x1024xf32, #tpu.memory_space<vmem>>, vector<8x128xf32>,
    %c0_145 = arith.constant 0 : index
    %c0_146 = arith.constant 0 : index
    %379 = vector.load %arg10[%c0_145, %c0_146] : memref<8x1024xf32, #tpu.memory_space<vmem>>, vector<8x1024xf32>
    %c0_147 = arith.constant 0 : index
    %c0_148 = arith.constant 0 : index
    %380 = vector.load %arg5[%c0_147, %c0_148] : memref<8x72xf32, #tpu.memory_space<vmem>>, vector<8x72xf32>
    %c33_i32_149 = arith.constant 33 : i32
    %381 = tpu.dynamic_rotate %379 by %c33_i32_149 dim 1 : vector<8x1024xf32>, i32 -> vector<8x1024xf32>
    %c0_150 = arith.constant 0 : index
    %c0_151 = arith.constant 0 : index
    %382 = vector.load %arg6[%c0_150, %c0_151] : memref<9x1024xf32, #tpu.memory_space<vmem>>, vector<1x1024xf32>
    %383 = vector.broadcast %382 : vector<1x1024xf32> to vector<8x1024xf32>
    %384 = arith.mulf %381, %383 : vector<8x1024xf32>
    %385 = vector.extract_strided_slice %380 {offsets = [0, 0], sizes = [8, 8], strides = [1, 1]} : vector<8x72xf32> to vector<8x8xf32>
    %cst_152 = arith.constant dense<0.000000e+00> : vector<8x1024xf32>
    %386 = tpu.matmul %385, %384, %cst_152 {dimension_numbers = #tpu.dot_dimension_numbers<[1], [0], [0], [1], [0, 0, 1, 1], [], []>} : vector<8x8xf32>, vector<8x1024xf32>, vector<8x1024xf32> -> vector<8x1024xf32>
    %c32_i32_153 = arith.constant 32 : i32
    %387 = tpu.dynamic_rotate %379 by %c32_i32_153 dim 1 : vector<8x1024xf32>, i32 -> vector<8x1024xf32>
    %c1_154 = arith.constant 1 : index
    %c0_155 = arith.constant 0 : index
    %388 = vector.load %arg6[%c1_154, %c0_155] : memref<9x1024xf32, #tpu.memory_space<vmem>>, vector<1x1024xf32>
    %389 = vector.broadcast %388 : vector<1x1024xf32> to vector<8x1024xf32>
    %390 = arith.mulf %387, %389 : vector<8x1024xf32>
    %391 = vector.extract_strided_slice %380 {offsets = [0, 8], sizes = [8, 8], strides = [1, 1]} : vector<8x72xf32> to vector<8x8xf32>
    %cst_156 = arith.constant dense<0.000000e+00> : vector<8x1024xf32>
    %392 = tpu.matmul %391, %390, %cst_156 {dimension_numbers = #tpu.dot_dimension_numbers<[1], [0], [0], [1], [0, 0, 1, 1], [], []>} : vector<8x8xf32>, vector<8x1024xf32>, vector<8x1024xf32> -> vector<8x1024xf32>
    %393 = arith.addf %386, %392 : vector<8x1024xf32>
    %c31_i32_157 = arith.constant 31 : i32
    %394 = tpu.dynamic_rotate %379 by %c31_i32_157 dim 1 : vector<8x1024xf32>, i32 -> vector<8x1024xf32>
    %c2_158 = arith.constant 2 : index
    %c0_159 = arith.constant 0 : index
    %395 = vector.load %arg6[%c2_158, %c0_159] : memref<9x1024xf32, #tpu.memory_space<vmem>>, vector<1x1024xf32>
    %396 = vector.broadcast %395 : vector<1x1024xf32> to vector<8x1024xf32>
    %397 = arith.mulf %394, %396 : vector<8x1024xf32>
    %398 = vector.extract_strided_slice %380 {offsets = [0, 16], sizes = [8, 8], strides = [1, 1]} : vector<8x72xf32> to vector<8x8xf32>
    %cst_160 = arith.constant dense<0.000000e+00> : vector<8x1024xf32>
    %399 = tpu.matmul %398, %397, %cst_160 {dimension_numbers = #tpu.dot_dimension_numbers<[1], [0], [0], [1], [0, 0, 1, 1], [], []>} : vector<8x8xf32>, vector<8x1024xf32>, vector<8x1024xf32> -> vector<8x1024xf32>
    %400 = arith.addf %393, %399 : vector<8x1024xf32>
    %c1_i32_161 = arith.constant 1 : i32
    %401 = tpu.dynamic_rotate %379 by %c1_i32_161 dim 1 : vector<8x1024xf32>, i32 -> vector<8x1024xf32>
    %c3_162 = arith.constant 3 : index
    %c0_163 = arith.constant 0 : index
    %402 = vector.load %arg6[%c3_162, %c0_163] : memref<9x1024xf32, #tpu.memory_space<vmem>>, vector<1x1024xf32>
    %403 = vector.broadcast %402 : vector<1x1024xf32> to vector<8x1024xf32>
    %404 = arith.mulf %401, %403 : vector<8x1024xf32>
    %405 = vector.extract_strided_slice %380 {offsets = [0, 24], sizes = [8, 8], strides = [1, 1]} : vector<8x72xf32> to vector<8x8xf32>
    %cst_164 = arith.constant dense<0.000000e+00> : vector<8x1024xf32>
    %406 = tpu.matmul %405, %404, %cst_164 {dimension_numbers = #tpu.dot_dimension_numbers<[1], [0], [0], [1], [0, 0, 1, 1], [], []>} : vector<8x8xf32>, vector<8x1024xf32>, vector<8x1024xf32> -> vector<8x1024xf32>
    %407 = arith.addf %400, %406 : vector<8x1024xf32>
    %408 = vector.extract_strided_slice %380 {offsets = [0, 32], sizes = [8, 8], strides = [1, 1]} : vector<8x72xf32> to vector<8x8xf32>
    %cst_165 = arith.constant dense<0.000000e+00> : vector<8x1024xf32>
    %409 = tpu.matmul %408, %379, %cst_165 {dimension_numbers = #tpu.dot_dimension_numbers<[1], [0], [0], [1], [0, 0, 1, 1], [], []>} : vector<8x8xf32>, vector<8x1024xf32>, vector<8x1024xf32> -> vector<8x1024xf32>
    %410 = arith.addf %407, %409 : vector<8x1024xf32>
    %c1023_i32 = arith.constant 1023 : i32
    %411 = tpu.dynamic_rotate %379 by %c1023_i32 dim 1 : vector<8x1024xf32>, i32 -> vector<8x1024xf32>
    %c5_166 = arith.constant 5 : index
    %c0_167 = arith.constant 0 : index
    %412 = vector.load %arg6[%c5_166, %c0_167] : memref<9x1024xf32, #tpu.memory_space<vmem>>, vector<1x1024xf32>
    %413 = vector.broadcast %412 : vector<1x1024xf32> to vector<8x1024xf32>
    %414 = arith.mulf %411, %413 : vector<8x1024xf32>
    %415 = vector.extract_strided_slice %380 {offsets = [0, 40], sizes = [8, 8], strides = [1, 1]} : vector<8x72xf32> to vector<8x8xf32>
    %cst_168 = arith.constant dense<0.000000e+00> : vector<8x1024xf32>
    %416 = tpu.matmul %415, %414, %cst_168 {dimension_numbers = #tpu.dot_dimension_numbers<[1], [0], [0], [1], [0, 0, 1, 1], [], []>} : vector<8x8xf32>, vector<8x1024xf32>, vector<8x1024xf32> -> vector<8x1024xf32>
    %417 = arith.addf %410, %416 : vector<8x1024xf32>
    %c993_i32 = arith.constant 993 : i32
    %418 = tpu.dynamic_rotate %379 by %c993_i32 dim 1 : vector<8x1024xf32>, i32 -> vector<8x1024xf32>
    %c6_169 = arith.constant 6 : index
    %c0_170 = arith.constant 0 : index
    %419 = vector.load %arg6[%c6_169, %c0_170] : memref<9x1024xf32, #tpu.memory_space<vmem>>, vector<1x1024xf32>
    %420 = vector.broadcast %419 : vector<1x1024xf32> to vector<8x1024xf32>
    %421 = arith.mulf %418, %420 : vector<8x1024xf32>
    %422 = vector.extract_strided_slice %380 {offsets = [0, 48], sizes = [8, 8], strides = [1, 1]} : vector<8x72xf32> to vector<8x8xf32>
    %cst_171 = arith.constant dense<0.000000e+00> : vector<8x1024xf32>
    %423 = tpu.matmul %422, %421, %cst_171 {dimension_numbers = #tpu.dot_dimension_numbers<[1], [0], [0], [1], [0, 0, 1, 1], [], []>} : vector<8x8xf32>, vector<8x1024xf32>, vector<8x1024xf32> -> vector<8x1024xf32>
    %424 = arith.addf %417, %423 : vector<8x1024xf32>
    %c992_i32 = arith.constant 992 : i32
    %425 = tpu.dynamic_rotate %379 by %c992_i32 dim 1 : vector<8x1024xf32>, i32 -> vector<8x1024xf32>
    %c7_172 = arith.constant 7 : index
    %c0_173 = arith.constant 0 : index
    %426 = vector.load %arg6[%c7_172, %c0_173] : memref<9x1024xf32, #tpu.memory_space<vmem>>, vector<1x1024xf32>
    %427 = vector.broadcast %426 : vector<1x1024xf32> to vector<8x1024xf32>
    %428 = arith.mulf %425, %427 : vector<8x1024xf32>
    %429 = vector.extract_strided_slice %380 {offsets = [0, 56], sizes = [8, 8], strides = [1, 1]} : vector<8x72xf32> to vector<8x8xf32>
    %cst_174 = arith.constant dense<0.000000e+00> : vector<8x1024xf32>
    %430 = tpu.matmul %429, %428, %cst_174 {dimension_numbers = #tpu.dot_dimension_numbers<[1], [0], [0], [1], [0, 0, 1, 1], [], []>} : vector<8x8xf32>, vector<8x1024xf32>, vector<8x1024xf32> -> vector<8x1024xf32>
    %431 = arith.addf %424, %430 : vector<8x1024xf32>
    %c991_i32 = arith.constant 991 : i32
    %432 = tpu.dynamic_rotate %379 by %c991_i32 dim 1 : vector<8x1024xf32>, i32 -> vector<8x1024xf32>
    %c8_175 = arith.constant 8 : index
    %c0_176 = arith.constant 0 : index
    %433 = vector.load %arg6[%c8_175, %c0_176] : memref<9x1024xf32, #tpu.memory_space<vmem>>, vector<1x1024xf32>
    %434 = vector.broadcast %433 : vector<1x1024xf32> to vector<8x1024xf32>
    %435 = arith.mulf %432, %434 : vector<8x1024xf32>
    %436 = vector.extract_strided_slice %380 {offsets = [0, 64], sizes = [8, 8], strides = [1, 1]} : vector<8x72xf32> to vector<8x8xf32>
    %cst_177 = arith.constant dense<0.000000e+00> : vector<8x1024xf32>
    %437 = tpu.matmul %436, %435, %cst_177 {dimension_numbers = #tpu.dot_dimension_numbers<[1], [0], [0], [1], [0, 0, 1, 1], [], []>} : vector<8x8xf32>, vector<8x1024xf32>, vector<8x1024xf32> -> vector<8x1024xf32>
    %438 = arith.addf %431, %437 : vector<8x1024xf32>
    %cst_178 = arith.constant 0.000000e+00 : f32
    %439 = vector.broadcast %cst_178 : f32 to vector<8x1024xf32>
    %440 = arith.maximumf %438, %439 : vector<8x1024xf32>
    %c0_179 = arith.constant 0 : index
    %c0_180 = arith.constant 0 : index
    %441 = vector.load %arg7[%c0_179, %c0_180] : memref<8x72xf32, #tpu.memory_space<vmem>>, vector<8x72xf32>
    %c33_i32_181 = arith.constant 33 : i32
    %442 = tpu.dynamic_rotate %440 by %c33_i32_181 dim 1 : vector<8x1024xf32>, i32 -> vector<8x1024xf32>
    %c0_182 = arith.constant 0 : index
    %c0_183 = arith.constant 0 : index
    %443 = vector.load %arg6[%c0_182, %c0_183] : memref<9x1024xf32, #tpu.memory_space<vmem>>, vector<1x1024xf32>
    %444 = vector.broadcast %443 : vector<1x1024xf32> to vector<8x1024xf32>
    %445 = arith.mulf %442, %444 : vector<8x1024xf32>
    %446 = vector.extract_strided_slice %441 {offsets = [0, 0], sizes = [8, 8], strides = [1, 1]} : vector<8x72xf32> to vector<8x8xf32>
    %cst_184 = arith.constant dense<0.000000e+00> : vector<8x1024xf32>
    %447 = tpu.matmul %446, %445, %cst_184 {dimension_numbers = #tpu.dot_dimension_numbers<[1], [0], [0], [1], [0, 0, 1, 1], [], []>} : vector<8x8xf32>, vector<8x1024xf32>, vector<8x1024xf32> -> vector<8x1024xf32>
    %c32_i32_185 = arith.constant 32 : i32
    %448 = tpu.dynamic_rotate %440 by %c32_i32_185 dim 1 : vector<8x1024xf32>, i32 -> vector<8x1024xf32>
    %c1_186 = arith.constant 1 : index
    %c0_187 = arith.constant 0 : index
    %449 = vector.load %arg6[%c1_186, %c0_187] : memref<9x1024xf32, #tpu.memory_space<vmem>>, vector<1x1024xf32>
    %450 = vector.broadcast %449 : vector<1x1024xf32> to vector<8x1024xf32>
    %451 = arith.mulf %448, %450 : vector<8x1024xf32>
    %452 = vector.extract_strided_slice %441 {offsets = [0, 8], sizes = [8, 8], strides = [1, 1]} : vector<8x72xf32> to vector<8x8xf32>
    %cst_188 = arith.constant dense<0.000000e+00> : vector<8x1024xf32>
    %453 = tpu.matmul %452, %451, %cst_188 {dimension_numbers = #tpu.dot_dimension_numbers<[1], [0], [0], [1], [0, 0, 1, 1], [], []>} : vector<8x8xf32>, vector<8x1024xf32>, vector<8x1024xf32> -> vector<8x1024xf32>
    %454 = arith.addf %447, %453 : vector<8x1024xf32>
    %c31_i32_189 = arith.constant 31 : i32
    %455 = tpu.dynamic_rotate %440 by %c31_i32_189 dim 1 : vector<8x1024xf32>, i32 -> vector<8x1024xf32>
    %c2_190 = arith.constant 2 : index
    %c0_191 = arith.constant 0 : index
    %456 = vector.load %arg6[%c2_190, %c0_191] : memref<9x1024xf32, #tpu.memory_space<vmem>>, vector<1x1024xf32>
    %457 = vector.broadcast %456 : vector<1x1024xf32> to vector<8x1024xf32>
    %458 = arith.mulf %455, %457 : vector<8x1024xf32>
    %459 = vector.extract_strided_slice %441 {offsets = [0, 16], sizes = [8, 8], strides = [1, 1]} : vector<8x72xf32> to vector<8x8xf32>
    %cst_192 = arith.constant dense<0.000000e+00> : vector<8x1024xf32>
    %460 = tpu.matmul %459, %458, %cst_192 {dimension_numbers = #tpu.dot_dimension_numbers<[1], [0], [0], [1], [0, 0, 1, 1], [], []>} : vector<8x8xf32>, vector<8x1024xf32>, vector<8x1024xf32> -> vector<8x1024xf32>
    %461 = arith.addf %454, %460 : vector<8x1024xf32>
    %c1_i32_193 = arith.constant 1 : i32
    %462 = tpu.dynamic_rotate %440 by %c1_i32_193 dim 1 : vector<8x1024xf32>, i32 -> vector<8x1024xf32>
    %c3_194 = arith.constant 3 : index
    %c0_195 = arith.constant 0 : index
    %463 = vector.load %arg6[%c3_194, %c0_195] : memref<9x1024xf32, #tpu.memory_space<vmem>>, vector<1x1024xf32>
    %464 = vector.broadcast %463 : vector<1x1024xf32> to vector<8x1024xf32>
    %465 = arith.mulf %462, %464 : vector<8x1024xf32>
    %466 = vector.extract_strided_slice %441 {offsets = [0, 24], sizes = [8, 8], strides = [1, 1]} : vector<8x72xf32> to vector<8x8xf32>
    %cst_196 = arith.constant dense<0.000000e+00> : vector<8x1024xf32>
    %467 = tpu.matmul %466, %465, %cst_196 {dimension_numbers = #tpu.dot_dimension_numbers<[1], [0], [0], [1], [0, 0, 1, 1], [], []>} : vector<8x8xf32>, vector<8x1024xf32>, vector<8x1024xf32> -> vector<8x1024xf32>
    %468 = arith.addf %461, %467 : vector<8x1024xf32>
    %469 = vector.extract_strided_slice %441 {offsets = [0, 32], sizes = [8, 8], strides = [1, 1]} : vector<8x72xf32> to vector<8x8xf32>
    %cst_197 = arith.constant dense<0.000000e+00> : vector<8x1024xf32>
    %470 = tpu.matmul %469, %440, %cst_197 {dimension_numbers = #tpu.dot_dimension_numbers<[1], [0], [0], [1], [0, 0, 1, 1], [], []>} : vector<8x8xf32>, vector<8x1024xf32>, vector<8x1024xf32> -> vector<8x1024xf32>
    %471 = arith.addf %468, %470 : vector<8x1024xf32>
    %c1023_i32_198 = arith.constant 1023 : i32
    %472 = tpu.dynamic_rotate %440 by %c1023_i32_198 dim 1 : vector<8x1024xf32>, i32 -> vector<8x1024xf32>
    %c5_199 = arith.constant 5 : index
    %c0_200 = arith.constant 0 : index
    %473 = vector.load %arg6[%c5_199, %c0_200] : memref<9x1024xf32, #tpu.memory_space<vmem>>, vector<1x1024xf32>
    %474 = vector.broadcast %473 : vector<1x1024xf32> to vector<8x1024xf32>
    %475 = arith.mulf %472, %474 : vector<8x1024xf32>
    %476 = vector.extract_strided_slice %441 {offsets = [0, 40], sizes = [8, 8], strides = [1, 1]} : vector<8x72xf32> to vector<8x8xf32>
    %cst_201 = arith.constant dense<0.000000e+00> : vector<8x1024xf32>
    %477 = tpu.matmul %476, %475, %cst_201 {dimension_numbers = #tpu.dot_dimension_numbers<[1], [0], [0], [1], [0, 0, 1, 1], [], []>} : vector<8x8xf32>, vector<8x1024xf32>, vector<8x1024xf32> -> vector<8x1024xf32>
    %478 = arith.addf %471, %477 : vector<8x1024xf32>
    %c993_i32_202 = arith.constant 993 : i32
    %479 = tpu.dynamic_rotate %440 by %c993_i32_202 dim 1 : vector<8x1024xf32>, i32 -> vector<8x1024xf32>
    %c6_203 = arith.constant 6 : index
    %c0_204 = arith.constant 0 : index
    %480 = vector.load %arg6[%c6_203, %c0_204] : memref<9x1024xf32, #tpu.memory_space<vmem>>, vector<1x1024xf32>
    %481 = vector.broadcast %480 : vector<1x1024xf32> to vector<8x1024xf32>
    %482 = arith.mulf %479, %481 : vector<8x1024xf32>
    %483 = vector.extract_strided_slice %441 {offsets = [0, 48], sizes = [8, 8], strides = [1, 1]} : vector<8x72xf32> to vector<8x8xf32>
    %cst_205 = arith.constant dense<0.000000e+00> : vector<8x1024xf32>
    %484 = tpu.matmul %483, %482, %cst_205 {dimension_numbers = #tpu.dot_dimension_numbers<[1], [0], [0], [1], [0, 0, 1, 1], [], []>} : vector<8x8xf32>, vector<8x1024xf32>, vector<8x1024xf32> -> vector<8x1024xf32>
    %485 = arith.addf %478, %484 : vector<8x1024xf32>
    %c992_i32_206 = arith.constant 992 : i32
    %486 = tpu.dynamic_rotate %440 by %c992_i32_206 dim 1 : vector<8x1024xf32>, i32 -> vector<8x1024xf32>
    %c7_207 = arith.constant 7 : index
    %c0_208 = arith.constant 0 : index
    %487 = vector.load %arg6[%c7_207, %c0_208] : memref<9x1024xf32, #tpu.memory_space<vmem>>, vector<1x1024xf32>
    %488 = vector.broadcast %487 : vector<1x1024xf32> to vector<8x1024xf32>
    %489 = arith.mulf %486, %488 : vector<8x1024xf32>
    %490 = vector.extract_strided_slice %441 {offsets = [0, 56], sizes = [8, 8], strides = [1, 1]} : vector<8x72xf32> to vector<8x8xf32>
    %cst_209 = arith.constant dense<0.000000e+00> : vector<8x1024xf32>
    %491 = tpu.matmul %490, %489, %cst_209 {dimension_numbers = #tpu.dot_dimension_numbers<[1], [0], [0], [1], [0, 0, 1, 1], [], []>} : vector<8x8xf32>, vector<8x1024xf32>, vector<8x1024xf32> -> vector<8x1024xf32>
    %492 = arith.addf %485, %491 : vector<8x1024xf32>
    %c991_i32_210 = arith.constant 991 : i32
    %493 = tpu.dynamic_rotate %440 by %c991_i32_210 dim 1 : vector<8x1024xf32>, i32 -> vector<8x1024xf32>
    %c8_211 = arith.constant 8 : index
    %c0_212 = arith.constant 0 : index
    %494 = vector.load %arg6[%c8_211, %c0_212] : memref<9x1024xf32, #tpu.memory_space<vmem>>, vector<1x1024xf32>
    %495 = vector.broadcast %494 : vector<1x1024xf32> to vector<8x1024xf32>
    %496 = arith.mulf %493, %495 : vector<8x1024xf32>
    %497 = vector.extract_strided_slice %441 {offsets = [0, 64], sizes = [8, 8], strides = [1, 1]} : vector<8x72xf32> to vector<8x8xf32>
    %cst_213 = arith.constant dense<0.000000e+00> : vector<8x1024xf32>
    %498 = tpu.matmul %497, %496, %cst_213 {dimension_numbers = #tpu.dot_dimension_numbers<[1], [0], [0], [1], [0, 0, 1, 1], [], []>} : vector<8x8xf32>, vector<8x1024xf32>, vector<8x1024xf32> -> vector<8x1024xf32>
    %499 = arith.addf %492, %498 : vector<8x1024xf32>
    %500 = vector.extract_strided_slice %499 {offsets = [0, 0], sizes = [1, 1024], strides = [1, 1]} : vector<8x1024xf32> to vector<1x1024xf32>
    %c0_214 = arith.constant 0 : index
    %c0_215 = arith.constant 0 : index
    %c0_216 = arith.constant 0 : index
    %501 = vector.load %arg9[%c0_214, %c0_215, %c0_216] : memref<1x1x1024xf32, #tpu.memory_space<vmem>>, vector<1x1x1024xf32>
    %502 = vector.shape_cast %501 : vector<1x1x1024xf32> to vector<1x1024xf32>
    %503 = vector.shape_cast %500 : vector<1x1024xf32> to vector<1x1x1024xf32>
    tpu.vector_store %arg9[%c0_214, %c0_215, %c0_216], %503 {strides = array<i32>} : memref<1x1x1024xf32, #tpu.memory_space<vmem>>, vector<1x1x1024xf32>,
    return
  }
  func.func @transform_0(%arg0: i32) -> (i32, i32, i32) {
    %c0_i32 = arith.constant 0 : i32
    %c0_i32_0 = arith.constant 0 : i32
    %c0_i32_1 = arith.constant 0 : i32
    return %arg0, %c0_i32, %c0_i32_0 : i32, i32, i32
  }
  func.func @transform_1(%arg0: i32) -> (i32, i32) {
    %c0_i32 = arith.constant 0 : i32
    %c0_i32_0 = arith.constant 0 : i32
    %c0_i32_1 = arith.constant 0 : i32
    return %c0_i32, %c0_i32_0 : i32, i32
  }
  func.func @transform_2(%arg0: i32) -> (i32, i32) {
    %c0_i32 = arith.constant 0 : i32
    %c0_i32_0 = arith.constant 0 : i32
    %c0_i32_1 = arith.constant 0 : i32
    return %c0_i32, %c0_i32_0 : i32, i32
  }
  func.func @transform_3(%arg0: i32) -> (i32, i32) {
    %c0_i32 = arith.constant 0 : i32
    %c0_i32_0 = arith.constant 0 : i32
    %c0_i32_1 = arith.constant 0 : i32
    return %c0_i32, %c0_i32_0 : i32, i32
  }
  func.func @transform_4(%arg0: i32) -> (i32, i32) {
    %c0_i32 = arith.constant 0 : i32
    %c0_i32_0 = arith.constant 0 : i32
    %c0_i32_1 = arith.constant 0 : i32
    return %c0_i32, %c0_i32_0 : i32, i32
  }
  func.func @transform_5(%arg0: i32) -> (i32, i32) {
    %c0_i32 = arith.constant 0 : i32
    %c0_i32_0 = arith.constant 0 : i32
    %c0_i32_1 = arith.constant 0 : i32
    return %c0_i32, %c0_i32_0 : i32, i32
  }
  func.func @transform_6(%arg0: i32) -> (i32, i32) {
    %c0_i32 = arith.constant 0 : i32
    %c0_i32_0 = arith.constant 0 : i32
    %c0_i32_1 = arith.constant 0 : i32
    return %c0_i32, %c0_i32_0 : i32, i32
  }
  func.func @transform_7(%arg0: i32) -> (i32, i32, i32) {
    %c0_i32 = arith.constant 0 : i32
    %c0_i32_0 = arith.constant 0 : i32
    %c0_i32_1 = arith.constant 0 : i32
    return %arg0, %c0_i32, %c0_i32_0 : i32, i32, i32
  }
  func.func @transform_8(%arg0: i32) -> (i32, i32, i32) {
    %c0_i32 = arith.constant 0 : i32
    %c0_i32_0 = arith.constant 0 : i32
    %c0_i32_1 = arith.constant 0 : i32
    return %arg0, %c0_i32, %c0_i32_0 : i32, i32, i32
  }
}

</mosaic_0001>

<bundles_post_ra>
// kernel: apply.1
= control target key start
LH: loop header
LB: loop body
LE: loop exit
PB: predicated region body
PF: predicated region fallthrough
CT: control target
= control target key end

     0   :  { %14 = vsyncpa [#allocation4], 0  ;;  %s13224_s0 = inlined_call_operand.vmem [shape: f32[2,4,256], index: 0, kind: input, shape index: {}]   ;;  %s13225_s1 = inlined_call_operand.vmem [shape: f32[8,200], index: 1, kind: input, shape index: {}]   ;;  %s13226_s2 = inlined_call_operand.hbm [shape: f32[25,256], index: 2, kind: input, shape index: {}]   ;;  %s13227_s3 = inlined_call_operand.vmem [shape: f32[16,32], index: 3, kind: input, shape index: {}]   ;;  %s13228_s4 = inlined_call_operand.hbm [shape: f32[8,72], index: 4, kind: input, shape index: {}]   ;;  %s13229_s5 = inlined_call_operand.vmem [shape: f32[9,1024], index: 5, kind: input, shape index: {}]   ;;  %s13230_s6 = inlined_call_operand.vmem [shape: f32[8,72], index: 6, kind: input, shape index: {}]   ;;  %s13231_s7 = inlined_call_operand.vmem [shape: f32[2,8,256], index: 7, kind: output, shape index: {0}]   ;;  %s13232_s8 = inlined_call_operand.vmem [shape: f32[2,1,1024], index: 8, kind: output, shape index: {1}]  }
   0x1   :  { %15 = vsyncpa [#allocation6], 0  ;;  %s11326_s27 = smov 0  }
   0x2 LB: > { %s11332_s28 = sadd.s32 4294967295, %s11236_s27   ;;  %p10565_p0 = scmp.ge.s32.totalorder %s11236_s27, 1  ;;  %s11236_s27 = sphi %s11326_s27, %s21_s27  }
   0x3   : > { %p230_p1 = scmp.lt.s32.totalorder %s11236_s27, 3  ;;  %s11238_s29 = smov [#allocation3]  }
   0x4   : > { %s245_s30 = sshll.u32 %s11238_s29, 4  ;;  %p13233_p3 = scmp.eq.s32.totalorder %s11332_s28, 0  ;;  %s246_s30 = int_to_ptr.vmem [resolvable:$true] %s245_s30 }
   0x5   : > { %p11336_p2 = pnand %p10565_p0, %p230_p1  ;;  %s11239_s10 = smov [#allocation5]  }
   0x6   : > { %s262_s11 = sshll.u32 %s11239_s10, 4  ;;  %s11166_s15 = scalar_lea.hbm %s13226_s2, 1024  ;;  %s11349_s11 = int_to_ptr.vmem [resolvable:$true] %s262_s11 }
   0x7   : > { %s13267_s9 = scalar_select %p11336_p2, 1, 0 }
   0x8   : > { %p11102_p4 = pneg %p11336_p2  ;;  %p11167_p6 = scmp.ne.s32.totalorder %s13226_s2, %s11166_s15 }
   0x9   : > { %p11173_p10 = scmp.lt.u32.totalorder %s11166_s15, %s13226_s2 }
   0xa   : > { %p11345_p5 = pnand %p13233_p3, %p11102_p4 }
   0xc   : > { %p11168_p7 = pneg %p11345_p5 }
   0xe   : > { %p11169_p8 = pnand %p11168_p7, %p11167_p6 }
  0x10   : > { %p11170_p9 = pneg %p11169_p8 }
  0x12   : > { %p11175_p11 = pnand %p11173_p10, %p11170_p9 }
  0x14   : > { %11178 = shalt.err (!%p11175_p11)
}
  0x15   : > { %s11179_s20 = scalar_lea.vmem %s246_s30, 1024  ;;  %p11187_p1 = scmp.lt.s32.totalorder %s246_s30, %s246_s30 }
  0x16   : > { %p11180_p12 = scmp.ne.s32.totalorder %s246_s30, %s11179_s20  ;;  %p11188_p4 = scmp.lt.s32.totalorder %s11179_s20, %s11179_s20 }
  0x18   : > { %p11182_p13 = pnand %p11180_p12, %p11168_p7  ;;  %p11189_p3 = por %p11188_p4, %p11187_p1 }
  0x1a   : > { %p11183_p0 = pneg %p11182_p13 }
  0x1c   : > { %p11190_p2 = pnand %p11189_p3, %p11183_p0 }
  0x1e   : > { %11193 = shalt.err (!%p11190_p2)
}
  0x1f   : > { %s11240_s21 = smov 256   ;;  %s11241_s22 = smov 16  }
  0x20   : > { %11105 = dma.hbm_to_vmem [thread:$0]  (!%p11345_p5), %s13226_s2, 1024, %s246_s30, [#allocation4], %s11240_s21, %s11240_s21, %s11241_s22  }
  0x21   : > { %s11194_s29 = scalar_lea.hbm %s13228_s4, 128 }
  0x22   : > { %p11195_p6 = scmp.ne.s32.totalorder %s13228_s4, %s11194_s29  ;;  %p11201_p8 = scmp.lt.u32.totalorder %s11194_s29, %s13228_s4 }
  0x24   : > { %p11197_p2 = pnand %p11195_p6, %p11168_p7 }
  0x26   : > { %p11198_p3 = pneg %p11197_p2 }
  0x28   : > { %p11203_p9 = pnand %p11201_p8, %p11198_p3 }
  0x2a   : > { %11206 = shalt.err (!%p11203_p9)
}
  0x2b   : > { %s11207_s30 = scalar_lea.vmem %s11349_s11, 128  ;;  %p11215_p13 = scmp.lt.s32.totalorder %s11349_s11, %s11349_s11 }
  0x2c   : > { %p11208_p10 = scmp.ne.s32.totalorder %s11349_s11, %s11207_s30  ;;  %p11216_p0 = scmp.lt.s32.totalorder %s11207_s30, %s11207_s30 }
  0x2e   : > { %p11210_p11 = pnand %p11208_p10, %p11168_p7  ;;  %p11217_p1 = por %p11216_p0, %p11215_p13 }
  0x30   : > { %p11211_p12 = pneg %p11210_p11 }
  0x32   : > { %p11218_p4 = pnand %p11217_p1, %p11211_p12 }
  0x34   : > { %11221 = shalt.err (!%p11218_p4)
}
  0x35   : > { %11108 = dma.hbm_to_vmem [thread:$0]  (!%p11345_p5), %s13228_s4, 128, %s11349_s11, [#allocation6]  }
  0x36   : > { %p13269_p6 = scmp.ne.s32.totalorder %s13267_s9, 0 }
  0x38   : > { %289 = sbr.rel (%p13269_p6) target bundleno = 2043 (0x7fb), region = 48 }
  0x3f   : > { %p13270_p2 = scmp.eq.s32.totalorder %s11332_s28, 0 }
  0x41   : > { %11227 = dma.done.wait (%p13270_p2), [#allocation4], 1024   ;;  %p13271_p7 = pmov %p13270_p2 }
  0x42   : > { %p13272_p3 = pmov %p13270_p2 }
  0x43   : > { %11229 = vsyncadd (%p13271_p7), [#allocation4], 4294966272 }
  0x44   : > { %11231 = dma.done.wait (%p13272_p3), [#allocation6], 128   ;;  %p13273_p8 = pmov %p13270_p2 }
  0x45   : > { %p331_p9 = scmp.lt.s32.totalorder %s11332_s28, 1  ;;  %v13261_v0 = vmov 0.0   ;;  %vm349_vm0 = vcmask 1043456   ;;  %v11425_v2 = vld [vmem:[%s13225_s1] sm:$0xff]  ;;  %s11243_s21 = smov 96   ;;  %v11496_v6 = vld [vmem:[%s13225_s1 + $0x8] sm:$0xff]  ;;  %v358_v7 = vlaneseq }
  0x46   : > { %11233 = vsyncadd (%p13273_p8), [#allocation6], 4294967168  ;;  %837 = vmatprep.mubr.f32.mxu0 %v13261_v0  ;;  %469 = vmatprep.mubr.f32.mxu1 %v13261_v0  ;;  %s11244_s22 = smov 30   ;;  %s11245_s23 = smov 18   ;;  %vm402_vm3 = vcmask 64512  }
  0x47   : > { %s13331_s28 = smov (!%p331_p9, %s11332_s28), 1  ;;  %769 = vrot.lane.b32.xlu1 %v11425_v2, %s11243_s21  ;;  %s11246_s24 = smov 88   ;;  %v11526_v8 = vshrl.u32 %v358_v7, 7  ;;  %v11532_v9 = vand.u32 127, %v358_v7 }
  0x48   : > { %s13235_s9 = sshll.u32 %s13331_s28, 3  ;;  %s11247_s25 = smov 17   ;;  %v755_v13 = vld [vmem:[#allocation3 + $0x4] ss:$8 sm:$0x3] }
  0x49   : > { %s335_s18 = scalar_lea.vmem %s13224_s0, %s13235_s9  ;;  %s11248_s26 = smov 16   ;;  %13274 = vst [vmem:[#allocation9_spill] sm:$0xff] %v11526_v8  ;;  %v11535_v10 = vsub.s32 0, %v11526_v8  ;;  %v11538_v11 = vsub.s32 1, %v11526_v8  ;;  %vm751_vm1 = vcmp.lt.s32.totalorder %v11532_v9, 30  ;;  %vm850_vm2 = vcmp.lt.s32.totalorder %v11532_v9, 18 }
  0x4a   : > { %v11420_v1 = vld [vmem:[%s335_s18] sm:$0xff]  ;;  %s11249_s29 = smov 80   ;;  %s11250_s10 = smov 72   ;;  %vm949_vm4 = vcmp.lt.s32.totalorder %v11532_v9, 17  ;;  %vm1048_vm5 = vcmp.lt.s32.totalorder %v11532_v9, 16  ;;  %vm1147_vm6 = vcmp.lt.s32.totalorder %v11532_v9, 15 }
  0x4b   : > { %v11429_v3 = vsel %vm349_vm0, %v11420_v1, 0.0  ;;  %v11435_v4 = vcombine.high %v11420_v1, %v11420_v1  ;;  %s11251_s13 = smov 15   ;;  %s11252_s14 = smov 14   ;;  %v764_v15 = vrot.slane %v755_v13, %v11538_v11  ;;  %v760_v16 = vrot.slane %v755_v13, %v11535_v10  ;;  %v854_v18 = vld [vmem:[#allocation3 + $0x5] ss:$8 sm:$0x3] }
  0x4c   : > { %747 = vrot.lane.b32.xlu0 %v11429_v3, %s11244_s22  ;;  %846 = vrot.lane.b32.xlu1 %v11429_v3, %s11245_s23  ;;  %s13238_s15 = smov 64   ;;  %s11254_s30 = smov 56   ;;  %v859_v23 = vrot.slane %v854_v18, %v11535_v10  ;;  %v863_v25 = vrot.slane %v854_v18, %v11538_v11  ;;  %v953_v27 = vld [vmem:[#allocation3 + $0x6] ss:$8 sm:$0x3]  ;;  %vm1246_vm7 = vcmp.lt.s32.totalorder %v11532_v9, 14 }
  0x4d   : > { %v11440_v5 = vsel %vm349_vm0, %v11435_v4, 0.0  ;;  %s11255_s16 = smov 2   ;;  %s11256_s17 = smov 1   ;;  %v962_v33 = vrot.slane %v953_v27, %v11538_v11  ;;  %v958_v34 = vrot.slane %v953_v27, %v11535_v10  ;;  %v1052_v42 = vld [vmem:[#allocation3 + $0x7] ss:$8 sm:$0x3] }
  0x4e   : > { %s11257_s11 = smov 48   ;;  %s11258_s12 = smov 40   ;;  %v1061_v44 = vrot.slane %v1052_v42, %v11538_v11  ;;  %v1057_v45 = vrot.slane %v1052_v42, %v11535_v10  ;;  %v1151_v47 = vld [vmem:[#allocation3 + $0x10] ss:$8 sm:$0x3]  ;;  %vm1345_vm8 = vcmp.lt.s32.totalorder %v11532_v9, 2 }
  0x4f   : > { %s11259_s18 = smov 127   ;;  %s11260_s19 = smov 32   ;;  %v1160_v52 = vrot.slane %v1151_v47, %v11538_v11  ;;  %v1156_v58 = vrot.slane %v1151_v47, %v11535_v10  ;;  %v1250_v60 = vld [vmem:[#allocation3 + $0x11] ss:$8 sm:$0x3]  ;;  %vm1444_vm9 = vcmp.lt.s32.totalorder %v11532_v9, 1 }
  0x50   : > { %749 = vrot.lane.b32.xlu0 %v11440_v5, %s11244_s22  ;;  %868 = vrot.lane.b32.xlu1 %v11425_v2, %s11246_s24  ;;  %s11261_s20 = smov 24   ;;  %s11262_s22 = smov 126   ;;  %v1259_v63 = vrot.slane %v1250_v60, %v11538_v11  ;;  %v1349_v13 = vld [vmem:[#allocation3 + $0x12] ss:$8 sm:$0x3]  ;;  %vm1620_vm10 = vcmp.lt.s32.totalorder %v11532_v9, 127 }
  0x51   : > { %vm1719_vm11 = vcmp.lt.s32.totalorder %v11532_v9, 126  ;;  %vm1818_vm12 = vcmp.lt.s32.totalorder %v11532_v9, 114  ;;  %vm1917_vm13 = vcmp.lt.s32.totalorder %v11532_v9, 113  ;;  %vm2015_vm14 = vcmp.lt.s32.totalorder %v11532_v9, 112 }
  0x52   : > { %vm381_vm15 = vcmp.lt.s32.totalorder %v11532_v9, 33 }
  0x54   : > { %848 = vrot.lane.b32.xlu0 %v11440_v5, %s11245_s23  ;;  %947 = vrot.lane.b32.xlu1 %v11440_v5, %s11247_s25  ;;  %s11263_s23 = smov 114  }
  0x58   : > { %945 = vrot.lane.b32.xlu0 %v11429_v3, %s11247_s25  ;;  %1044 = vrot.lane.b32.xlu1 %v11429_v3, %s11248_s26  ;;  %s11264_s25 = smov 8  }
  0x5c   : > { %967 = vrot.lane.b32.xlu0 %v11425_v2, %s11249_s29  ;;  %1066 = vrot.lane.b32.xlu1 %v11425_v2, %s11250_s10 }
  0x60   : > { %1046 = vrot.lane.b32.xlu0 %v11440_v5, %s11248_s26  ;;  %1145 = vrot.lane.b32.xlu1 %v11440_v5, %s11251_s13 }
  0x64   : > { %1143 = vrot.lane.b32.xlu0 %v11429_v3, %s11251_s13  ;;  %1242 = vrot.lane.b32.xlu1 %v11429_v3, %s11252_s14  ;;  %s11265_s13 = smov 113  }
  0x68   : > { %1165 = vrot.lane.b32.xlu0 %v11425_v2, %s13238_s15  ;;  %1264 = vrot.lane.b32.xlu1 %v11425_v2, %s11254_s30  ;;  %s11273_s30 = smov 97  }
  0x6c   : > { %1244 = vrot.lane.b32.xlu0 %v11440_v5, %s11252_s14  ;;  %1343 = vrot.lane.b32.xlu1 %v11440_v5, %s11255_s16  ;;  %s11266_s14 = smov 112  }
  0x70   : > { %1341 = vrot.lane.b32.xlu0 %v11429_v3, %s11255_s16  ;;  %1440 = vrot.lane.b32.xlu1 %v11429_v3, %s11256_s17  ;;  %s11274_s16 = smov 34  }
  0x74   : > { %1363 = vrot.lane.b32.xlu0 %v11425_v2, %s11257_s11  ;;  %1462 = vrot.lane.b32.xlu1 %v11425_v2, %s11258_s12  ;;  %s11267_s12 = smov 111  }
  0x78   : > { %1442 = vrot.lane.b32.xlu0 %v11440_v5, %s11256_s17  ;;  %1616 = vrot.lane.b32.xlu1 %v11429_v3, %s11259_s18 }
  0x7c   : > { %1539 = vrot.lane.b32.xlu0 %v11425_v2, %s11260_s19  ;;  %1638 = vrot.lane.b32.xlu1 %v11425_v2, %s11261_s20  ;;  %s11268_s20 = smov 120  }
  0x80   : > { %1618 = vrot.lane.b32.xlu0 %v11440_v5, %s11259_s18  ;;  %1717 = vrot.lane.b32.xlu1 %v11440_v5, %s11262_s22 }
  0x84   : > { %1715 = vrot.lane.b32.xlu0 %v11429_v3, %s11262_s22  ;;  %1814 = vrot.lane.b32.xlu1 %v11429_v3, %s11263_s23  ;;  %s11269_s22 = smov 110  }
  0x88   : > { %1737 = vrot.lane.b32.xlu0 %v11425_v2, %s11248_s26  ;;  %1836 = vrot.lane.b32.xlu1 %v11425_v2, %s11264_s25  ;;  %s11271_s25 = smov 104  }
  0x8c   : > { %1816 = vrot.lane.b32.xlu0 %v11440_v5, %s11263_s23  ;;  %1915 = vrot.lane.b32.xlu1 %v11440_v5, %s11265_s13  ;;  %s11270_s23 = smov 98  }
  0x90   : > { %1913 = vrot.lane.b32.xlu0 %v11429_v3, %s11265_s13  ;;  %2013 = vrot.lane.b32.xlu1 %v11440_v5, %s11266_s14  ;;  %s11272_s13 = smov 33  }
  0x94   : > { %2011 = vrot.lane.b32.xlu0 %v11429_v3, %s11266_s14  ;;  %2110 = vrot.lane.b32.xlu1 %v11429_v3, %s11267_s12 }
  0x98   : > { %2033 = vrot.lane.b32.xlu0 %v11496_v6, %s11268_s20  ;;  %2132 = vrot.lane.b32.xlu1 %v11496_v6, %s11266_s14 }
  0x9c   : > { %2112 = vrot.lane.b32.xlu0 %v11440_v5, %s11267_s12  ;;  %2211 = vrot.lane.b32.xlu1 %v11440_v5, %s11269_s22  ;;  %s13236_s12 = smov 95  }
  0xa0   : > { %2209 = vrot.lane.b32.xlu0 %v11429_v3, %s11269_s22  ;;  %2308 = vrot.lane.b32.xlu1 %v11429_v3, %s11270_s23  ;;  %s11276_s22 = smov 31  }
  0xa4   : > { %2231 = vrot.lane.b32.xlu0 %v11496_v6, %s11271_s25  ;;  %2330 = vrot.lane.b32.xlu1 %v11496_v6, %s11243_s21 }
  0xa8   : > { %2310 = vrot.lane.b32.xlu0 %v11440_v5, %s11270_s23  ;;  %379 = vrot.lane.b32.xlu1 %v11440_v5, %s11272_s13  ;;  %s11277_s23 = smov 94  }
  0xac   : > { %377 = vrot.lane.b32.xlu0 %v11429_v3, %s11272_s13  ;;  %2409 = vrot.lane.b32.xlu1 %v11440_v5, %s11273_s30 }
  0xb0   : > { %2407 = vrot.lane.b32.xlu0 %v11429_v3, %s11273_s30  ;;  %2429 = vrot.lane.b32.xlu1 %v11496_v6, %s11246_s24 }
  0xb4   : > { %400 = vrot.lane.b32.xlu0 %v11425_v2, %s11268_s20  ;;  %356 = vrot.lane.b32.xlu1 %v11440_v5, %s11274_s16 }
  0xb8   : > { %354 = vrot.lane.b32.xlu0 %v11429_v3, %s11274_s16  ;;  %2508 = vrot.lane.b32.xlu1 %v11440_v5, %s11243_s21  ;;  %s10709_s16 = sshll.u32 %s13331_s28, 4 }
  0xb9   : > { %v770_v12 = vpop.permute.xlu1 %769 }
  0xbc   : > { %2506 = vrot.lane.b32.xlu0 %v11429_v3, %s11243_s21  ;;  %549 = vrot.lane.b32.xlu1 %v11429_v3, %s11260_s19 }
  0xbe   : > { %v748_v14 = vpop.permute.xlu0 %747  ;;  %v847_v17 = vpop.permute.xlu1 %846 }
  0xc0   : > { %2528 = vrot.lane.b32.xlu0 %v11496_v6, %s11249_s29  ;;  %2605 = vrot.lane.b32.xlu1 %v11429_v3, %s13236_s12 }
  0xc2   : > { %v750_v19 = vpop.permute.xlu0 %749  ;;  %v869_v26 = vpop.permute.xlu1 %868 }
  0xc3   : > { %v752_v20 = vsel %vm751_vm1, %v748_v14, %v750_v19  ;;  %v753_v21 = vsel %vm751_vm1, %v750_v19, %v748_v14  ;;  %v1358_v19 = vrot.slane %v1349_v13, %v11538_v11  ;;  %vm2213_vm1 = vcmp.lt.s32.totalorder %v11532_v9, 110 }
  0xc4   : > { %551 = vrot.lane.b32.xlu0 %v11440_v5, %s11260_s19  ;;  %v768_v22 = vmul.f32 %v764_v15, %v752_v20  ;;  %v767_v24 = vmul.f32 %v760_v16, %v753_v21  ;;  %571 = vrot.lane.b32.xlu1 %v11425_v2, %s11266_s14  ;;  %v1255_v15 = vrot.slane %v1250_v60, %v11535_v10 }
  0xc6   : > { %773 = vmatprep.subr.mxu0 %v768_v22  ;;  %v849_v28 = vpop.permute.xlu0 %848  ;;  %v948_v35 = vpop.permute.xlu1 %947 }
  0xc7   : > { %v851_v29 = vsel %vm850_vm2, %v847_v17, %v849_v28  ;;  %v852_v30 = vsel %vm850_vm2, %v849_v28, %v847_v17  ;;  %774 = vmatpush1.msra.mxu0 %v767_v24  ;;  %vm360_vm2 = vcmp.lt.s32.totalorder %v11532_v9, 34 }
  0xc8   : > { %v866_v31 = vmul.f32 %v859_v23, %v852_v30  ;;  %2607 = vrot.lane.b32.xlu0 %v11440_v5, %s13236_s12  ;;  %10581 = vmatmul.mubr.msk.f32.vlgmr.msra.gmra.mrb[0].mxu0 %vm402_vm3, %v770_v12  ;;  %v867_v32 = vmul.f32 %v863_v25, %v851_v29  ;;  %v1448_v25 = vld [vmem:[#allocation3 + $0x13] ss:$8 sm:$0x3]  ;;  %s13275_s12 = smov 95  }
  0xc9   : > { %936 = vmatprep.mubr.f32.mxu0 %v13261_v0  ;;  %648 = vrot.lane.b32.xlu1 %v11429_v3, %s11276_s22  ;;  %v1457_v30 = vrot.slane %v1448_v25, %v11538_v11 }
  0xca   : > { %872 = vmatprep.subr.mxu0 %v867_v32  ;;  %v946_v36 = vpop.permute.xlu0 %945  ;;  %v1045_v41 = vpop.permute.xlu1 %1044 }
  0xcb   : > { %v950_v37 = vsel %vm949_vm4, %v946_v36, %v948_v35  ;;  %v951_v38 = vsel %vm949_vm4, %v948_v35, %v946_v36  ;;  %873 = vmatpush1.msra.mxu0 %v866_v31  ;;  %v1453_v36 = vrot.slane %v1448_v25, %v11535_v10  ;;  %vm2312_vm4 = vcmp.lt.s32.totalorder %v11532_v9, 98 }
  0xcc   : > { %2627 = vrot.lane.b32.xlu0 %v11496_v6, %s11250_s10  ;;  %v966_v39 = vmul.f32 %v962_v33, %v950_v37  ;;  %v965_v40 = vmul.f32 %v958_v34, %v951_v38 }
  0xcd   : > { %2704 = vrot.lane.b32.xlu1 %v11429_v3, %s11277_s23 }
  0xce   : > { %v968_v43 = vpop.permute.xlu0 %967  ;;  %971 = vmatprep.subr.mxu0 %v966_v39  ;;  %v1067_v46 = vpop.permute.xlu1 %1066 }
  0xd0   : > { %650 = vrot.lane.b32.xlu0 %v11440_v5, %s11276_s22  ;;  %10582 = vmatmul.mubr.msk.f32.vlgmr.msra.gmra.mrb[0].mxu0 %vm402_vm3, %v869_v26  ;;  %v1354_v26 = vrot.slane %v1349_v13, %v11535_v10 }
  0xd1   : > { %972 = vmatpush1.msra.mxu0 %v965_v40  ;;  %1035 = vmatprep.mubr.f32.mxu0 %v13261_v0 }
  0xd2   : > { %v1047_v48 = vpop.permute.xlu0 %1046  ;;  %670 = vrot.lane.b32.xlu1 %v11425_v2, %s11271_s25  ;;  %v1146_v54 = vpop.permute.xlu1 %1145 }
  0xd3   : > { %v1049_v49 = vsel %vm1048_vm5, %v1045_v41, %v1047_v48  ;;  %v1050_v50 = vsel %vm1048_vm5, %v1047_v48, %v1045_v41  ;;  %vm553_vm5 = vcmp.lt.s32.totalorder %v11532_v9, 32 }
  0xd4   : > { %v1065_v51 = vmul.f32 %v1061_v44, %v1049_v49  ;;  %2706 = vrot.lane.b32.xlu0 %v11440_v5, %s11277_s23  ;;  %v1064_v53 = vmul.f32 %v1057_v45, %v1050_v50  ;;  %s340_s23 = scalar_lea.vmem %s13231_s7, %s10709_s16 }
  0xd6   : > { %v1144_v55 = vpop.permute.xlu0 %1143  ;;  %1070 = vmatprep.subr.mxu0 %v1065_v51  ;;  %v1243_v59 = vpop.permute.xlu1 %1242  ;;  %v1723_v51 = vld [vmem:[#allocation3 + $0x16] ss:$8 sm:$0x3] }
  0xd7   : > { %v1148_v56 = vsel %vm1147_vm6, %v1144_v55, %v1146_v54  ;;  %v1149_v61 = vsel %vm1147_vm6, %v1146_v54, %v1144_v55  ;;  %v1732_v55 = vrot.slane %v1723_v51, %v11538_v11  ;;  %vm2411_vm6 = vcmp.lt.s32.totalorder %v11532_v9, 97 }
  0xd8   : > { %10583 = vmatmul.mubr.msk.f32.vlgmr.msra.gmra.mrb[0].mxu0 %vm402_vm3, %v968_v43  ;;  %v1164_v57 = vmul.f32 %v1160_v52, %v1148_v56  ;;  %2726 = vrot.lane.b32.xlu0 %v11496_v6, %s13238_s15  ;;  %v1163_v3 = vmul.f32 %v1156_v58, %v1149_v61  ;;  %v1624_v43 = vld [vmem:[#allocation3 + $0x15] ss:$8 sm:$0x3]  ;;  %v1822_v61 = vld [vmem:[#allocation3 + $0x17] ss:$8 sm:$0x3] }
  0xd9   : > { %1071 = vmatpush1.msra.mxu0 %v1064_v53  ;;  %1134 = vmatprep.mubr.f32.mxu0 %v13261_v0  ;;  %v1629_v52 = vrot.slane %v1624_v43, %v11535_v10 }
  0xda   : > { %v1166_v62 = vpop.permute.xlu0 %1165  ;;  %1169 = vmatprep.subr.mxu0 %v1164_v57  ;;  %v1265_v5 = vpop.permute.xlu1 %1264 }
  0xde   : > { %v1245_v7 = vpop.permute.xlu0 %1244  ;;  %v1344_v16 = vpop.permute.xlu1 %1343 }
  0xdf   : > { %v1247_v12 = vsel %vm1246_vm7, %v1243_v59, %v1245_v7  ;;  %v1248_v17 = vsel %vm1246_vm7, %v1245_v7, %v1243_v59  ;;  %vm2510_vm7 = vcmp.lt.s32.totalorder %v11532_v9, 96 }
  0xe0   : > { %10584 = vmatmul.mubr.msk.f32.vlgmr.msra.gmra.mrb[0].mxu0 %vm402_vm3, %v1067_v46  ;;  %v1263_v14 = vmul.f32 %v1259_v63, %v1247_v12  ;;  %v1262_v21 = vmul.f32 %v1255_v15, %v1248_v17  ;;  %v1633_v46 = vrot.slane %v1624_v43, %v11538_v11  ;;  %v1827_v17 = vrot.slane %v1822_v61, %v11535_v10 }
  0xe1   : > { %1170 = vmatpush1.msra.mxu0 %v1163_v3  ;;  %1233 = vmatprep.mubr.f32.mxu0 %v13261_v0 }
  0xe2   : > { %v1342_v18 = vpop.permute.xlu0 %1341  ;;  %1268 = vmatprep.subr.mxu0 %v1263_v14  ;;  %v1441_v22 = vpop.permute.xlu1 %1440 }
  0xe3   : > { %v1346_v20 = vsel %vm1345_vm8, %v1342_v18, %v1344_v16  ;;  %v1347_v28 = vsel %vm1345_vm8, %v1344_v16, %v1342_v18  ;;  %v1921_v16 = vld [vmem:[#allocation3 + $0x20] ss:$8 sm:$0x3]  ;;  %vm652_vm8 = vcmp.lt.s32.totalorder %v11532_v9, 31 }
  0xe4   : > { %v1362_v24 = vmul.f32 %v1358_v19, %v1346_v20  ;;  %v1361_v32 = vmul.f32 %v1354_v26, %v1347_v28  ;;  %v1926_v28 = vrot.slane %v1921_v16, %v11535_v10 }
  0xe6   : > { %v1364_v23 = vpop.permute.xlu0 %1363  ;;  %v1463_v27 = vpop.permute.xlu1 %1462 }
  0xe8   : > { %10585 = vmatmul.mubr.msk.f32.vlgmr.msra.gmra.mrb[0].mxu0 %vm402_vm3, %v1166_v62 }
  0xe9   : > { %1269 = vmatpush1.msra.mxu0 %v1262_v21  ;;  %1332 = vmatprep.mubr.f32.mxu0 %v13261_v0  ;;  %v1930_v21 = vrot.slane %v1921_v16, %v11538_v11 }
  0xea   : > { %v1443_v29 = vpop.permute.xlu0 %1442  ;;  %1367 = vmatprep.subr.mxu0 %v1362_v24  ;;  %v1617_v33 = vpop.permute.xlu1 %1616 }
  0xeb   : > { %v1445_v31 = vsel %vm1444_vm9, %v1441_v22, %v1443_v29  ;;  %v1446_v38 = vsel %vm1444_vm9, %v1443_v29, %v1441_v22 }
  0xec   : > { %v1461_v35 = vmul.f32 %v1457_v30, %v1445_v31  ;;  %v1460_v40 = vmul.f32 %v1453_v36, %v1446_v38  ;;  %v385_v30 = vld [vmem:[#allocation3 + $0x1] ss:$8 sm:$0x3] }
  0xed   : > { %v390_v36 = vrot.slane %v385_v30, %v11535_v10 }
  0xee   : > { %v1540_v34 = vpop.permute.xlu0 %1539  ;;  %v1639_v37 = vpop.permute.xlu1 %1638 }
  0xf0   : > { %10586 = vmatmul.mubr.msk.f32.vlgmr.msra.gmra.mrb[0].mxu0 %vm402_vm3, %v1265_v5  ;;  %v1831_v5 = vrot.slane %v1822_v61, %v11538_v11 }
  0xf1   : > { %1368 = vmatpush1.msra.mxu0 %v1361_v32  ;;  %1431 = vmatprep.mubr.f32.mxu0 %v13261_v0 }
  0xf2   : > { %v1619_v39 = vpop.permute.xlu0 %1618  ;;  %1466 = vmatprep.subr.mxu0 %v1461_v35  ;;  %v1718_v41 = vpop.permute.xlu1 %1717  ;;  %v394_v35 = vrot.slane %v385_v30, %v11538_v11 }
  0xf3   : > { %v1622_v47 = vsel %vm1620_vm10, %v1619_v39, %v1617_v33 }
  0xf4   : > { %v1637_v50 = vmul.f32 %v1633_v46, %v1622_v47 }
  0xf6   : > { %v1716_v42 = vpop.permute.xlu0 %1715  ;;  %v1815_v44 = vpop.permute.xlu1 %1814 }
  0xf7   : > { %v1721_v56 = vsel %vm1719_vm11, %v1718_v41, %v1716_v42  ;;  %v1720_v63 = vsel %vm1719_vm11, %v1716_v42, %v1718_v41  ;;  %v2118_v41 = vld [vmem:[#allocation3 + $0x22] ss:$8 sm:$0x3]  ;;  %vm2609_vm11 = vcmp.lt.s32.totalorder %v11532_v9, 95 }
  0xf8   : > { %10587 = vmatmul.mubr.msk.f32.vlgmr.msra.gmra.mrb[0].mxu0 %vm402_vm3, %v1364_v23  ;;  %v1736_v60 = vmul.f32 %v1732_v55, %v1721_v56  ;;  %v2217_v56 = vld [vmem:[#allocation3 + $0x23] ss:$8 sm:$0x3] }
  0xf9   : > { %1467 = vmatpush1.msra.mxu0 %v1460_v40  ;;  %1530 = vmatprep.mubr.f32.mxu0 %v13261_v0  ;;  %v2226_v61 = vrot.slane %v2217_v56, %v11538_v11 }
  0xfa   : > { %v1738_v45 = vpop.permute.xlu0 %1737  ;;  %10589 = vmatprep.subr.msk.mxu0 %vm349_vm0, %v11435_v4  ;;  %v11620_v48 = vpop.permute.xlu1 %1836  ;;  %v1621_v4 = vsel %vm1620_vm10, %v1617_v33, %v1619_v39 }
  0xfb   : > { %v1636_v57 = vmul.f32 %v1629_v52, %v1621_v4 }
  0xfe   : > { %v1817_v49 = vpop.permute.xlu0 %1816  ;;  %v1916_v53 = vpop.permute.xlu1 %1915 }
  0xff   : > { %v1820_v7 = vsel %vm1818_vm12, %v1817_v49, %v1815_v44  ;;  %v1819_v19 = vsel %vm1818_vm12, %v1815_v44, %v1817_v49  ;;  %v2127_v49 = vrot.slane %v2118_v41, %v11538_v11  ;;  %vm2708_vm12 = vcmp.lt.s32.totalorder %v11532_v9, 94 }
 0x100   : > { %10588 = vmatmul.mubr.msk.f32.vlgmr.msra.gmra.mrb[0].mxu0 %vm402_vm3, %v1463_v27  ;;  %v1835_v15 = vmul.f32 %v1831_v5, %v1820_v7  ;;  %v1834_v23 = vmul.f32 %v1827_v17, %v1819_v19  ;;  %v2019_v27 = vld [vmem:[#allocation3 + $0x21] ss:$8 sm:$0x3] }
 0x101   : > { %10590 = vmatpush1.msk.msra.mxu0 %vm349_vm0, %v11420_v1  ;;  %1607 = vmatprep.mubr.f32.mxu0 %v13261_v0  ;;  %v1728_v1 = vrot.slane %v1723_v51, %v11535_v10  ;;  %v2028_v33 = vrot.slane %v2019_v27, %v11538_v11  ;;  %vm2114_vm0 = vcmp.lt.s32.totalorder %v11532_v9, 111 }
 0x102   : > { %v1914_v54 = vpop.permute.xlu0 %1913  ;;  %1642 = vmatprep.subr.mxu0 %v1637_v50  ;;  %v11633_v58 = vpop.permute.xlu1 %2013  ;;  %v2024_v50 = vrot.slane %v2019_v27, %v11535_v10  ;;  %v2222_v27 = vrot.slane %v2217_v56, %v11535_v10 }
 0x103   : > { %v1735_v12 = vmul.f32 %v1728_v1, %v1720_v63  ;;  %v1919_v22 = vsel %vm1917_vm13, %v1916_v53, %v1914_v54  ;;  %v1918_v31 = vsel %vm1917_vm13, %v1914_v54, %v1916_v53  ;;  %v363_v53 = vld [vmem:[#allocation3] ss:$8 sm:$0x3]  ;;  %v2123_v1 = vrot.slane %v2118_v41, %v11535_v10 }
 0x104   : > { %v1934_v26 = vmul.f32 %v1930_v21, %v1919_v22  ;;  %v2316_v22 = vld [vmem:[#allocation3 + $0x24] ss:$8 sm:$0x3]  ;;  %vm11279_vm13 = vmmov 0  }
 0x106   : > { %v11635_v59 = vpop.permute.xlu0 %2011  ;;  %v11640_v62 = vpop.permute.xlu1 %2110 }
 0x107   : > { %v2016_v51 = vsel %vm2015_vm14, %v11635_v59, %v11633_v58 }
 0x108   : > { %10591 = vmatmul.mubr.msk.f32.vlgmr.msra.gmra.mrb[0].mxu0 %vm402_vm3, %v1540_v34  ;;  %v2017_v34 = vsel %vm2015_vm14, %v11633_v58, %v11635_v59  ;;  %v2031_v55 = vmul.f32 %v2024_v50, %v2016_v51  ;;  %v372_v58 = vrot.slane %v363_v53, %v11538_v11  ;;  %v2514_v51 = vld [vmem:[#allocation3 + $0x26] ss:$8 sm:$0x3]  ;;  %vm2809_vm14 = vcmask 130048  }
 0x109   : > { %1643 = vmatpush1.msra.mxu0 %v1636_v57  ;;  %1706 = vmatprep.mubr.f32.mxu0 %v13261_v0  ;;  %v2032_v40 = vmul.f32 %v2028_v33, %v2017_v34  ;;  %v368_v57 = vrot.slane %v363_v53, %v11535_v10 }
 0x10a   : > { %v11645_v3 = vpop.permute.xlu0 %2033  ;;  %1741 = vmatprep.subr.mxu0 %v1736_v60  ;;  %v11650_v13 = vpop.permute.xlu1 %2132 }
 0x10e   : > { %v11652_v14 = vpop.permute.xlu0 %2112  ;;  %v11657_v18 = vpop.permute.xlu1 %2211 }
 0x10f   : > { %v2115_v7 = vsel %vm2114_vm0, %v11640_v62, %v11652_v14 }
 0x110   : > { %10592 = vmatmul.mubr.msk.f32.vlgmr.msra.gmra.mrb[0].mxu0 %vm402_vm3, %v1639_v37  ;;  %v1933_v37 = vmul.f32 %v1926_v28, %v1918_v31  ;;  %v2130_v21 = vmul.f32 %v2123_v1, %v2115_v7 }
 0x111   : > { %1742 = vmatpush1.msra.mxu0 %v1735_v12  ;;  %1805 = vmatprep.mubr.f32.mxu0 %v13261_v0 }
 0x112   : > { %v11662_v20 = vpop.permute.xlu0 %2209  ;;  %1840 = vmatprep.subr.mxu0 %v1835_v15  ;;  %v11667_v24 = vpop.permute.xlu1 %2308 }
 0x116   : > { %v11669_v25 = vpop.permute.xlu0 %2231  ;;  %v11674_v29 = vpop.permute.xlu1 %2330 }
 0x118   : > { %10593 = vmatmul.mubr.msk.f32.vlgmr.msra.gmra.mrb[0].mxu0 %vm402_vm3, %v1738_v45 }
 0x119   : > { %1841 = vmatpush1.msra.mxu0 %v1834_v23  ;;  %1904 = vmatprep.mubr.f32.mxu0 %v13261_v0 }
 0x11a   : > { %v11679_v32 = vpop.permute.xlu0 %2310  ;;  %1938 = vmatprep.subr.mxu0 %v1934_v26  ;;  %v380_v38 = vpop.permute.xlu1 %379  ;;  %v2325_v26 = vrot.slane %v2316_v22, %v11538_v11 }
 0x11e   : > { %v378_v39 = vpop.permute.xlu0 %377  ;;  %v11696_v46 = vpop.permute.xlu1 %2409 }
 0x11f   : > { %v382_v42 = vsel %vm381_vm15, %v378_v39, %v380_v38  ;;  %v383_v43 = vsel %vm381_vm15, %v380_v38, %v378_v39 }
 0x120   : > { %10594 = vmatmul.mubr.msk.f32.vlgmr.msra.gmra.mrb[0].mxu0 %vm402_vm3, %v11620_v48  ;;  %v398_v44 = vmul.f32 %v394_v35, %v382_v42  ;;  %v397_v45 = vmul.f32 %v390_v36, %v383_v43  ;;  %v2116_v48 = vsel %vm2114_vm0, %v11652_v14, %v11640_v62  ;;  %v557_v14 = vld [vmem:[#allocation3 + $0x2] ss:$8 sm:$0x3]  ;;  %v2415_v36 = vld [vmem:[#allocation3 + $0x25] ss:$8 sm:$0x3]  ;;  %v2321_v42 = vrot.slane %v2316_v22, %v11535_v10 }
 0x121   : > { %1939 = vmatpush1.msra.mxu0 %v1933_v37  ;;  %2002 = vmatprep.mubr.f32.mxu0 %v13261_v0  ;;  %v2131_v54 = vmul.f32 %v2127_v49, %v2116_v48  ;;  %v562_v28 = vrot.slane %v557_v14, %v11535_v10  ;;  %v566_v30 = vrot.slane %v557_v14, %v11538_v11  ;;  %vm4013_vm0 = vcmask 261120  }
 0x122   : > { %2037 = vmatprep.subr.mxu0 %v2032_v40  ;;  %v11699_v47 = vpop.permute.xlu0 %2407  ;;  %405 = vmatprep.subr.mxu1 %v398_v44  ;;  %v11711_v52 = vpop.permute.xlu1 %2429  ;;  %v2424_v41 = vrot.slane %v2415_v36, %v11538_v11 }
 0x123   : > { %406 = vmatpush1.msra.mxu1 %v397_v45  ;;  %v2413_v43 = vsel %vm2411_vm6, %v11696_v46, %v11699_v47  ;;  %v656_v45 = vld [vmem:[#allocation3 + $0x3] ss:$8 sm:$0x3] }
 0x124   : > { %v2428_v50 = vmul.f32 %v2424_v41, %v2413_v43  ;;  %v661_v53 = vrot.slane %v656_v45, %v11535_v10 }
 0x126   : > { %v401_v4 = vpop.permute.xlu0 %400  ;;  %v357_v59 = vpop.permute.xlu1 %356 }
 0x127   : > { %10577 = vmatmul.mubr.msk.f32.vlgmr.msra.gmra.mrb[0].mxu1 %vm402_vm3, %v401_v4 }
 0x128   : > { %10595 = vmatmul.mubr.msk.f32.vlgmr.msra.gmra.mrb[0].mxu0 %vm402_vm3, %v11496_v6  ;;  %542 = vmatprep.mubr.f32.mxu1 %v13261_v0  ;;  %v2215_v6 = vsel %vm2213_vm1, %v11657_v18, %v11662_v20 }
 0x129   : > { %2038 = vmatpush1.msra.mxu0 %v2031_v55  ;;  %2101 = vmatprep.mubr.f32.mxu0 %v13261_v0  ;;  %v2230_v19 = vmul.f32 %v2226_v61, %v2215_v6  ;;  %v2420_v55 = vrot.slane %v2415_v36, %v11535_v10 }
 0x12a   : > { %2136 = vmatprep.subr.mxu0 %v2131_v54  ;;  %v355_v60 = vpop.permute.xlu0 %354  ;;  %v11732_v16 = vpop.permute.xlu1 %2508  ;;  %v2523_v54 = vrot.slane %v2514_v51, %v11538_v11 }
 0x12b   : > { %v361_v63 = vsel %vm360_vm2, %v355_v60, %v357_v59  ;;  %v362_v5 = vsel %vm360_vm2, %v357_v59, %v355_v60  ;;  %vm4017_vm2 = vcmask 785408  }
 0x12c   : > { %v375_v12 = vmul.f32 %v368_v57, %v362_v5  ;;  %v376_v15 = vmul.f32 %v372_v58, %v361_v63  ;;  %v2412_v58 = vsel %vm2411_vm6, %v11699_v47, %v11696_v46  ;;  %v2613_v63 = vld [vmem:[#allocation3 + $0x27] ss:$8 sm:$0x3]  ;;  %v2519_v47 = vrot.slane %v2514_v51, %v11535_v10 }
 0x12d   : > { %v2427_v6 = vmul.f32 %v2420_v55, %v2412_v58  ;;  %v2622_v46 = vrot.slane %v2613_v63, %v11538_v11 }
 0x12e   : > { %v11734_v17 = vpop.permute.xlu0 %2506  ;;  %478 = vmatprep.subr.mxu1 %v376_v15  ;;  %v550_v62 = vpop.permute.xlu1 %549 }
 0x12f   : > { %479 = vmatpush1.msra.mxu1 %v375_v12  ;;  %v2511_v7 = vsel %vm2510_vm7, %v11734_v17, %v11732_v16 }
 0x130   : > { %10596 = vmatmul.mubr.msk.f32.vlgmr.msra.gmra.mrb[0].mxu0 %vm402_vm3, %v11645_v3  ;;  %10578 = vmatmul.mubr.msk.f32.vlgmr.msra.gmra.mrb[0].mxu1 %vm402_vm3, %v11425_v2  ;;  %v2314_v3 = vsel %vm2312_vm4, %v11679_v32, %v11667_v24  ;;  %v2214_v2 = vsel %vm2213_vm1, %v11662_v20, %v11657_v18  ;;  %v2526_v15 = vmul.f32 %v2519_v47, %v2511_v7  ;;  %vm4015_vm1 = vcmask 523264  }
 0x131   : > { %2137 = vmatpush1.msra.mxu0 %v2130_v21  ;;  %2200 = vmatprep.mubr.f32.mxu0 %v13261_v0  ;;  %v2329_v34 = vmul.f32 %v2325_v26, %v2314_v3  ;;  %v2229_v35 = vmul.f32 %v2222_v27, %v2214_v2  ;;  %v2618_v21 = vrot.slane %v2613_v63, %v11535_v10  ;;  %v2808_v2 = vld [vmem:[%s13227_s3 + $0x8] sm:$0xff] }
 0x132   : > { %2235 = vmatprep.subr.mxu0 %v2230_v19  ;;  %v11742_v23 = vpop.permute.xlu0 %2528  ;;  %639 = vmatprep.mubr.f32.mxu1 %v13261_v0  ;;  %v11758_v31 = vpop.permute.xlu1 %2605 }
 0x136   : > { %v552_v33 = vpop.permute.xlu0 %551  ;;  %v572_v39 = vpop.permute.xlu1 %571 }
 0x137   : > { %v554_v37 = vsel %vm553_vm5, %v550_v62, %v552_v33  ;;  %v555_v38 = vsel %vm553_vm5, %v552_v33, %v550_v62 }
 0x138   : > { %v569_v18 = vmul.f32 %v562_v28, %v555_v38  ;;  %10597 = vmatmul.mubr.msk.f32.vlgmr.msra.gmra.mrb[0].mxu0 %vm402_vm3, %v11650_v13  ;;  %v570_v20 = vmul.f32 %v566_v30, %v554_v37  ;;  %v2313_v13 = vsel %vm2312_vm4, %v11667_v24, %v11679_v32  ;;  %v665_v24 = vrot.slane %v656_v45, %v11538_v11 }
 0x139   : > { %2236 = vmatpush1.msra.mxu0 %v2229_v35  ;;  %2299 = vmatprep.mubr.f32.mxu0 %v13261_v0  ;;  %v2328_v48 = vmul.f32 %v2321_v42, %v2313_v13  ;;  %v11278_v30 = vmov 0.0|0.0  }
 0x13a   : > { %2334 = vmatprep.subr.mxu0 %v2329_v34  ;;  %v2608_v40 = vpop.permute.xlu0 %2607  ;;  %575 = vmatprep.subr.mxu1 %v570_v20 }
 0x13b   : > { %576 = vmatpush1.msra.mxu1 %v569_v18  ;;  %v649_v44 = vpop.permute.xlu1 %648  ;;  %v2611_v5 = vsel %vm2609_vm11, %v2608_v40, %v11758_v31  ;;  %v2610_v22 = vsel %vm2609_vm11, %v11758_v31, %v2608_v40 }
 0x13c   : > { %10579 = vmatmul.mubr.msk.f32.vlgmr.msra.gmra.mrb[0].mxu1 %vm402_vm3, %v572_v39  ;;  %v2626_v12 = vmul.f32 %v2622_v46, %v2611_v5  ;;  %v2625_v62 = vmul.f32 %v2618_v21, %v2610_v22 }
 0x13d   : > { %738 = vmatprep.mubr.f32.mxu1 %v13261_v0 }
 0x13e   : > { %v2628_v49 = vpop.permute.xlu0 %2627 }
 0x13f   : > { %v2705_v32 = vpop.permute.xlu1 %2704 }
 0x140   : > { %10598 = vmatmul.mubr.msk.f32.vlgmr.msra.gmra.mrb[0].mxu0 %vm402_vm3, %v11669_v25  ;;  %v2512_v25 = vsel %vm2510_vm7, %v11732_v16, %v11734_v17 }
 0x141   : > { %2335 = vmatpush1.msra.mxu0 %v2328_v48  ;;  %2398 = vmatprep.mubr.f32.mxu0 %v13261_v0  ;;  %v2527_v1 = vmul.f32 %v2523_v54, %v2512_v25 }
 0x142   : > { %2433 = vmatprep.subr.mxu0 %v2428_v50  ;;  %v651_v4 = vpop.permute.xlu0 %650 }
 0x143   : > { %v653_v56 = vsel %vm652_vm8, %v649_v44, %v651_v4  ;;  %v654_v57 = vsel %vm652_vm8, %v651_v4, %v649_v44 }
 0x144   : > { %v668_v59 = vmul.f32 %v661_v53, %v654_v57  ;;  %v669_v60 = vmul.f32 %v665_v24, %v653_v56  ;;  %v671_v61 = vpop.permute.xlu1 %670 }
 0x146   : > { %674 = vmatprep.subr.mxu1 %v669_v60  ;;  %v2707_v19 = vpop.permute.xlu0 %2706 }
 0x147   : > { %675 = vmatpush1.msra.mxu1 %v668_v59  ;;  %v2710_v17 = vsel %vm2708_vm12, %v2707_v19, %v2705_v32  ;;  %v2709_v26 = vsel %vm2708_vm12, %v2705_v32, %v2707_v19 }
 0x148   : > { %10580 = vmatmul.mubr.msk.f32.vlgmr.msra.gmra.mrb[0].mxu1 %vm402_vm3, %v671_v61  ;;  %10599 = vmatmul.mubr.msk.f32.vlgmr.msra.gmra.mrb[0].mxu0 %vm402_vm3, %v11674_v29  ;;  %v2712_v29 = vld [vmem:[#allocation3 + $0x30] ss:$8 sm:$0x3] }
 0x149   : > { %2434 = vmatpush1.msra.mxu0 %v2427_v6  ;;  %2497 = vmatprep.mubr.f32.mxu0 %v13261_v0  ;;  %v2721_v16 = vrot.slane %v2712_v29, %v11538_v11 }
 0x14a   : > { %2532 = vmatprep.subr.mxu0 %v2527_v1  ;;  %v2727_v3 = vpop.permute.xlu0 %2726  ;;  %10870 = vmatprep.subr.bf16.mxu1 %v11278_v30 }
 0x14b   : > { %v2725_v14 = vmul.f32 %v2721_v16, %v2710_v17  ;;  %10762 = vmatprep.mubr.msk.f32.mxu1 %vm11279_vm13, %v13261_v0 }
 0x150   : > { %10600 = vmatmul.mubr.msk.f32.vlgmr.msra.gmra.mrb[0].mxu0 %vm402_vm3, %v11711_v52  ;;  %v2717_v52 = vrot.slane %v2712_v29, %v11535_v10 }
 0x151   : > { %2533 = vmatpush1.msra.mxu0 %v2526_v15  ;;  %2596 = vmatprep.mubr.f32.mxu0 %v13261_v0 }
 0x152   : > { %2631 = vmatprep.subr.mxu0 %v2626_v12  ;;  %v2724_v27 = vmul.f32 %v2717_v52, %v2709_v26 }
 0x158   : > { %10601 = vmatmul.mubr.msk.f32.vlgmr.msra.gmra.mrb[0].mxu0 %vm402_vm3, %v11742_v23  ;;  %v2807_v23 = vld [vmem:[%s13227_s3] sm:$0xff] }
 0x159   : > { %2632 = vmatpush1.msra.mxu0 %v2625_v62  ;;  %2695 = vmatprep.mubr.f32.mxu0 %v13261_v0  ;;  %v11838_v28 = vpack.c.bf16 %v2808_v2, %v2807_v23 }
 0x15a   : > { %2730 = vmatprep.subr.mxu0 %v2725_v14 }
 0x15b   : > { %10872 = vmatpush3.bf16.msra.mxu1 %v11838_v28 }
 0x15c   : > { %10873 = vmatprep.subr.bf16.mxu1 %v11278_v30 }
 0x160   : > { %10602 = vmatmul.mubr.msk.f32.vlgmr.msra.gmra.mrb[0].mxu0 %vm402_vm3, %v2628_v49 }
 0x161   : > { %2731 = vmatpush1.msra.mxu0 %v2724_v27  ;;  %2794 = vmatprep.mubr.f32.mxu0 %v13261_v0 }
 0x168   : > { %10603 = vmatmul.mubr.msk.f32.vlgmr.msra.gmra.mrb[0].mxu0 %vm402_vm3, %v2727_v3 }
 0x169   : > { %7626 = vmatprep.mubr.f32.mxu0 %v13261_v0 }
 0x21b   : > { %v740_v31 = vpop.f32.mrb[0].mxu1 }
 0x21c   : > { %v742_v33 = vpop.f32.mrb[1].mxu1 }
 0x23b   : > { %v2796_v34 = vpop.f32.mrb[0].mxu0 }
 0x23c   : > { %v10918_v35 = vadd.f32 %v2796_v34, %v740_v31  ;;  %v2798_v36 = vpop.f32.mrb[1].mxu0 }
 0x23d   : > { %v10919_v37 = vadd.f32 %v2798_v36, %v742_v33 }
 0x23e   : > { %v2803_v38 = vmax.f32 %v10918_v35, 0.0 }
 0x23f   : > { %v2804_v18 = vmax.f32 %v10919_v37, 0.0 }
 0x240   : > { %2805 = vst [vmem:[%s340_s23] sm:$0xff] %v2803_v38  ;;  %2957 = vrot.lane.b32.xlu0 %v2803_v38, %s11243_s21  ;;  %2883 = vrot.lane.b32.xlu1 %v2803_v38, %s11266_s14 }
 0x241   : > { %2806 = vst [vmem:[%s340_s23 + $0x8] sm:$0xff] %v2804_v18  ;;  %10763 = vmatmul.mubr.msk.f32.vlgmr.msra.gmra.mrb[2].mxu1 %vm2809_vm14, %v2803_v38 }
 0x242   : > { %10875 = vmatpush3.bf16.msra.mxu1 %v11838_v28  ;;  %10769 = vmatprep.mubr.msk.f32.mxu1 %vm11279_vm13, %v13261_v0 }
 0x243   : > { %10876 = vmatprep.subr.bf16.mxu1 %v11278_v30 }
 0x244   : > { %3105 = vrot.lane.b32.xlu0 %v2803_v38, %s13238_s15  ;;  %3031 = vrot.lane.b32.xlu1 %v2803_v38, %s11249_s29 }
 0x248   : > { %3253 = vrot.lane.b32.xlu0 %v2803_v38, %s11260_s19  ;;  %3179 = vrot.lane.b32.xlu1 %v2803_v38, %s11257_s11 }
 0x24c   : > { %3327 = vrot.lane.b32.xlu1 %v2803_v38, %s11248_s26  ;;  %3474 = vrot.lane.b32.xlu0 %v2804_v18, %s11266_s14 }
 0x250   : > { %3548 = vrot.lane.b32.xlu1 %v2804_v18, %s11243_s21  ;;  %3622 = vrot.lane.b32.xlu0 %v2804_v18, %s11249_s29 }
 0x254   : > { %3696 = vrot.lane.b32.xlu1 %v2804_v18, %s13238_s15  ;;  %3770 = vrot.lane.b32.xlu0 %v2804_v18, %s11257_s11 }
 0x258   : > { %3844 = vrot.lane.b32.xlu1 %v2804_v18, %s11260_s19  ;;  %3918 = vrot.lane.b32.xlu0 %v2804_v18, %s11248_s26 }
 0x2b2   : > { %v2884_v20 = vpop.permute.xlu1 %2883  ;;  %v2958_v39 = vpop.permute.xlu0 %2957 }
 0x2b3   : > { %10770 = vmatmul.mubr.msk.f32.vlgmr.msra.gmra.mrb[4].mxu1 %vm2809_vm14, %v2884_v20 }
 0x2b4   : > { %10878 = vmatpush3.bf16.msra.mxu1 %v11838_v28  ;;  %10776 = vmatprep.mubr.msk.f32.mxu1 %vm11279_vm13, %v13261_v0 }
 0x2b5   : > { %10879 = vmatprep.subr.bf16.mxu1 %v11278_v30 }
 0x2b6   : > { %v3032_v40 = vpop.permute.xlu1 %3031  ;;  %v3106_v41 = vpop.permute.xlu0 %3105 }
 0x2b7   : > { %10777 = vmatmul.mubr.msk.f32.vlgmr.msra.gmra.mrb[6].mxu1 %vm2809_vm14, %v2958_v39 }
 0x2b8   : > { %10881 = vmatpush3.bf16.msra.mxu1 %v11838_v28  ;;  %10783 = vmatprep.mubr.msk.f32.mxu1 %vm11279_vm13, %v13261_v0 }
 0x2b9   : > { %10882 = vmatprep.subr.bf16.mxu1 %v11278_v30 }
 0x2ba   : > { %v3180_v42 = vpop.permute.xlu1 %3179  ;;  %v3254_v43 = vpop.permute.xlu0 %3253 }
 0x2bb   : > { %10784 = vmatmul.mubr.msk.f32.vlgmr.msra.gmra.mrb[8].mxu1 %vm2809_vm14, %v3032_v40 }
 0x2bc   : > { %10884 = vmatpush3.bf16.msra.mxu1 %v11838_v28  ;;  %10790 = vmatprep.mubr.msk.f32.mxu1 %vm11279_vm13, %v13261_v0 }
 0x2bd   : > { %10885 = vmatprep.subr.bf16.mxu1 %v11278_v30 }
 0x2be   : > { %v3328_v13 = vpop.permute.xlu1 %3327  ;;  %v3475_v44 = vpop.permute.xlu0 %3474 }
 0x2bf   : > { %10791 = vmatmul.mubr.msk.f32.vlgmr.msra.gmra.mrb[10].mxu1 %vm2809_vm14, %v3106_v41 }
 0x2c0   : > { %10887 = vmatpush3.bf16.msra.mxu1 %v11838_v28  ;;  %10797 = vmatprep.mubr.msk.f32.mxu1 %vm11279_vm13, %v13261_v0 }
 0x2c1   : > { %10888 = vmatprep.subr.bf16.mxu1 %v11278_v30 }
 0x2c2   : > { %v3549_v45 = vpop.permute.xlu1 %3548  ;;  %v3623_v49 = vpop.permute.xlu0 %3622 }
 0x2c3   : > { %10798 = vmatmul.mubr.msk.f32.vlgmr.msra.gmra.mrb[12].mxu1 %vm2809_vm14, %v3180_v42 }
 0x2c4   : > { %10890 = vmatpush3.bf16.msra.mxu1 %v11838_v28  ;;  %10804 = vmatprep.mubr.msk.f32.mxu1 %vm11279_vm13, %v13261_v0 }
 0x2c5   : > { %10891 = vmatprep.subr.bf16.mxu1 %v11278_v30 }
 0x2c6   : > { %v3697_v50 = vpop.permute.xlu1 %3696  ;;  %v3771_v48 = vpop.permute.xlu0 %3770 }
 0x2c7   : > { %10805 = vmatmul.mubr.msk.f32.vlgmr.msra.gmra.mrb[14].mxu1 %vm2809_vm14, %v3254_v43 }
 0x2c8   : > { %10893 = vmatpush3.bf16.msra.mxu1 %v11838_v28  ;;  %10811 = vmatprep.mubr.msk.f32.mxu1 %vm11279_vm13, %v13261_v0 }
 0x2c9   : > { %10894 = vmatprep.subr.bf16.mxu1 %v11278_v30 }
 0x2ca   : > { %v3845_v51 = vpop.permute.xlu1 %3844  ;;  %v3919_v53 = vpop.permute.xlu0 %3918 }
 0x2cb   : > { %10812 = vmatmul.mubr.msk.f32.vlgmr.msra.gmra.mrb[16].mxu1 %vm2809_vm14, %v3328_v13 }
 0x2cc   : > { %10896 = vmatpush3.bf16.msra.mxu1 %v11838_v28  ;;  %10818 = vmatprep.mubr.msk.f32.mxu1 %vm11279_vm13, %v13261_v0 }
 0x2cd   : > { %10897 = vmatprep.subr.bf16.mxu1 %v11278_v30 }
 0x2cf   : > { %10819 = vmatmul.mubr.msk.f32.vlgmr.msra.gmra.mrb[18].mxu1 %vm2809_vm14, %v2804_v18 }
 0x2d0   : > { %10899 = vmatpush3.bf16.msra.mxu1 %v11838_v28  ;;  %10825 = vmatprep.mubr.msk.f32.mxu1 %vm11279_vm13, %v13261_v0 }
 0x2d1   : > { %10900 = vmatprep.subr.bf16.mxu1 %v11278_v30 }
 0x2d3   : > { %10826 = vmatmul.mubr.msk.f32.vlgmr.msra.gmra.mrb[20].mxu1 %vm2809_vm14, %v3475_v44 }
 0x2d4   : > { %10902 = vmatpush3.bf16.msra.mxu1 %v11838_v28  ;;  %10832 = vmatprep.mubr.msk.f32.mxu1 %vm11279_vm13, %v13261_v0 }
 0x2d5   : > { %10903 = vmatprep.subr.bf16.mxu1 %v11278_v30 }
 0x2d7   : > { %10833 = vmatmul.mubr.msk.f32.vlgmr.msra.gmra.mrb[22].mxu1 %vm2809_vm14, %v3549_v45 }
 0x2d8   : > { %10905 = vmatpush3.bf16.msra.mxu1 %v11838_v28  ;;  %10839 = vmatprep.mubr.msk.f32.mxu1 %vm11279_vm13, %v13261_v0 }
 0x2d9   : > { %10906 = vmatprep.subr.bf16.mxu1 %v11278_v30 }
 0x2db   : > { %10840 = vmatmul.mubr.msk.f32.vlgmr.msra.gmra.mrb[24].mxu1 %vm2809_vm14, %v3623_v49 }
 0x2dc   : > { %10908 = vmatpush3.bf16.msra.mxu1 %v11838_v28  ;;  %10846 = vmatprep.mubr.msk.f32.mxu1 %vm11279_vm13, %v13261_v0 }
 0x2dd   : > { %10909 = vmatprep.subr.bf16.mxu1 %v11278_v30 }
 0x2df   : > { %10847 = vmatmul.mubr.msk.f32.vlgmr.msra.gmra.mrb[26].mxu1 %vm2809_vm14, %v3697_v50 }
 0x2e0   : > { %10911 = vmatpush3.bf16.msra.mxu1 %v11838_v28  ;;  %10853 = vmatprep.mubr.msk.f32.mxu1 %vm11279_vm13, %v13261_v0 }
 0x2e1   : > { %10912 = vmatprep.subr.bf16.mxu1 %v11278_v30 }
 0x2e3   : > { %10854 = vmatmul.mubr.msk.f32.vlgmr.msra.gmra.mrb[28].mxu1 %vm2809_vm14, %v3771_v48 }
 0x2e4   : > { %10914 = vmatpush3.bf16.msra.mxu1 %v11838_v28  ;;  %10860 = vmatprep.mubr.msk.f32.mxu1 %vm11279_vm13, %v13261_v0 }
 0x2e5   : > { %10915 = vmatprep.subr.bf16.mxu1 %v11278_v30 }
 0x2e7   : > { %10861 = vmatmul.mubr.msk.f32.vlgmr.msra.gmra.mrb[30].mxu1 %vm2809_vm14, %v3845_v51 }
 0x2e8   : > { %10917 = vmatpush3.bf16.msra.mxu1 %v11838_v28  ;;  %10867 = vmatprep.mubr.msk.f32.mxu1 %vm11279_vm13, %v13261_v0 }
 0x2eb   : > { %10868 = vmatmul.mubr.msk.f32.vlgmr.msra.gmra.mrb[32].mxu1 %vm2809_vm14, %v3919_v53 }
 0x2ec   : > { %4444 = vmatprep.mubr.f32.mxu1 %v13261_v0 }
 0x314   : > { %v11939_v24 = vpop.f32.mrb[2].mxu1 }
 0x315   : > { %v10764_v32 = vpop.f32.mrb[3].mxu1  ;;  %v3992_v4 = vmul.f32 0.516129, %v11939_v24  ;;  %v3995_v55 = vmul.f32 0.032258064, %v11939_v24 }
 0x386   : > { %v2953_v54 = vpop.f32.mrb[4].mxu1 }
 0x387   : > { %v3993_v25 = vmul.f32 0.48387095, %v2953_v54  ;;  %v3996_v56 = vmul.f32 0.9677419, %v2953_v54  ;;  %v10771_v57 = vpop.f32.mrb[5].mxu1 }
 0x388   : > { %v3998_v60 = vmul.f32 0.5483871, %v2953_v54  ;;  %v4020_v1 = vmul.f32 0.06451613, %v2953_v54 }
 0x389   : > { %v3994_v58 = vadd.f32 %v3993_v25, %v3992_v4  ;;  %v3997_v59 = vadd.f32 %v3996_v56, %v3995_v55 }
 0x38a   : > { %v3027_v61 = vpop.f32.mrb[6].mxu1 }
 0x38b   : > { %v3999_v6 = vmul.f32 0.4516129, %v3027_v61  ;;  %v4021_v63 = vmul.f32 0.9354839, %v3027_v61  ;;  %4002 = vrot.lane.b32.xlu1 %v3994_v58, %s11260_s19  ;;  %v10778_v46 = vpop.f32.mrb[7].mxu1 }
 0x38c   : > { %v4023_v7 = vmul.f32 0.58064514, %v3027_v61  ;;  %v4026_v15 = vmul.f32 0.09677419, %v3027_v61 }
 0x38d   : > { %v4000_v47 = vadd.f32 %v3999_v6, %v3998_v60  ;;  %v11944_v5 = vadd.f32 %v4021_v63, %v4020_v1 }
 0x38e   : > { %v3101_v12 = vpop.f32.mrb[8].mxu1 }
 0x38f   : > { %v4024_v29 = vmul.f32 0.41935483, %v3101_v12  ;;  %v4027_v19 = vmul.f32 0.9032258, %v3101_v12  ;;  %4006 = vrot.lane.b32.xlu1 %v3997_v59, %s13238_s15  ;;  %4010 = vrot.lane.b32.xlu0 %v4000_v47, %s11243_s21  ;;  %v10785_v21 = vpop.f32.mrb[9].mxu1 }
 0x390   : > { %v4029_v17 = vmul.f32 0.61290324, %v3101_v12  ;;  %v4048_v14 = vmul.f32 0.12903225, %v3101_v12 }
 0x391   : > { %v4025_v22 = vadd.f32 %v4024_v29, %v4023_v7  ;;  %v4028_v16 = vadd.f32 %v4027_v19, %v4026_v15 }
 0x392   : > { %v3175_v62 = vpop.f32.mrb[10].mxu1 }
 0x393   : > { %v4030_v52 = vmul.f32 0.38709676, %v3175_v62  ;;  %v4049_v26 = vmul.f32 0.87096775, %v3175_v62  ;;  %4033 = vrot.lane.b32.xlu0 %v4025_v22, %s11260_s19  ;;  %v10792_v27 = vpop.f32.mrb[11].mxu1 }
 0x394   : > { %v4051_v2 = vmul.f32 0.6451613, %v3175_v62  ;;  %v4054_v30 = vmul.f32 0.16129032, %v3175_v62 }
 0x395   : > { %v4031_v3 = vadd.f32 %v4030_v52, %v4029_v17  ;;  %v11949_v23 = vadd.f32 %v4049_v26, %v4048_v14 }
 0x396   : > { %v3249_v28 = vpop.f32.mrb[12].mxu1 }
 0x397   : > { %v4052_v31 = vmul.f32 0.3548387, %v3249_v28  ;;  %v4055_v33 = vmul.f32 0.83870965, %v3249_v28  ;;  %4041 = vrot.lane.b32.xlu1 %v4031_v3, %s11243_s21  ;;  %4037 = vrot.lane.b32.xlu0 %v4028_v16, %s13238_s15  ;;  %v10799_v34 = vpop.f32.mrb[13].mxu1 }
 0x398   : > { %v4057_v37 = vmul.f32 0.67741936, %v3249_v28  ;;  %v4076_v18 = vmul.f32 0.19354838, %v3249_v28 }
 0x399   : > { %v4053_v35 = vadd.f32 %v4052_v31, %v4051_v2  ;;  %v4056_v36 = vadd.f32 %v4055_v33, %v4054_v30 }
 0x39a   : > { %v3323_v38 = vpop.f32.mrb[14].mxu1 }
 0x39b   : > { %v4058_v20 = vmul.f32 0.32258064, %v3323_v38  ;;  %v4077_v39 = vmul.f32 0.8064516, %v3323_v38  ;;  %4061 = vrot.lane.b32.xlu0 %v4053_v35, %s11260_s19  ;;  %v10806_v40 = vpop.f32.mrb[15].mxu1 }
 0x39c   : > { %v4079_v43 = vmul.f32 0.7096774, %v3323_v38  ;;  %v4082_v44 = vmul.f32 0.22580644, %v3323_v38 }
 0x39d   : > { %v4059_v41 = vadd.f32 %v4058_v20, %v4057_v37  ;;  %v11954_v42 = vadd.f32 %v4077_v39, %v4076_v18 }
 0x39e   : > { %v3397_v13 = vpop.f32.mrb[16].mxu1 }
 0x39f   : > { %v4080_v45 = vmul.f32 0.29032257, %v3397_v13  ;;  %v4083_v49 = vmul.f32 0.7741935, %v3397_v13  ;;  %4065 = vrot.lane.b32.xlu0 %v4056_v36, %s13238_s15  ;;  %v10813_v50 = vpop.f32.mrb[17].mxu1 }
 0x3a0   : > { %v4085_v53 = vmul.f32 0.7419355, %v3397_v13  ;;  %v4104_v4 = vmul.f32 0.2580645, %v3397_v13 }
 0x3a1   : > { %v4081_v48 = vadd.f32 %v4080_v45, %v4079_v43  ;;  %v4084_v51 = vadd.f32 %v4083_v49, %v4082_v44 }
 0x3a2   : > { %v3470_v32 = vpop.f32.mrb[18].mxu1 }
 0x3a3   : > { %v4086_v54 = vmul.f32 0.2580645, %v3470_v32  ;;  %v4105_v55 = vmul.f32 0.7419355, %v3470_v32  ;;  %4089 = vrot.lane.b32.xlu1 %v4081_v48, %s11260_s19  ;;  %4069 = vrot.lane.b32.xlu0 %v4059_v41, %s11243_s21  ;;  %v10820_v25 = vpop.f32.mrb[19].mxu1 }
 0x3a4   : > { %v4107_v58 = vmul.f32 0.7741935, %v3470_v32  ;;  %v4110_v60 = vmul.f32 0.29032257, %v3470_v32 }
 0x3a5   : > { %v4087_v56 = vadd.f32 %v4086_v54, %v4085_v53  ;;  %v11959_v57 = vadd.f32 %v4105_v55, %v4104_v4 }
 0x3a6   : > { %v3544_v59 = vpop.f32.mrb[20].mxu1 }
 0x3a7   : > { %v4108_v61 = vmul.f32 0.22580644, %v3544_v59  ;;  %v4111_v1 = vmul.f32 0.7096774, %v3544_v59  ;;  %4093 = vrot.lane.b32.xlu1 %v4084_v51, %s13238_s15  ;;  %v10827_v6 = vpop.f32.mrb[21].mxu1 }
 0x3a8   : > { %v4113_v47 = vmul.f32 0.8064516, %v3544_v59  ;;  %v4132_v12 = vmul.f32 0.32258064, %v3544_v59 }
 0x3a9   : > { %v4109_v63 = vadd.f32 %v4108_v61, %v4107_v58  ;;  %v4112_v46 = vadd.f32 %v4111_v1, %v4110_v60  ;;  %v11979_v60 = vld [vmem:[#allocation5] sm:$0xff] }
 0x3aa   : > { %v3618_v7 = vpop.f32.mrb[22].mxu1 }
 0x3ab   : > { %v4114_v15 = vmul.f32 0.19354838, %v3618_v7  ;;  %v4133_v29 = vmul.f32 0.67741936, %v3618_v7  ;;  %4097 = vrot.lane.b32.xlu1 %v4087_v56, %s11243_s21  ;;  %4117 = vrot.lane.b32.xlu0 %v4109_v63, %s11260_s19  ;;  %v10834_v19 = vpop.f32.mrb[23].mxu1 }
 0x3ac   : > { %v4135_v16 = vmul.f32 0.83870965, %v3618_v7  ;;  %v4138_v62 = vmul.f32 0.3548387, %v3618_v7 }
 0x3ad   : > { %v4115_v21 = vadd.f32 %v4114_v15, %v4113_v47  ;;  %v11964_v22 = vadd.f32 %v4133_v29, %v4132_v12 }
 0x3ae   : > { %v3692_v17 = vpop.f32.mrb[24].mxu1 }
 0x3af   : > { %v4136_v14 = vmul.f32 0.16129032, %v3692_v17  ;;  %v4139_v52 = vmul.f32 0.6451613, %v3692_v17  ;;  %4121 = vrot.lane.b32.xlu0 %v4112_v46, %s13238_s15  ;;  %v10841_v26 = vpop.f32.mrb[25].mxu1 }
 0x3b0   : > { %v4141_v2 = vmul.f32 0.87096775, %v3692_v17  ;;  %v4160_v30 = vmul.f32 0.38709676, %v3692_v17 }
 0x3b1   : > { %v4137_v27 = vadd.f32 %v4136_v14, %v4135_v16  ;;  %v4140_v3 = vadd.f32 %v4139_v52, %v4138_v62 }
 0x3b2   : > { %v3766_v28 = vpop.f32.mrb[26].mxu1 }
 0x3b3   : > { %v4142_v31 = vmul.f32 0.12903225, %v3766_v28  ;;  %v4161_v33 = vmul.f32 0.61290324, %v3766_v28  ;;  %4145 = vrot.lane.b32.xlu1 %v4137_v27, %s11260_s19  ;;  %v10848_v34 = vpop.f32.mrb[27].mxu1 }
 0x3b4   : > { %v4163_v37 = vmul.f32 0.9032258, %v3766_v28  ;;  %v4166_v18 = vmul.f32 0.41935483, %v3766_v28 }
 0x3b5   : > { %v4143_v35 = vadd.f32 %v4142_v31, %v4141_v2  ;;  %v11968_v36 = vadd.f32 %v4161_v33, %v4160_v30 }
 0x3b6   : > { %v3840_v38 = vpop.f32.mrb[28].mxu1 }
 0x3b7   : > { %v4164_v20 = vmul.f32 0.09677419, %v3840_v38  ;;  %v4167_v39 = vmul.f32 0.58064514, %v3840_v38  ;;  %v10855_v40 = vpop.f32.mrb[29].mxu1 }
 0x3b8   : > { %v4169_v13 = vmul.f32 0.9354839, %v3840_v38  ;;  %v4188_v45 = vmul.f32 0.4516129, %v3840_v38 }
 0x3b9   : > { %v4165_v41 = vadd.f32 %v4164_v20, %v4163_v37  ;;  %v4168_v43 = vadd.f32 %v4167_v39, %v4166_v18 }
 0x3ba   : > { %v3914_v44 = vpop.f32.mrb[30].mxu1 }
 0x3bb   : > { %v4170_v49 = vmul.f32 0.06451613, %v3914_v44  ;;  %v4189_v50 = vmul.f32 0.5483871, %v3914_v44  ;;  %v10862_v48 = vpop.f32.mrb[31].mxu1 }
 0x3bc   : > { %v4191_v32 = vmul.f32 0.9677419, %v3914_v44  ;;  %v4194_v4 = vmul.f32 0.48387095, %v3914_v44 }
 0x3bd   : > { %v4171_v51 = vadd.f32 %v4170_v49, %v4169_v13  ;;  %v4190_v53 = vadd.f32 %v4189_v50, %v4188_v45 }
 0x3be   : > { %v3988_v54 = vpop.f32.mrb[32].mxu1 }
 0x3bf   : > { %v4192_v55 = vmul.f32 0.032258064, %v3988_v54  ;;  %v4195_v25 = vmul.f32 0.516129, %v3988_v54  ;;  %4206 = vrot.lane.b32.xlu1 %v3988_v54, %s11243_s21  ;;  %v10869_v56 = vpop.f32.mrb[33].mxu1 }
 0x3c1   : > { %v4193_v58 = vadd.f32 %v4192_v55, %v4191_v32  ;;  %v4196_v59 = vadd.f32 %v4195_v25, %v4194_v4 }
 0x3c3   : > { %4202 = vrot.lane.b32.xlu0 %v4196_v59, %s13238_s15  ;;  %4198 = vrot.lane.b32.xlu1 %v4193_v58, %s11260_s19 }
 0x3c7   : > { %4125 = vrot.lane.b32.xlu0 %v4115_v21, %s11243_s21  ;;  %4149 = vrot.lane.b32.xlu1 %v4140_v3, %s13238_s15 }
 0x3cb   : > { %4173 = vrot.lane.b32.xlu0 %v4165_v41, %s11260_s19  ;;  %4153 = vrot.lane.b32.xlu1 %v4143_v35, %s11243_s21 }
 0x3cf   : > { %4181 = vrot.lane.b32.xlu0 %v4171_v51, %s11243_s21  ;;  %4177 = vrot.lane.b32.xlu1 %v4168_v43, %s13238_s15 }
 0x3d3   : > { %4376 = vrot.lane.b32.xlu0 %v11979_v60, %s11268_s20 }
 0x3fd   : > { %v4003_v61 = vpop.permute.xlu1 %4002 }
 0x3fe   : > { %v4014_v1 = vsel %vm4013_vm0, %v11939_v24, %v4003_v61  ;;  %v12164_v61 = vsub.s32 3, %v11526_v8 }
 0x401   : > { %v4007_v6 = vpop.permute.xlu1 %4006  ;;  %v4011_v63 = vpop.permute.xlu0 %4010 }
 0x402   : > { %v4016_v46 = vsel %vm4015_vm1, %v4014_v1, %v4007_v6  ;;  %v12167_v1 = vsub.s32 2, %v11526_v8 }
 0x403   : > { %v11987_v47 = vsel %vm4017_vm2, %v4016_v46, %v4011_v63 }
 0x404   : > { %4298 = vrot.lane.b32.xlu1 %v11987_v47, %s11260_s19 }
 0x405   : > { %v4034_v7 = vpop.permute.xlu0 %4033 }
 0x406   : > { %v4044_v12 = vsel %vm4013_vm0, %v11944_v5, %v4034_v7 }
 0x409   : > { %v4042_v15 = vpop.permute.xlu1 %4041  ;;  %v4038_v29 = vpop.permute.xlu0 %4037 }
 0x40a   : > { %v4045_v19 = vsel %vm4015_vm1, %v4044_v12, %v4038_v29  ;;  %v12182_v12 = vsub.s32 5, %v11526_v8 }
 0x40b   : > { %v11995_v24 = vsel %vm4017_vm2, %v4045_v19, %v4042_v15 }
 0x40c   : > { %4300 = vrot.lane.b32.xlu0 %v11995_v24, %s11260_s19 }
 0x40d   : > { %v4062_v21 = vpop.permute.xlu0 %4061 }
 0x40e   : > { %v4072_v17 = vsel %vm4013_vm0, %v11949_v23, %v4062_v21  ;;  %v12195_v21 = vsub.s32 4, %v11526_v8 }
 0x411   : > { %v4066_v16 = vpop.permute.xlu0 %4065 }
 0x412   : > { %v4073_v62 = vsel %vm4015_vm1, %v4072_v17, %v4066_v16 }
 0x415   : > { %v4090_v14 = vpop.permute.xlu1 %4089  ;;  %v4070_v52 = vpop.permute.xlu0 %4069 }
 0x416   : > { %v12003_v5 = vsel %vm4017_vm2, %v4073_v62, %v4070_v52  ;;  %v4100_v27 = vsel %vm4013_vm0, %v11954_v42, %v4090_v14 }
 0x417   : > { %4302 = vrot.lane.b32.xlu0 %v12003_v5, %s11260_s19 }
 0x419   : > { %v4094_v26 = vpop.permute.xlu1 %4093 }
 0x41a   : > { %v4101_v3 = vsel %vm4015_vm1, %v4100_v27, %v4094_v26  ;;  %v12208_v26 = vsub.s32 6, %v11526_v8 }
 0x41d   : > { %v4098_v2 = vpop.permute.xlu1 %4097  ;;  %v4118_v23 = vpop.permute.xlu0 %4117 }
 0x41e   : > { %v12011_v28 = vsel %vm4017_vm2, %v4101_v3, %v4098_v2  ;;  %v4128_v39 = vsel %vm4013_vm0, %v11959_v57, %v4118_v23  ;;  %v12220_v2 = vsub.s32 7, %v11526_v8 }
 0x41f   : > { %4304 = vrot.lane.b32.xlu1 %v12011_v28, %s11260_s19 }
 0x421   : > { %v4122_v31 = vpop.permute.xlu0 %4121 }
 0x422   : > { %v4129_v40 = vsel %vm4015_vm1, %v4128_v39, %v4122_v31  ;;  %v4246_v31 = vld [vmem:[%s13229_s5] ss:$8 sm:$0xf] }
 0x425   : > { %v4146_v30 = vpop.permute.xlu1 %4145 }
 0x426   : > { %v4156_v41 = vsel %vm4013_vm0, %v11964_v22, %v4146_v30 }
 0x431   : > { %v4207_v33 = vpop.permute.xlu1 %4206 }
 0x435   : > { %v4203_v34 = vpop.permute.xlu0 %4202  ;;  %v4199_v35 = vpop.permute.xlu1 %4198 }
 0x436   : > { %v4209_v37 = vsel %vm4013_vm0, %v4190_v53, %v4199_v35  ;;  %v10621_v53 = vld [vmem:[%s13229_s5 + $0x1] ss:$8 sm:$0xf0] }
 0x437   : > { %v4210_v38 = vsel %vm4015_vm1, %v4209_v37, %v4203_v34 }
 0x438   : > { %v12018_v42 = vsel %vm4017_vm2, %v4210_v38, %v4207_v33  ;;  %v4247_v33 = vld [vmem:[%s13229_s5] ss:$8 sm:$0xf0] }
 0x439   : > { %v4126_v18 = vpop.permute.xlu0 %4125  ;;  %4312 = vrot.lane.b32.xlu1 %v12018_v42, %s11260_s19  ;;  %v4150_v20 = vpop.permute.xlu1 %4149 }
 0x43a   : > { %v12028_v43 = vsel %vm4017_vm2, %v4129_v40, %v4126_v18  ;;  %v4157_v13 = vsel %vm4015_vm1, %v4156_v41, %v4150_v20  ;;  %v4248_v20 = vor.u32 %v4247_v33, %v4246_v31 }
 0x43c   : > { %v12323_v33 = vrot.slane %v4248_v20, %v12208_v26 }
 0x43d   : > { %v4174_v44 = vpop.permute.xlu0 %4173  ;;  %4306 = vrot.lane.b32.xlu1 %v12028_v43, %s11260_s19  ;;  %v4154_v45 = vpop.permute.xlu1 %4153 }
 0x43e   : > { %v4184_v49 = vsel %vm4013_vm0, %v11968_v36, %v4174_v44  ;;  %v12036_v57 = vsel %vm4017_vm2, %v4157_v13, %v4154_v45  ;;  %v10620_v36 = vld [vmem:[%s13229_s5 + $0x1] ss:$8 sm:$0xf] }
 0x43f   : > { %4308 = vrot.lane.b32.xlu0 %v12036_v57, %s11260_s19  ;;  %v12108_v4 = vor.u32 %v10621_v53, %v10620_v36  ;;  %v12271_v36 = vrot.slane %v4248_v20, %v11535_v10 }
 0x441   : > { %v4182_v22 = vpop.permute.xlu0 %4181  ;;  %v4178_v50 = vpop.permute.xlu1 %4177  ;;  %v12116_v54 = vrot.slane %v12108_v4, %v11538_v11  ;;  %v12173_v6 = vrot.slane %v12108_v4, %v11535_v10  ;;  %v12179_v7 = vrot.slane %v12108_v4, %v12164_v61  ;;  %v12186_v15 = vrot.slane %v12108_v4, %v12167_v1 }
 0x442   : > { %v4185_v48 = vsel %vm4015_vm1, %v4184_v49, %v4178_v50  ;;  %v12205_v52 = vrot.slane %v12108_v4, %v12182_v12  ;;  %v12213_v3 = vrot.slane %v12108_v4, %v12195_v21  ;;  %v12238_v37 = vrot.slane %v12108_v4, %v12208_v26 }
 0x443   : > { %v12042_v51 = vsel %vm4017_vm2, %v4185_v48, %v4182_v22  ;;  %4222 = vrot.lane.b32.xlu0 %v11987_v47, %s11272_s13  ;;  %v12247_v18 = vrot.slane %v12108_v4, %v12220_v2  ;;  %v12263_v49 = vrot.slane %v4248_v20, %v11538_v11  ;;  %v12279_v4 = vrot.slane %v4248_v20, %v12167_v1 }
 0x444   : > { %4310 = vrot.lane.b32.xlu1 %v12042_v51, %s11260_s19 }
 0x445   : > { %v12106_v32 = vpop.permute.xlu0 %4376 }
 0x447   : > { %4228 = vrot.lane.b32.xlu0 %v12011_v28, %s11272_s13 }
 0x448   : > { %4224 = vrot.lane.b32.xlu1 %v11995_v24, %s11272_s13 }
 0x44b   : > { %4236 = vrot.lane.b32.xlu0 %v12018_v42, %s11272_s13 }
 0x44c   : > { %4226 = vrot.lane.b32.xlu1 %v12003_v5, %s11272_s13 }
 0x44f   : > { %4232 = vrot.lane.b32.xlu0 %v12036_v57, %s11272_s13 }
 0x450   : > { %4230 = vrot.lane.b32.xlu1 %v12028_v43, %s11272_s13 }
 0x453   : > { %4950 = vrot.lane.b32.xlu0 %v11987_v47, %s11276_s22 }
 0x454   : > { %4234 = vrot.lane.b32.xlu1 %v12042_v51, %s11272_s13 }
 0x457   : > { %4956 = vrot.lane.b32.xlu0 %v12011_v28, %s11276_s22 }
 0x458   : > { %4952 = vrot.lane.b32.xlu1 %v11995_v24, %s11276_s22 }
 0x45b   : > { %4964 = vrot.lane.b32.xlu0 %v12018_v42, %s11276_s22 }
 0x45c   : > { %4954 = vrot.lane.b32.xlu1 %v12003_v5, %s11276_s22 }
 0x45f   : > { %4958 = vrot.lane.b32.xlu0 %v12028_v43, %s11276_s22 }
 0x460   : > { %5027 = vrot.lane.b32.xlu1 %v11979_v60, %s11266_s14 }
 0x463   : > { %4962 = vrot.lane.b32.xlu0 %v12042_v51, %s11276_s22 }
 0x464   : > { %4960 = vrot.lane.b32.xlu1 %v12036_v57, %s11276_s22 }
 0x467   : > { %5325 = vrot.lane.b32.xlu0 %v11995_v24, %s11256_s17 }
 0x468   : > { %5323 = vrot.lane.b32.xlu1 %v11987_v47, %s11256_s17 }
 0x46b   : > { %5327 = vrot.lane.b32.xlu0 %v12003_v5, %s11256_s17 }
 0x46c   : > { %5337 = vrot.lane.b32.xlu1 %v12018_v42, %s11256_s17 }
 0x46f   : > { %5400 = vrot.lane.b32.xlu0 %v11979_v60, %s11271_s25 }
 0x470   : > { %5329 = vrot.lane.b32.xlu1 %v12011_v28, %s11256_s17 }
 0x473   : > { %5333 = vrot.lane.b32.xlu0 %v12036_v57, %s11256_s17 }
 0x474   : > { %5331 = vrot.lane.b32.xlu1 %v12028_v43, %s11256_s17 }
 0x476   : > { %v4299_v55 = vpop.permute.xlu1 %4298 }
 0x477   : > { %5696 = vrot.lane.b32.xlu0 %v11979_v60, %s11243_s21 }
 0x478   : > { %5335 = vrot.lane.b32.xlu1 %v12042_v51, %s11256_s17 }
 0x47b   : > { %5996 = vrot.lane.b32.xlu0 %v12003_v5, %s11259_s18 }
 0x47c   : > { %5994 = vrot.lane.b32.xlu1 %v11995_v24, %s11259_s18 }
 0x47e   : > { %v4301_v25 = vpop.permute.xlu0 %4300 }
 0x47f   : > { %v4320_v56 = vsel %vm553_vm5, %v4299_v55, %v4301_v25  ;;  %5998 = vrot.lane.b32.xlu0 %v12011_v28, %s11259_s18 }
 0x480   : > { %5992 = vrot.lane.b32.xlu1 %v11987_v47, %s11259_s18  ;;  %v4368_v58 = vmul.f32 %v12116_v54, %v4320_v56 }
 0x482   : > { %4380 = vmatprep.subr.mxu1 %v4368_v58 }
 0x483   : > { %6069 = vrot.lane.b32.xlu0 %v11979_v60, %s11246_s24 }
 0x484   : > { %6000 = vrot.lane.b32.xlu1 %v12028_v43, %s11259_s18 }
 0x487   : > { %6004 = vrot.lane.b32.xlu0 %v12042_v51, %s11259_s18 }
 0x488   : > { %6002 = vrot.lane.b32.xlu1 %v12036_v57, %s11259_s18 }
 0x489   : > { %v4303_v63 = vpop.permute.xlu0 %4302 }
 0x48a   : > { %v4319_v16 = vsel %vm553_vm5, %v4301_v25, %v4303_v63 }
 0x48b   : > { %6367 = vrot.lane.b32.xlu0 %v11995_v24, %s11273_s30  ;;  %v4369_v27 = vmul.f32 %v12186_v15, %v4319_v16  ;;  %v12302_v16 = vrot.slane %v4248_v20, %v12182_v12 }
 0x48c   : > { %6369 = vrot.lane.b32.xlu1 %v12003_v5, %s11273_s30 }
 0x48f   : > { %6365 = vrot.lane.b32.xlu0 %v11987_v47, %s11273_s30 }
 0x490   : > { %6371 = vrot.lane.b32.xlu1 %v12011_v28, %s11273_s30 }
 0x491   : > { %v4305_v59 = vpop.permute.xlu1 %4304 }
 0x492   : > { %v4318_v29 = vsel %vm553_vm5, %v4303_v63, %v4305_v59 }
 0x493   : > { %6373 = vrot.lane.b32.xlu0 %v12028_v43, %s11273_s30  ;;  %v4370_v14 = vmul.f32 %v12179_v7, %v4318_v29 }
 0x494   : > { %6006 = vrot.lane.b32.xlu1 %v12018_v42, %s11259_s18 }
 0x497   : > { %6375 = vrot.lane.b32.xlu0 %v12036_v57, %s11273_s30 }
 0x498   : > { %6442 = vrot.lane.b32.xlu1 %v11979_v60, %s11249_s29 }
 0x49b   : > { %6742 = vrot.lane.b32.xlu0 %v12003_v5, %s11243_s21 }
 0x49c   : > { %6377 = vrot.lane.b32.xlu1 %v12042_v51, %s11273_s30 }
 0x49f   : > { %6379 = vrot.lane.b32.xlu0 %v12018_v42, %s11273_s30 }
 0x4a0   : > { %6740 = vrot.lane.b32.xlu1 %v11995_v24, %s11243_s21 }
 0x4a3   : > { %6744 = vrot.lane.b32.xlu0 %v12011_v28, %s11243_s21 }
 0x4a4   : > { %6738 = vrot.lane.b32.xlu1 %v11987_v47, %s11243_s21 }
 0x4a7   : > { %6815 = vrot.lane.b32.xlu0 %v11979_v60, %s11250_s10 }
 0x4a8   : > { %6746 = vrot.lane.b32.xlu1 %v12028_v43, %s11243_s21 }
 0x4ab   : > { %6750 = vrot.lane.b32.xlu0 %v12042_v51, %s11243_s21  ;;  %v4313_v46 = vpop.permute.xlu1 %4312 }
 0x4ac   : > { %v4321_v19 = vsel %vm553_vm5, %v4313_v46, %v4299_v55  ;;  %6748 = vrot.lane.b32.xlu1 %v12036_v57, %s11243_s21  ;;  %v12282_v55 = vrot.slane %v4248_v20, %v12164_v61 }
 0x4ad   : > { %v4367_v17 = vmul.f32 %v12173_v6, %v4321_v19  ;;  %v12299_v19 = vrot.slane %v4248_v20, %v12195_v21 }
 0x4af   : > { %7113 = vrot.lane.b32.xlu0 %v11995_v24, %s13275_s12  ;;  %4381 = vmatpush1.msra.mxu1 %v4367_v17  ;;  %v4307_v62 = vpop.permute.xlu1 %4306  ;;  %v10630_v17 = vld [vmem:[%s13229_s5 + $0x2] ss:$8 sm:$0xf] }
 0x4b0   : > { %7115 = vrot.lane.b32.xlu1 %v12003_v5, %s13275_s12  ;;  %10622 = vmatmul.mubr.msk.f32.vlgmr.msra.gmra.mrb[34].mxu1 %vm402_vm3, %v12106_v32  ;;  %v4317_v23 = vsel %vm553_vm5, %v4305_v59, %v4307_v62 }
 0x4b1   : > { %4451 = vmatprep.subr.mxu1 %v4370_v14  ;;  %v4309_v30 = vpop.permute.xlu0 %4308  ;;  %4515 = vmatprep.mubr.f32.mxu1 %v13261_v0  ;;  %v4371_v38 = vmul.f32 %v12213_v3, %v4317_v23  ;;  %v10631_v14 = vld [vmem:[%s13229_s5 + $0x2] ss:$8 sm:$0xf0] }
 0x4b2   : > { %v4316_v34 = vsel %vm553_vm5, %v4307_v62, %v4309_v30  ;;  %4452 = vmatpush1.msra.mxu1 %v4369_v27  ;;  %v12313_v27 = vld [vmem:[%s13230_s6] sm:$0xff] }
 0x4b3   : > { %7111 = vrot.lane.b32.xlu0 %v11987_v47, %s13275_s12  ;;  %v4372_v35 = vmul.f32 %v12205_v52, %v4316_v34 }
 0x4b4   : > { %6752 = vrot.lane.b32.xlu1 %v12018_v42, %s11243_s21  ;;  %10623 = vmatmul.mubr.msk.f32.vlgmr.msra.gmra.mrb[36].mxu1 %vm402_vm3, %v12106_v32 }
 0x4b5   : > { %v4223_v39 = vpop.permute.xlu0 %4222  ;;  %4522 = vmatprep.subr.mxu1 %v4372_v35  ;;  %4586 = vmatprep.mubr.f32.mxu1 %v13261_v0 }
 0x4b6   : > { %4523 = vmatpush1.msra.mxu1 %v4371_v38  ;;  %v4311_v40 = vpop.permute.xlu1 %4310  ;;  %v12328_v38 = vrot.slane %v4248_v20, %v12220_v2 }
 0x4b7   : > { %v4314_v41 = vsel %vm553_vm5, %v4311_v40, %v4313_v46  ;;  %v4315_v13 = vsel %vm553_vm5, %v4309_v30, %v4311_v40  ;;  %7119 = vrot.lane.b32.xlu0 %v12028_v43, %s13275_s12 }
 0x4b8   : > { %v4373_v44 = vmul.f32 %v12238_v37, %v4315_v13  ;;  %7117 = vrot.lane.b32.xlu1 %v12011_v28, %s13275_s12  ;;  %10624 = vmatmul.mubr.msk.f32.vlgmr.msra.gmra.mrb[38].mxu1 %vm402_vm3, %v12106_v32  ;;  %v4374_v45 = vmul.f32 %v12247_v18, %v4314_v41 }
 0x4b9   : > { %v4229_v22 = vpop.permute.xlu0 %4228  ;;  %4657 = vmatprep.mubr.f32.mxu1 %v13261_v0 }
 0x4ba   : > { %4593 = vmatprep.subr.mxu1 %v4374_v45  ;;  %v4225_v50 = vpop.permute.xlu1 %4224 }
 0x4bb   : > { %v4244_v48 = vsel %vm381_vm15, %v4223_v39, %v4225_v50  ;;  %7121 = vrot.lane.b32.xlu0 %v12036_v57, %s13275_s12  ;;  %4594 = vmatpush1.msra.mxu1 %v4373_v44 }
 0x4bc   : > { %7188 = vrot.lane.b32.xlu1 %v11979_v60, %s13238_s15  ;;  %10625 = vmatmul.mubr.msk.f32.vlgmr.msra.gmra.mrb[40].mxu1 %vm402_vm3, %v12106_v32  ;;  %v4291_v53 = vmul.f32 %v12263_v49, %v4244_v48 }
 0x4bd   : > { %v4237_v25 = vpop.permute.xlu0 %4236  ;;  %4730 = vmatprep.mubr.f32.mxu1 %v13261_v0 }
 0x4be   : > { %v4245_v56 = vsel %vm381_vm15, %v4237_v25, %v4223_v39  ;;  %4666 = vmatprep.subr.mxu1 %v4291_v53  ;;  %v4227_v58 = vpop.permute.xlu1 %4226  ;;  %v4977_v39 = vor.u32 %v10631_v14, %v10630_v17 }
 0x4bf   : > { %v4290_v59 = vmul.f32 %v12271_v36, %v4245_v56  ;;  %v4242_v32 = vsel %vm381_vm15, %v4227_v58, %v4229_v22  ;;  %v4243_v63 = vsel %vm381_vm15, %v4225_v50, %v4227_v58  ;;  %7125 = vrot.lane.b32.xlu0 %v12018_v42, %s13275_s12 }
 0x4c0   : > { %v4292_v46 = vmul.f32 %v12279_v4, %v4243_v63  ;;  %7123 = vrot.lane.b32.xlu1 %v12042_v51, %s13275_s12  ;;  %v4293_v29 = vmul.f32 %v12282_v55, %v4242_v32  ;;  %v12354_v58 = vrot.slane %v4977_v39, %v12167_v1 }
 0x4c1   : > { %v4233_v62 = vpop.permute.xlu0 %4232  ;;  %4667 = vmatpush1.msra.mxu1 %v4290_v59  ;;  %v12357_v59 = vrot.slane %v4977_v39, %v12164_v61 }
 0x4c2   : > { %4737 = vmatprep.subr.mxu1 %v4293_v29  ;;  %v4231_v23 = vpop.permute.xlu1 %4230  ;;  %10626 = vmatmul.mubr.msk.f32.vlgmr.msra.gmra.mrb[34].mxu1 %vm402_vm3, %v11979_v60 }
 0x4c3   : > { %v4240_v30 = vsel %vm381_vm15, %v4231_v23, %v4233_v62  ;;  %v4241_v31 = vsel %vm381_vm15, %v4229_v22, %v4231_v23  ;;  %4738 = vmatpush1.msra.mxu1 %v4292_v46  ;;  %4801 = vmatprep.mubr.f32.mxu1 %v13261_v0  ;;  %v12342_v22 = vrot.slane %v4977_v39, %v11538_v11 }
 0x4c4   : > { %v4294_v34 = vmul.f32 %v12299_v19, %v4241_v31  ;;  %v4295_v35 = vmul.f32 %v12302_v16, %v4240_v30  ;;  %7558 = vrot.lane.b32.xlu0 %v12313_v27, %s11268_s20  ;;  %v10637_v31 = vld [vmem:[%s13229_s5 + $0x3] ss:$8 sm:$0xf0] }
 0x4c5   : > { %v4951_v40 = vpop.permute.xlu0 %4950 }
 0x4c6   : > { %4808 = vmatprep.subr.mxu1 %v4295_v35  ;;  %v4235_v41 = vpop.permute.xlu1 %4234  ;;  %10627 = vmatmul.mubr.msk.f32.vlgmr.msra.gmra.mrb[36].mxu1 %vm402_vm3, %v11979_v60  ;;  %v12380_v35 = vrot.slane %v4977_v39, %v12182_v12 }
 0x4c7   : > { %v4238_v13 = vsel %vm381_vm15, %v4235_v41, %v4237_v25  ;;  %v4239_v44 = vsel %vm381_vm15, %v4233_v62, %v4235_v41  ;;  %4809 = vmatpush1.msra.mxu1 %v4294_v34  ;;  %4872 = vmatprep.mubr.f32.mxu1 %v13261_v0  ;;  %v12349_v25 = vrot.slane %v4977_v39, %v11535_v10 }
 0x4c8   : > { %v4296_v20 = vmul.f32 %v12323_v33, %v4239_v44  ;;  %v4297_v45 = vmul.f32 %v12328_v38, %v4238_v13  ;;  %v12383_v41 = vrot.slane %v4977_v39, %v12195_v21 }
 0x4c9   : > { %v4957_v50 = vpop.permute.xlu0 %4956 }
 0x4ca   : > { %4879 = vmatprep.subr.mxu1 %v4297_v45  ;;  %v4953_v48 = vpop.permute.xlu1 %4952  ;;  %10628 = vmatmul.mubr.msk.f32.vlgmr.msra.gmra.mrb[38].mxu1 %vm402_vm3, %v11979_v60  ;;  %v12388_v45 = vrot.slane %v4977_v39, %v12220_v2 }
 0x4cb   : > { %v4972_v53 = vsel %vm652_vm8, %v4951_v40, %v4953_v48  ;;  %4880 = vmatpush1.msra.mxu1 %v4296_v20  ;;  %4943 = vmatprep.mubr.f32.mxu1 %v13261_v0 }
 0x4cc   : > { %v5020_v56 = vmul.f32 %v12342_v22, %v4972_v53  ;;  %v12393_v53 = vrot.slane %v4977_v39, %v12208_v26 }
 0x4cd   : > { %v4965_v32 = vpop.permute.xlu0 %4964 }
 0x4ce   : > { %v4973_v63 = vsel %vm652_vm8, %v4965_v32, %v4951_v40  ;;  %5031 = vmatprep.subr.mxu1 %v5020_v56  ;;  %v4955_v46 = vpop.permute.xlu1 %4954  ;;  %10629 = vmatmul.mubr.msk.f32.vlgmr.msra.gmra.mrb[40].mxu1 %vm402_vm3, %v11979_v60  ;;  %v10636_v60 = vld [vmem:[%s13229_s5 + $0x3] ss:$8 sm:$0xf] }
 0x4cf   : > { %v5019_v29 = vmul.f32 %v12349_v25, %v4973_v63  ;;  %v4970_v17 = vsel %vm652_vm8, %v4955_v46, %v4957_v50  ;;  %v4971_v62 = vsel %vm652_vm8, %v4953_v48, %v4955_v46  ;;  %5095 = vmatprep.mubr.f32.mxu1 %v13261_v0  ;;  %v5350_v40 = vor.u32 %v10637_v31, %v10636_v60 }
 0x4d0   : > { %v5021_v14 = vmul.f32 %v12354_v58, %v4971_v62  ;;  %v5022_v23 = vmul.f32 %v12357_v59, %v4970_v17 }
 0x4d1   : > { %v4959_v30 = vpop.permute.xlu0 %4958  ;;  %5032 = vmatpush1.msra.mxu1 %v5019_v29  ;;  %v12403_v46 = vrot.slane %v5350_v40, %v11538_v11 }
 0x4d2   : > { %5102 = vmatprep.subr.mxu1 %v5022_v23  ;;  %v5028_v34 = vpop.permute.xlu1 %5027  ;;  %v4969_v44 = vsel %vm652_vm8, %v4957_v50, %v4959_v30 }
 0x4d3   : > { %10632 = vmatmul.mubr.msk.f32.vlgmr.msra.gmra.mrb[34].mxu1 %vm402_vm3, %v5028_v34 }
 0x4d4   : > { %5103 = vmatpush1.msra.mxu1 %v5021_v14  ;;  %5166 = vmatprep.mubr.f32.mxu1 %v13261_v0 }
 0x4d5   : > { %v4963_v13 = vpop.permute.xlu0 %4962 }
 0x4d6   : > { %v4961_v20 = vpop.permute.xlu1 %4960  ;;  %v4966_v48 = vsel %vm652_vm8, %v4963_v13, %v4965_v32  ;;  %v5023_v32 = vmul.f32 %v12383_v41, %v4969_v44 }
 0x4d7   : > { %v4968_v56 = vsel %vm652_vm8, %v4959_v30, %v4961_v20  ;;  %10633 = vmatmul.mubr.msk.f32.vlgmr.msra.gmra.mrb[36].mxu1 %vm402_vm3, %v5028_v34  ;;  %v4967_v63 = vsel %vm652_vm8, %v4961_v20, %v4963_v13  ;;  %v5026_v17 = vmul.f32 %v12388_v45, %v4966_v48  ;;  %v12413_v30 = vrot.slane %v5350_v40, %v11535_v10 }
 0x4d8   : > { %v5024_v50 = vmul.f32 %v12380_v35, %v4968_v56  ;;  %5237 = vmatprep.mubr.f32.mxu1 %v13261_v0  ;;  %v5025_v62 = vmul.f32 %v12393_v53, %v4967_v63  ;;  %v12421_v20 = vrot.slane %v5350_v40, %v12164_v61  ;;  %v12424_v48 = vrot.slane %v5350_v40, %v12167_v1 }
 0x4d9   : > { %v5326_v29 = vpop.permute.xlu0 %5325 }
 0x4da   : > { %5173 = vmatprep.subr.mxu1 %v5024_v50  ;;  %v5324_v39 = vpop.permute.xlu1 %5323 }
 0x4db   : > { %v5345_v14 = vsel %vm1444_vm9, %v5324_v39, %v5326_v29  ;;  %5174 = vmatpush1.msra.mxu1 %v5023_v32 }
 0x4dc   : > { %10634 = vmatmul.mubr.msk.f32.vlgmr.msra.gmra.mrb[38].mxu1 %vm402_vm3, %v5028_v34  ;;  %5244 = vmatprep.subr.mxu1 %v5026_v17  ;;  %v5393_v23 = vmul.f32 %v12403_v46, %v5345_v14  ;;  %v12437_v17 = vrot.slane %v5350_v40, %v12182_v12 }
 0x4dd   : > { %v5328_v60 = vpop.permute.xlu0 %5327  ;;  %5245 = vmatpush1.msra.mxu1 %v5025_v62  ;;  %5308 = vmatprep.mubr.f32.mxu1 %v13261_v0 }
 0x4de   : > { %5404 = vmatprep.subr.mxu1 %v5393_v23  ;;  %v5338_v31 = vpop.permute.xlu1 %5337  ;;  %v5344_v63 = vsel %vm1444_vm9, %v5326_v29, %v5328_v60  ;;  %13276 = vst [vmem:[#allocation10_spill] sm:$0xff] %v12437_v17 }
 0x4df   : > { %v5346_v13 = vsel %vm1444_vm9, %v5338_v31, %v5324_v39  ;;  %v12434_v39 = vrot.slane %v5350_v40, %v12195_v21  ;;  %v5394_v62 = vmul.f32 %v12424_v48, %v5344_v63  ;;  %v12449_v63 = vrot.slane %v5350_v40, %v12208_v26 }
 0x4e0   : > { %v5392_v44 = vmul.f32 %v12413_v30, %v5346_v13  ;;  %10635 = vmatmul.mubr.msk.f32.vlgmr.msra.gmra.mrb[40].mxu1 %vm402_vm3, %v5028_v34 }
 0x4e1   : > { %v5401_v56 = vpop.permute.xlu0 %5400  ;;  %5468 = vmatprep.mubr.f32.mxu1 %v13261_v0  ;;  %13277 = vst [vmem:[#allocation11_spill] sm:$0xff] %v12449_v63 }
 0x4e2   : > { %5405 = vmatpush1.msra.mxu1 %v5392_v44  ;;  %v5330_v50 = vpop.permute.xlu1 %5329 }
 0x4e3   : > { %v5343_v32 = vsel %vm1444_vm9, %v5328_v60, %v5330_v50 }
 0x4e4   : > { %10638 = vmatmul.mubr.msk.f32.vlgmr.msra.gmra.mrb[34].mxu1 %vm402_vm3, %v5401_v56  ;;  %v5395_v34 = vmul.f32 %v12421_v20, %v5343_v32  ;;  %v12452_v32 = vrot.slane %v5350_v40, %v12220_v2 }
 0x4e5   : > { %v5334_v14 = vpop.permute.xlu0 %5333  ;;  %5539 = vmatprep.mubr.f32.mxu1 %v13261_v0 }
 0x4e6   : > { %5475 = vmatprep.subr.mxu1 %v5395_v34  ;;  %v5332_v29 = vpop.permute.xlu1 %5331  ;;  %13278 = vst [vmem:[#allocation12_spill] sm:$0xff] %v12452_v32 }
 0x4e7   : > { %v5341_v23 = vsel %vm1444_vm9, %v5332_v29, %v5334_v14  ;;  %v5342_v60 = vsel %vm1444_vm9, %v5330_v50, %v5332_v29  ;;  %5476 = vmatpush1.msra.mxu1 %v5394_v62 }
 0x4e8   : > { %v5396_v13 = vmul.f32 %v12434_v39, %v5342_v60  ;;  %10639 = vmatmul.mubr.msk.f32.vlgmr.msra.gmra.mrb[36].mxu1 %vm402_vm3, %v5401_v56  ;;  %v5397_v44 = vmul.f32 %v12437_v17, %v5341_v23 }
 0x4e9   : > { %v5697_v34 = vpop.permute.xlu0 %5696  ;;  %5610 = vmatprep.mubr.f32.mxu1 %v13261_v0 }
 0x4ea   : > { %5546 = vmatprep.subr.mxu1 %v5397_v44  ;;  %v5336_v8 = vpop.permute.xlu1 %5335 }
 0x4eb   : > { %v5339_v50 = vsel %vm1444_vm9, %v5336_v8, %v5338_v31  ;;  %v5340_v62 = vsel %vm1444_vm9, %v5334_v14, %v5336_v8  ;;  %5547 = vmatpush1.msra.mxu1 %v5396_v13  ;;  %v10646_v8 = vld [vmem:[%s13229_s5 + $0x5] ss:$8 sm:$0xf] }
 0x4ec   : > { %v5398_v29 = vmul.f32 %v12449_v63, %v5340_v62  ;;  %10640 = vmatmul.mubr.msk.f32.vlgmr.msra.gmra.mrb[38].mxu1 %vm402_vm3, %v5401_v56  ;;  %v5399_v23 = vmul.f32 %v12452_v32, %v5339_v50  ;;  %v10647_v31 = vld [vmem:[%s13229_s5 + $0x5] ss:$8 sm:$0xf0] }
 0x4ed   : > { %v5997_v40 = vpop.permute.xlu0 %5996  ;;  %5681 = vmatprep.mubr.f32.mxu1 %v13261_v0  ;;  %v6019_v44 = vor.u32 %v10647_v31, %v10646_v8 }
 0x4ee   : > { %5617 = vmatprep.subr.mxu1 %v5399_v23  ;;  %v5995_v60 = vpop.permute.xlu1 %5994 }
 0x4ef   : > { %5618 = vmatpush1.msra.mxu1 %v5398_v29  ;;  %v12490_v62 = vrot.slane %v6019_v44, %v11535_v10  ;;  %v12497_v23 = vrot.slane %v6019_v44, %v12164_v61  ;;  %v12504_v31 = vrot.slane %v6019_v44, %v12167_v1  ;;  %v12512_v32 = vrot.slane %v6019_v44, %v12182_v12 }
 0x4f0   : > { %10641 = vmatmul.mubr.msk.f32.vlgmr.msra.gmra.mrb[40].mxu1 %vm402_vm3, %v5401_v56  ;;  %5700 = vmatprep.subr.mxu1 %v11995_v24  ;;  %v12535_v63 = vrot.slane %v6019_v44, %v12220_v2  ;;  %v12540_v17 = vrot.slane %v6019_v44, %v12208_v26 }
 0x4f1   : > { %v5999_v14 = vpop.permute.xlu0 %5998  ;;  %5701 = vmatpush1.msra.mxu1 %v11987_v47  ;;  %5764 = vmatprep.mubr.f32.mxu1 %v13261_v0  ;;  %v12482_v47 = vrot.slane %v6019_v44, %v11538_v11  ;;  %13280 = vst [vmem:[#allocation14_spill] sm:$0xff] %v12490_v62  ;;  %13281 = vst [vmem:[#allocation15_spill] sm:$0xff] %v12497_v23 }
 0x4f2   : > { %5771 = vmatprep.subr.mxu1 %v12011_v28  ;;  %v5993_v13 = vpop.permute.xlu1 %5992  ;;  %v6013_v28 = vsel %vm1620_vm10, %v5995_v60, %v5997_v40  ;;  %13282 = vst [vmem:[#allocation16_spill] sm:$0xff] %v12504_v31  ;;  %13283 = vst [vmem:[#allocation17_spill] sm:$0xff] %v12535_v63 }
 0x4f3   : > { %13279 = vst [vmem:[#allocation13_spill] sm:$0xff] %v12482_v47  ;;  %v6062_v29 = vmul.f32 %v12482_v47, %v6013_v28  ;;  %v6012_v28 = vsel %vm1620_vm10, %v5997_v40, %v5999_v14  ;;  %13284 = vst [vmem:[#allocation18_spill] sm:$0xff] %v12540_v17 }
 0x4f4   : > { %10642 = vmatmul.mubr.msk.f32.vlgmr.msra.gmra.mrb[34].mxu1 %vm402_vm3, %v5697_v34 }
 0x4f5   : > { %5772 = vmatpush1.msra.mxu1 %v12003_v5  ;;  %v12476_v24 = vpop.permute.xlu0 %6069  ;;  %5835 = vmatprep.mubr.f32.mxu1 %v13261_v0 }
 0x4f6   : > { %5842 = vmatprep.subr.mxu1 %v12036_v57  ;;  %v6001_v56 = vpop.permute.xlu1 %6000  ;;  %v6014_v57 = vsel %vm1620_vm10, %v5993_v13, %v5995_v60 }
 0x4f7   : > { %v6061_v60 = vmul.f32 %v12490_v62, %v6014_v57  ;;  %v10653_v57 = vld [vmem:[%s13229_s5 + $0x6] ss:$8 sm:$0xf0] }
 0x4f8   : > { %10643 = vmatmul.mubr.msk.f32.vlgmr.msra.gmra.mrb[36].mxu1 %vm402_vm3, %v5697_v34 }
 0x4f9   : > { %5843 = vmatpush1.msra.mxu1 %v12028_v43  ;;  %v6005_v50 = vpop.permute.xlu0 %6004  ;;  %5906 = vmatprep.mubr.f32.mxu1 %v13261_v0  ;;  %v6011_v43 = vsel %vm1620_vm10, %v5999_v14, %v6001_v56  ;;  %v6063_v14 = vmul.f32 %v12504_v31, %v6012_v28 }
 0x4fa   : > { %5913 = vmatprep.subr.mxu1 %v12018_v42  ;;  %v6003_v5 = vpop.permute.xlu1 %6002  ;;  %v6064_v47 = vmul.f32 %v12497_v23, %v6011_v43  ;;  %v12527_v43 = vrot.slane %v6019_v44, %v12195_v21 }
 0x4fc   : > { %10644 = vmatmul.mubr.msk.f32.vlgmr.msra.gmra.mrb[38].mxu1 %vm402_vm3, %v5697_v34 }
 0x4fd   : > { %5914 = vmatpush1.msra.mxu1 %v12042_v51  ;;  %v6368_v42 = vpop.permute.xlu0 %6367  ;;  %5977 = vmatprep.mubr.f32.mxu1 %v13261_v0  ;;  %v6009_v51 = vsel %vm1620_vm10, %v6003_v5, %v6005_v50 }
 0x4fe   : > { %6073 = vmatprep.subr.mxu1 %v6062_v29  ;;  %v6370_v8 = vpop.permute.xlu1 %6369  ;;  %v10652_v29 = vld [vmem:[%s13229_s5 + $0x6] ss:$8 sm:$0xf]  ;;  %v6066_v62 = vmul.f32 %v12512_v32, %v6009_v51 }
 0x4ff   : > { %v6392_v23 = vor.u32 %v10653_v57, %v10652_v29 }
 0x500   : > { %10645 = vmatmul.mubr.msk.f32.vlgmr.msra.gmra.mrb[40].mxu1 %vm402_vm3, %v5697_v34 }
 0x501   : > { %6074 = vmatpush1.msra.mxu1 %v6061_v60  ;;  %v12522_v40 = vpop.permute.xlu0 %6365  ;;  %6137 = vmatprep.mubr.f32.mxu1 %v13261_v0  ;;  %v6010_v60 = vsel %vm1620_vm10, %v6001_v56, %v6003_v5  ;;  %v12550_v29 = vrot.slane %v6392_v23, %v11538_v11 }
 0x502   : > { %6144 = vmatprep.subr.mxu1 %v6064_v47  ;;  %v6372_v34 = vpop.permute.xlu1 %6371  ;;  %v6065_v31 = vmul.f32 %v12527_v43, %v6010_v60  ;;  %v12565_v60 = vrot.slane %v6392_v23, %v12164_v61 }
 0x503   : > { %13285 = vst [vmem:[#allocation19_spill] sm:$0xff] %v12550_v29 }
 0x504   : > { %10648 = vmatmul.mubr.msk.f32.vlgmr.msra.gmra.mrb[34].mxu1 %vm402_vm3, %v12476_v24  ;;  %13287 = vst [vmem:[#allocation21_spill] sm:$0xff] %v12565_v60 }
 0x505   : > { %6145 = vmatpush1.msra.mxu1 %v6063_v14  ;;  %v6374_v47 = vpop.permute.xlu0 %6373  ;;  %6208 = vmatprep.mubr.f32.mxu1 %v13261_v0  ;;  %v6387_v14 = vsel %vm2411_vm6, %v12522_v40, %v6368_v42 }
 0x506   : > { %6215 = vmatprep.subr.mxu1 %v6066_v62  ;;  %v6007_v28 = vpop.permute.xlu1 %6006  ;;  %v6386_v62 = vsel %vm2411_vm6, %v6368_v42, %v6370_v8  ;;  %v12575_v42 = vrot.slane %v6392_v23, %v12167_v1 }
 0x507   : > { %v6015_v56 = vsel %vm1620_vm10, %v6007_v28, %v5993_v13  ;;  %v6008_v5 = vsel %vm1620_vm10, %v6005_v50, %v6007_v28  ;;  %v12558_v50 = vrot.slane %v6392_v23, %v11535_v10  ;;  %v6384_v28 = vsel %vm2411_vm6, %v6372_v34, %v6374_v47 }
 0x508   : > { %v6068_v51 = vmul.f32 %v12535_v63, %v6015_v56  ;;  %10649 = vmatmul.mubr.msk.f32.vlgmr.msra.gmra.mrb[36].mxu1 %vm402_vm3, %v12476_v24  ;;  %v6067_v57 = vmul.f32 %v12540_v17, %v6008_v5  ;;  %13288 = vst [vmem:[#allocation22_spill] sm:$0xff] %v12575_v42  ;;  %v6385_v17 = vsel %vm2411_vm6, %v6370_v8, %v6372_v34  ;;  %v10659_v8 = vld [vmem:[%s13229_s5 + $0x7] ss:$8 sm:$0xf0] }
 0x509   : > { %6216 = vmatpush1.msra.mxu1 %v6065_v31  ;;  %v6376_v44 = vpop.permute.xlu0 %6375  ;;  %6279 = vmatprep.mubr.f32.mxu1 %v13261_v0  ;;  %13286 = vst [vmem:[#allocation20_spill] sm:$0xff] %v12558_v50  ;;  %v6435_v31 = vmul.f32 %v12550_v29, %v6386_v62  ;;  %v6437_v63 = vmul.f32 %v12565_v60, %v6384_v28 }
 0x50a   : > { %6286 = vmatprep.subr.mxu1 %v6068_v51  ;;  %v12555_v13 = vpop.permute.xlu1 %6442  ;;  %v6434_v51 = vmul.f32 %v12558_v50, %v6387_v14  ;;  %v12581_v62 = vrot.slane %v6392_v23, %v12182_v12  ;;  %v10658_v14 = vld [vmem:[%s13229_s5 + $0x7] ss:$8 sm:$0xf]  ;;  %v6436_v28 = vmul.f32 %v12575_v42, %v6385_v17  ;;  %v12602_v50 = vrot.slane %v6392_v23, %v12220_v2 }
 0x50b   : > { %v6765_v29 = vor.u32 %v10659_v8, %v10658_v14 }
 0x50c   : > { %10650 = vmatmul.mubr.msk.f32.vlgmr.msra.gmra.mrb[38].mxu1 %vm402_vm3, %v12476_v24  ;;  %13289 = vst [vmem:[#allocation23_spill] sm:$0xff] %v12581_v62  ;;  %13291 = vst [vmem:[#allocation25_spill] sm:$0xff] %v12602_v50 }
 0x50d   : > { %6287 = vmatpush1.msra.mxu1 %v6067_v57  ;;  %v6743_v56 = vpop.permute.xlu0 %6742  ;;  %6350 = vmatprep.mubr.f32.mxu1 %v13261_v0  ;;  %v12618_v8 = vrot.slane %v6765_v29, %v11538_v11 }
 0x50e   : > { %6446 = vmatprep.subr.mxu1 %v6435_v31  ;;  %v6378_v5 = vpop.permute.xlu1 %6377 }
 0x50f   : > { %v6382_v57 = vsel %vm2411_vm6, %v6376_v44, %v6378_v5  ;;  %13293 = vst [vmem:[#allocation27_spill] sm:$0xff] %v12618_v8 }
 0x510   : > { %10651 = vmatmul.mubr.msk.f32.vlgmr.msra.gmra.mrb[40].mxu1 %vm402_vm3, %v12476_v24  ;;  %v12596_v24 = vrot.slane %v6392_v23, %v12195_v21  ;;  %v6439_v60 = vmul.f32 %v12581_v62, %v6382_v57  ;;  %v12678_v62 = vrot.slane %v6765_v29, %v12208_v26 }
 0x511   : > { %6447 = vmatpush1.msra.mxu1 %v6434_v51  ;;  %v6380_v31 = vpop.permute.xlu0 %6379  ;;  %6510 = vmatprep.mubr.f32.mxu1 %v13261_v0  ;;  %v6383_v51 = vsel %vm2411_vm6, %v6374_v47, %v6376_v44  ;;  %v12612_v44 = vrot.slane %v6392_v23, %v12208_v26 }
 0x512   : > { %6517 = vmatprep.subr.mxu1 %v6437_v63  ;;  %v6741_v34 = vpop.permute.xlu1 %6740  ;;  %13290 = vst [vmem:[#allocation24_spill] sm:$0xff] %v12596_v24  ;;  %v6388_v63 = vsel %vm2411_vm6, %v6380_v31, %v12522_v40  ;;  %v6438_v47 = vmul.f32 %v12596_v24, %v6383_v51  ;;  %v6381_v57 = vsel %vm2411_vm6, %v6378_v5, %v6380_v31 }
 0x513   : > { %13292 = vst [vmem:[#allocation26_spill] sm:$0xff] %v12612_v44  ;;  %v6441_v14 = vmul.f32 %v12602_v50, %v6388_v63  ;;  %v6759_v40 = vsel %vm2510_vm7, %v6741_v34, %v6743_v56  ;;  %v6440_v5 = vmul.f32 %v12612_v44, %v6381_v57  ;;  %v12629_v31 = vrot.slane %v6765_v29, %v11535_v10 }
 0x514   : > { %10654 = vmatmul.mubr.msk.f32.vlgmr.msra.gmra.mrb[34].mxu1 %vm402_vm3, %v12555_v13  ;;  %v12635_v63 = vrot.slane %v6765_v29, %v12164_v61  ;;  %v12650_v50 = vrot.slane %v6765_v29, %v12182_v12  ;;  %v12673_v24 = vrot.slane %v6765_v29, %v12220_v2 }
 0x515   : > { %6518 = vmatpush1.msra.mxu1 %v6436_v28  ;;  %v6745_v17 = vpop.permute.xlu0 %6744  ;;  %6581 = vmatprep.mubr.f32.mxu1 %v13261_v0  ;;  %13294 = vst [vmem:[#allocation28_spill] sm:$0xff] %v12629_v31  ;;  %v6808_v28 = vmul.f32 %v12618_v8, %v6759_v40  ;;  %v12643_v40 = vrot.slane %v6765_v29, %v12167_v1 }
 0x516   : > { %6588 = vmatprep.subr.mxu1 %v6439_v60  ;;  %v6739_v42 = vpop.permute.xlu1 %6738  ;;  %13295 = vst [vmem:[#allocation29_spill] sm:$0xff] %v12635_v63  ;;  %v6758_v8 = vsel %vm2510_vm7, %v6743_v56, %v6745_v17  ;;  %v10665_v56 = vld [vmem:[%s13229_s5 + $0x40] ss:$8 sm:$0xf0] }
 0x517   : > { %v6760_v51 = vsel %vm2510_vm7, %v6739_v42, %v6741_v34  ;;  %13296 = vst [vmem:[#allocation30_spill] sm:$0xff] %v12643_v40 }
 0x518   : > { %10655 = vmatmul.mubr.msk.f32.vlgmr.msra.gmra.mrb[36].mxu1 %vm402_vm3, %v12555_v13  ;;  %v6807_v34 = vmul.f32 %v12629_v31, %v6760_v51  ;;  %v10664_v51 = vld [vmem:[%s13229_s5 + $0x40] ss:$8 sm:$0xf] }
 0x519   : > { %6589 = vmatpush1.msra.mxu1 %v6438_v47  ;;  %v12624_v60 = vpop.permute.xlu0 %6815  ;;  %6652 = vmatprep.mubr.f32.mxu1 %v13261_v0  ;;  %v7138_v31 = vor.u32 %v10665_v56, %v10664_v51 }
 0x51a   : > { %6659 = vmatprep.subr.mxu1 %v6441_v14  ;;  %v6747_v23 = vpop.permute.xlu1 %6746 }
 0x51b   : > { %v6757_v47 = vsel %vm2510_vm7, %v6745_v17, %v6747_v23 }
 0x51c   : > { %10656 = vmatmul.mubr.msk.f32.vlgmr.msra.gmra.mrb[38].mxu1 %vm402_vm3, %v12555_v13  ;;  %v6810_v44 = vmul.f32 %v12635_v63, %v6757_v47  ;;  %v6809_v47 = vmul.f32 %v12643_v40, %v6758_v8 }
 0x51d   : > { %6660 = vmatpush1.msra.mxu1 %v6440_v5  ;;  %v6751_v14 = vpop.permute.xlu0 %6750  ;;  %6723 = vmatprep.mubr.f32.mxu1 %v13261_v0 }
 0x51e   : > { %6819 = vmatprep.subr.mxu1 %v6808_v28  ;;  %v6749_v57 = vpop.permute.xlu1 %6748 }
 0x51f   : > { %v6755_v5 = vsel %vm2510_vm7, %v6749_v57, %v6751_v14 }
 0x520   : > { %10657 = vmatmul.mubr.msk.f32.vlgmr.msra.gmra.mrb[40].mxu1 %vm402_vm3, %v12555_v13  ;;  %v12665_v13 = vrot.slane %v6765_v29, %v12195_v21  ;;  %v6812_v63 = vmul.f32 %v12650_v50, %v6755_v5 }
 0x521   : > { %6820 = vmatpush1.msra.mxu1 %v6807_v34  ;;  %v7114_v28 = vpop.permute.xlu0 %7113  ;;  %6883 = vmatprep.mubr.f32.mxu1 %v13261_v0  ;;  %v6756_v34 = vsel %vm2510_vm7, %v6747_v23, %v6749_v57  ;;  %v12683_v57 = vrot.slane %v7138_v31, %v11538_v11  ;;  %v12694_v11 = vrot.slane %v7138_v31, %v11535_v10 }
 0x522   : > { %6890 = vmatprep.subr.mxu1 %v6810_v44  ;;  %v7116_v17 = vpop.permute.xlu1 %7115  ;;  %v6811_v40 = vmul.f32 %v12665_v13, %v6756_v34  ;;  %v12701_v34 = vrot.slane %v7138_v31, %v12164_v61 }
 0x524   : > { %10660 = vmatmul.mubr.msk.f32.vlgmr.msra.gmra.mrb[34].mxu1 %vm402_vm3, %v12624_v60 }
 0x525   : > { %6891 = vmatpush1.msra.mxu1 %v6809_v47  ;;  %v7112_v44 = vpop.permute.xlu0 %7111  ;;  %6954 = vmatprep.mubr.f32.mxu1 %v13261_v0 }
 0x526   : > { %6961 = vmatprep.subr.mxu1 %v6812_v63  ;;  %v6753_v8 = vpop.permute.xlu1 %6752  ;;  %v7132_v63 = vsel %vm2609_vm11, %v7114_v28, %v7116_v17  ;;  %v7133_v47 = vsel %vm2609_vm11, %v7112_v44, %v7114_v28 }
 0x527   : > { %v6761_v23 = vsel %vm2510_vm7, %v6753_v8, %v6739_v42  ;;  %v6754_v5 = vsel %vm2510_vm7, %v6751_v14, %v6753_v8  ;;  %v7181_v14 = vmul.f32 %v12683_v57, %v7132_v63 }
 0x528   : > { %v6814_v51 = vmul.f32 %v12673_v24, %v6761_v23  ;;  %10661 = vmatmul.mubr.msk.f32.vlgmr.msra.gmra.mrb[36].mxu1 %vm402_vm3, %v12624_v60  ;;  %v6813_v56 = vmul.f32 %v12678_v62, %v6754_v5  ;;  %v7180_v23 = vmul.f32 %v12694_v11, %v7133_v47  ;;  %v12710_v5 = vrot.slane %v7138_v31, %v12167_v1 }
 0x529   : > { %6962 = vmatpush1.msra.mxu1 %v6811_v40  ;;  %v7120_v29 = vpop.permute.xlu0 %7119  ;;  %7025 = vmatprep.mubr.f32.mxu1 %v13261_v0 }
 0x52a   : > { %7032 = vmatprep.subr.mxu1 %v6814_v51  ;;  %v7118_v42 = vpop.permute.xlu1 %7117  ;;  %v12718_v51 = vrot.slane %v7138_v31, %v12182_v12  ;;  %v12730_v12 = vrot.slane %v7138_v31, %v12220_v2 }
 0x52b   : > { %v7130_v40 = vsel %vm2609_vm11, %v7118_v42, %v7120_v29  ;;  %v7131_v61 = vsel %vm2609_vm11, %v7116_v17, %v7118_v42 }
 0x52c   : > { %10662 = vmatmul.mubr.msk.f32.vlgmr.msra.gmra.mrb[38].mxu1 %vm402_vm3, %v12624_v60  ;;  %v7183_v28 = vmul.f32 %v12701_v34, %v7130_v40  ;;  %13297 = vst [vmem:[#allocation31_spill] sm:$0xff] %v12718_v51  ;;  %v7182_v1 = vmul.f32 %v12710_v5, %v7131_v61  ;;  %13299 = vst [vmem:[#allocation33_spill] sm:$0xff] %v12730_v12  ;;  %v12739_v40 = vrot.slane %v7138_v31, %v12208_v26 }
 0x52d   : > { %7033 = vmatpush1.msra.mxu1 %v6813_v56  ;;  %v7122_v8 = vpop.permute.xlu0 %7121  ;;  %7096 = vmatprep.mubr.f32.mxu1 %v13261_v0 }
 0x52e   : > { %7192 = vmatprep.subr.mxu1 %v7181_v14  ;;  %v7189_v10 = vpop.permute.xlu1 %7188  ;;  %v12723_v14 = vrot.slane %v7138_v31, %v12195_v21  ;;  %13300 = vst [vmem:[#allocation34_spill] sm:$0xff] %v12739_v40 }
 0x530   : > { %10663 = vmatmul.mubr.msk.f32.vlgmr.msra.gmra.mrb[40].mxu1 %vm402_vm3, %v12624_v60  ;;  %13298 = vst [vmem:[#allocation32_spill] sm:$0xff] %v12723_v14  ;;  %v7129_v60 = vsel %vm2609_vm11, %v7120_v29, %v7122_v8 }
 0x531   : > { %7193 = vmatpush1.msra.mxu1 %v7180_v23  ;;  %7256 = vmatprep.mubr.f32.mxu1 %v13261_v0  ;;  %v7126_v63 = vpop.permute.xlu0 %7125  ;;  %v7184_v21 = vmul.f32 %v12723_v14, %v7129_v60 }
 0x532   : > { %7263 = vmatprep.subr.mxu1 %v7183_v28  ;;  %v7124_v56 = vpop.permute.xlu1 %7123  ;;  %v7134_v47 = vsel %vm2609_vm11, %v7126_v63, %v7112_v44 }
 0x533   : > { %v7128_v17 = vsel %vm2609_vm11, %v7122_v8, %v7124_v56  ;;  %v7187_v29 = vmul.f32 %v12730_v12, %v7134_v47  ;;  %v7127_v2 = vsel %vm2609_vm11, %v7124_v56, %v7126_v63 }
 0x534   : > { %v7185_v42 = vmul.f32 %v12718_v51, %v7128_v17  ;;  %10666 = vmatmul.mubr.msk.f32.vlgmr.msra.gmra.mrb[34].mxu1 %vm402_vm3, %v7189_v10  ;;  %v7186_v44 = vmul.f32 %v12739_v40, %v7127_v2 }
 0x535   : > { %7264 = vmatpush1.msra.mxu1 %v7182_v1  ;;  %7327 = vmatprep.mubr.f32.mxu1 %v13261_v0 }
 0x536   : > { %7334 = vmatprep.subr.mxu1 %v7185_v42  ;;  %v12876_v2 = vpop.permute.xlu0 %7558 }
 0x538   : > { %10667 = vmatmul.mubr.msk.f32.vlgmr.msra.gmra.mrb[36].mxu1 %vm402_vm3, %v7189_v10 }
 0x539   : > { %7335 = vmatpush1.msra.mxu1 %v7184_v21  ;;  %7398 = vmatprep.mubr.f32.mxu1 %v13261_v0 }
 0x53a   : > { %7405 = vmatprep.subr.mxu1 %v7187_v29 }
 0x53c   : > { %10668 = vmatmul.mubr.msk.f32.vlgmr.msra.gmra.mrb[38].mxu1 %vm402_vm3, %v7189_v10 }
 0x53d   : > { %7406 = vmatpush1.msra.mxu1 %v7186_v44  ;;  %7469 = vmatprep.mubr.f32.mxu1 %v13261_v0 }
 0x540   : > { %10669 = vmatmul.mubr.msk.f32.vlgmr.msra.gmra.mrb[40].mxu1 %vm402_vm3, %v7189_v10 }
 0x607   : > { %v7258_v26 = vpop.f32.mrb[34].mxu1 }
 0x608   : > { %v12750_v31 = vmax.f32 %v7258_v26, 0.0  ;;  %v7260_v8 = vpop.f32.mrb[35].mxu1 }
 0x609   : > { %v12752_v23 = vmax.f32 %v7260_v8, 0.0 }
 0x60a   : > { %7525 = vrot.lane.b32.xlu1 %v12750_v31, %s11260_s19 }
 0x60b   : > { %7527 = vrot.lane.b32.xlu0 %v12752_v23, %s11260_s19  ;;  %v7329_v61 = vpop.f32.mrb[36].mxu1 }
 0x60c   : > { %v12758_v28 = vmax.f32 %v7329_v61, 0.0  ;;  %v7331_v63 = vpop.f32.mrb[37].mxu1 }
 0x60d   : > { %v12760_v56 = vmax.f32 %v7331_v63, 0.0 }
 0x60f   : > { %7529 = vrot.lane.b32.xlu0 %v12758_v28, %s11260_s19  ;;  %7531 = vrot.lane.b32.xlu1 %v12760_v56, %s11260_s19  ;;  %v7400_v10 = vpop.f32.mrb[38].mxu1 }
 0x610   : > { %v7402_v1 = vpop.f32.mrb[39].mxu1  ;;  %v12776_v21 = vmax.f32 %v7400_v10, 0.0 }
 0x611   : > { %v12766_v17 = vmax.f32 %v7402_v1, 0.0 }
 0x613   : > { %7535 = vrot.lane.b32.xlu0 %v12766_v17, %s11260_s19  ;;  %v7471_v60 = vpop.f32.mrb[40].mxu1 }
 0x614   : > { %v7473_v42 = vpop.f32.mrb[41].mxu1  ;;  %v12782_v29 = vmax.f32 %v7471_v60, 0.0 }
 0x615   : > { %v12770_v47 = vmax.f32 %v7473_v42, 0.0 }
 0x617   : > { %7493 = vrot.lane.b32.xlu0 %v12750_v31, %s11272_s13  ;;  %7539 = vrot.lane.b32.xlu1 %v12770_v47, %s11260_s19 }
 0x61b   : > { %7499 = vrot.lane.b32.xlu0 %v12760_v56, %s11272_s13  ;;  %7533 = vrot.lane.b32.xlu1 %v12776_v21, %s11260_s19 }
 0x61f   : > { %7507 = vrot.lane.b32.xlu0 %v12770_v47, %s11272_s13  ;;  %7537 = vrot.lane.b32.xlu1 %v12782_v29, %s11260_s19 }
 0x623   : > { %7503 = vrot.lane.b32.xlu0 %v12766_v17, %s11272_s13  ;;  %7495 = vrot.lane.b32.xlu1 %v12752_v23, %s11272_s13 }
 0x627   : > { %8132 = vrot.lane.b32.xlu0 %v12750_v31, %s11276_s22  ;;  %7497 = vrot.lane.b32.xlu1 %v12758_v28, %s11272_s13 }
 0x62b   : > { %8138 = vrot.lane.b32.xlu0 %v12760_v56, %s11276_s22  ;;  %7501 = vrot.lane.b32.xlu1 %v12776_v21, %s11272_s13 }
 0x62f   : > { %8146 = vrot.lane.b32.xlu0 %v12770_v47, %s11276_s22  ;;  %7505 = vrot.lane.b32.xlu1 %v12782_v29, %s11272_s13 }
 0x633   : > { %8140 = vrot.lane.b32.xlu0 %v12776_v21, %s11276_s22  ;;  %8134 = vrot.lane.b32.xlu1 %v12752_v23, %s11276_s22 }
 0x637   : > { %8144 = vrot.lane.b32.xlu0 %v12782_v29, %s11276_s22  ;;  %8136 = vrot.lane.b32.xlu1 %v12758_v28, %s11276_s22 }
 0x63b   : > { %8462 = vrot.lane.b32.xlu0 %v12752_v23, %s11256_s17  ;;  %8164 = vrot.lane.b32.xlu1 %v12313_v27, %s11266_s14 }
 0x63f   : > { %8464 = vrot.lane.b32.xlu0 %v12758_v28, %s11256_s17  ;;  %8142 = vrot.lane.b32.xlu1 %v12766_v17, %s11276_s22 }
 0x643   : > { %8492 = vrot.lane.b32.xlu0 %v12313_v27, %s11271_s25  ;;  %8460 = vrot.lane.b32.xlu1 %v12750_v31, %s11256_s17 }
 0x647   : > { %8470 = vrot.lane.b32.xlu0 %v12766_v17, %s11256_s17  ;;  %8474 = vrot.lane.b32.xlu1 %v12770_v47, %s11256_s17 }
 0x64b   : > { %8788 = vrot.lane.b32.xlu0 %v12313_v27, %s11243_s21  ;;  %8466 = vrot.lane.b32.xlu1 %v12760_v56, %s11256_s17 }
 0x64f   : > { %9088 = vrot.lane.b32.xlu0 %v12758_v28, %s11259_s18  ;;  %8468 = vrot.lane.b32.xlu1 %v12776_v21, %s11256_s17 }
 0x653   : > { %9090 = vrot.lane.b32.xlu0 %v12760_v56, %s11259_s18  ;;  %8472 = vrot.lane.b32.xlu1 %v12782_v29, %s11256_s17 }
 0x657   : > { %9116 = vrot.lane.b32.xlu0 %v12313_v27, %s11246_s24  ;;  %9086 = vrot.lane.b32.xlu1 %v12752_v23, %s11259_s18 }
 0x65b   : > { %9096 = vrot.lane.b32.xlu0 %v12782_v29, %s11259_s18  ;;  %9084 = vrot.lane.b32.xlu1 %v12750_v31, %s11259_s18 }
 0x65f   : > { %9414 = vrot.lane.b32.xlu0 %v12752_v23, %s11273_s30  ;;  %9092 = vrot.lane.b32.xlu1 %v12776_v21, %s11259_s18 }
 0x663   : > { %9412 = vrot.lane.b32.xlu0 %v12750_v31, %s11273_s30  ;;  %9094 = vrot.lane.b32.xlu1 %v12766_v17, %s11259_s18 }
 0x667   : > { %9420 = vrot.lane.b32.xlu0 %v12776_v21, %s11273_s30  ;;  %9416 = vrot.lane.b32.xlu1 %v12758_v28, %s11273_s30 }
 0x66b   : > { %9422 = vrot.lane.b32.xlu0 %v12766_v17, %s11273_s30  ;;  %9418 = vrot.lane.b32.xlu1 %v12760_v56, %s11273_s30 }
 0x66f   : > { %9744 = vrot.lane.b32.xlu0 %v12758_v28, %s11243_s21  ;;  %9098 = vrot.lane.b32.xlu1 %v12770_v47, %s11259_s18 }
 0x673   : > { %9426 = vrot.lane.b32.xlu0 %v12770_v47, %s11273_s30  ;;  %9444 = vrot.lane.b32.xlu1 %v12313_v27, %s11249_s29 }
 0x677   : > { %9746 = vrot.lane.b32.xlu0 %v12760_v56, %s11243_s21  ;;  %9424 = vrot.lane.b32.xlu1 %v12782_v29, %s11273_s30 }
 0x67b   : > { %9772 = vrot.lane.b32.xlu0 %v12313_v27, %s11250_s10  ;;  %9742 = vrot.lane.b32.xlu1 %v12752_v23, %s11243_s21  ;;  %s13329_s10 = sshll.u32 %s13331_s28, 3 }
 0x67c   : > { %v7526_v44 = vpop.permute.xlu1 %7525  ;;  %s344_s19 = scalar_lea.vmem %s13232_s8, %s13329_s10 }
 0x67d   : > { %v7528_v26 = vpop.permute.xlu0 %7527 }
 0x67e   : > { %v7547_v8 = vsel %vm553_vm5, %v7526_v44, %v7528_v26 }
 0x67f   : > { %v7550_v61 = vmul.f32 %v7547_v8, %v12116_v54  ;;  %9752 = vrot.lane.b32.xlu0 %v12782_v29, %s11243_s21  ;;  %9740 = vrot.lane.b32.xlu1 %v12750_v31, %s11243_s21 }
 0x681   : > { %7562 = vmatprep.subr.mxu0 %v7550_v61  ;;  %v7530_v63 = vpop.permute.xlu0 %7529  ;;  %v7532_v10 = vpop.permute.xlu1 %7531 }
 0x682   : > { %v7545_v54 = vsel %vm553_vm5, %v7530_v63, %v7532_v10  ;;  %v7546_v61 = vsel %vm553_vm5, %v7528_v26, %v7530_v63 }
 0x683   : > { %10070 = vrot.lane.b32.xlu0 %v12752_v23, %s13275_s12  ;;  %9748 = vrot.lane.b32.xlu1 %v12776_v21, %s11243_s21  ;;  %v7552_v40 = vmul.f32 %v7545_v54, %v12179_v7  ;;  %v7551_v51 = vmul.f32 %v7546_v61, %v12186_v15 }
 0x685   : > { %v7536_v1 = vpop.permute.xlu0 %7535 }
 0x687   : > { %10068 = vrot.lane.b32.xlu0 %v12750_v31, %s13275_s12  ;;  %9750 = vrot.lane.b32.xlu1 %v12766_v17, %s11243_s21 }
 0x689   : > { %v7494_v60 = vpop.permute.xlu0 %7493  ;;  %v7540_v42 = vpop.permute.xlu1 %7539 }
 0x68a   : > { %v7548_v8 = vsel %vm553_vm5, %v7540_v42, %v7526_v44 }
 0x68b   : > { %v7549_v0 = vmul.f32 %v7548_v8, %v12173_v6  ;;  %10076 = vrot.lane.b32.xlu0 %v12776_v21, %s13275_s12  ;;  %10072 = vrot.lane.b32.xlu1 %v12758_v28, %s13275_s12 }
 0x68d   : > { %v7500_v12 = vpop.permute.xlu0 %7499  ;;  %7563 = vmatpush1.msra.mxu0 %v7549_v0  ;;  %v7534_v14 = vpop.permute.xlu1 %7533  ;;  %v13301_v0 = vmov 0.0  }
 0x68e   : > { %v7543_v44 = vsel %vm553_vm5, %v7534_v14, %v7536_v1  ;;  %v7544_v26 = vsel %vm553_vm5, %v7532_v10, %v7534_v14  ;;  %10670 = vmatmul.mubr.msk.f32.vlgmr.msra.gmra.mrb[2].mxu0 %vm402_vm3, %v12876_v2  ;;  %7633 = vmatprep.subr.mxu0 %v7552_v40 }
 0x68f   : > { %v7553_v6 = vmul.f32 %v7544_v26, %v12213_v3  ;;  %v7554_v63 = vmul.f32 %v7543_v44, %v12205_v52  ;;  %10078 = vrot.lane.b32.xlu0 %v12766_v17, %s13275_s12  ;;  %9754 = vrot.lane.b32.xlu1 %v12770_v47, %s11243_s21  ;;  %s13302_s21 = smov 64  }
 0x690   : > { %7634 = vmatpush1.msra.mxu0 %v7551_v51  ;;  %7697 = vmatprep.mubr.f32.mxu0 %v13301_v0 }
 0x691   : > { %v7508_v7 = vpop.permute.xlu0 %7507  ;;  %7704 = vmatprep.subr.mxu0 %v7554_v63  ;;  %v7538_v15 = vpop.permute.xlu1 %7537 }
 0x692   : > { %v7541_v14 = vsel %vm553_vm5, %v7538_v15, %v7540_v42  ;;  %v7542_v3 = vsel %vm553_vm5, %v7536_v1, %v7538_v15  ;;  %10671 = vmatmul.mubr.msk.f32.vlgmr.msra.gmra.mrb[4].mxu0 %vm402_vm3, %v12876_v2  ;;  %v7516_v1 = vsel %vm381_vm15, %v7508_v7, %v7494_v60 }
 0x693   : > { %v7555_v52 = vmul.f32 %v7542_v3, %v12238_v37  ;;  %v7556_v40 = vmul.f32 %v7541_v14, %v12247_v18  ;;  %7705 = vmatpush1.msra.mxu0 %v7553_v6  ;;  %10082 = vrot.lane.b32.xlu0 %v12770_v47, %s13275_s12  ;;  %v7517_v54 = vmul.f32 %v7516_v1, %v12271_v36 }
 0x694   : > { %10074 = vrot.lane.b32.xlu1 %v12760_v56, %s13275_s12  ;;  %7768 = vmatprep.mubr.f32.mxu0 %v13301_v0 }
 0x695   : > { %v7504_v51 = vpop.permute.xlu0 %7503  ;;  %7775 = vmatprep.subr.mxu0 %v7556_v40  ;;  %v7496_v10 = vpop.permute.xlu1 %7495 }
 0x696   : > { %v7515_v37 = vsel %vm381_vm15, %v7494_v60, %v7496_v10  ;;  %10672 = vmatmul.mubr.msk.f32.vlgmr.msra.gmra.mrb[6].mxu0 %vm402_vm3, %v12876_v2 }
 0x697   : > { %v7518_v18 = vmul.f32 %v7515_v37, %v12263_v49  ;;  %7776 = vmatpush1.msra.mxu0 %v7555_v52  ;;  %7839 = vmatprep.mubr.f32.mxu0 %v13301_v0 }
 0x698   : > { %10100 = vrot.lane.b32.xlu1 %v12313_v27, %s13302_s21 }
 0x699   : > { %v8133_v42 = vpop.permute.xlu0 %8132  ;;  %7848 = vmatprep.subr.mxu0 %v7518_v18  ;;  %v7498_v8 = vpop.permute.xlu1 %7497 }
 0x69a   : > { %v7513_v61 = vsel %vm381_vm15, %v7498_v8, %v7500_v12  ;;  %v7514_v60 = vsel %vm381_vm15, %v7496_v10, %v7498_v8  ;;  %10673 = vmatmul.mubr.msk.f32.vlgmr.msra.gmra.mrb[8].mxu0 %vm402_vm3, %v12876_v2 }
 0x69b   : > { %v7519_v49 = vmul.f32 %v7514_v60, %v12279_v4  ;;  %v7520_v44 = vmul.f32 %v7513_v61, %v12282_v55  ;;  %7849 = vmatpush1.msra.mxu0 %v7517_v54  ;;  %7912 = vmatprep.mubr.f32.mxu0 %v13301_v0 }
 0x69c   : > { %10080 = vrot.lane.b32.xlu1 %v12782_v29, %s13275_s12 }
 0x69d   : > { %v8139_v36 = vpop.permute.xlu0 %8138  ;;  %7919 = vmatprep.subr.mxu0 %v7520_v44  ;;  %v7502_v26 = vpop.permute.xlu1 %7501 }
 0x69e   : > { %v7511_v6 = vsel %vm381_vm15, %v7502_v26, %v7504_v51  ;;  %v7512_v63 = vsel %vm381_vm15, %v7500_v12, %v7502_v26  ;;  %10674 = vmatmul.mubr.msk.f32.vlgmr.msra.gmra.mrb[2].mxu0 %vm402_vm3, %v12313_v27  ;;  %v11165_v27 = vld [vmem:[%s13230_s6] sm:$0xff] }
 0x69f   : > { %v7521_v4 = vmul.f32 %v7512_v63, %v12299_v19  ;;  %v7522_v55 = vmul.f32 %v7511_v6, %v12302_v16  ;;  %7920 = vmatpush1.msra.mxu0 %v7519_v49  ;;  %7983 = vmatprep.mubr.f32.mxu0 %v13301_v0 }
 0x6a1   : > { %v8147_v2 = vpop.permute.xlu0 %8146  ;;  %7990 = vmatprep.subr.mxu0 %v7522_v55  ;;  %v7506_v15 = vpop.permute.xlu1 %7505 }
 0x6a2   : > { %v7509_v14 = vsel %vm381_vm15, %v7506_v15, %v7508_v7  ;;  %v7510_v3 = vsel %vm381_vm15, %v7504_v51, %v7506_v15  ;;  %10675 = vmatmul.mubr.msk.f32.vlgmr.msra.gmra.mrb[4].mxu0 %vm402_vm3, %v11165_v27  ;;  %v8155_v7 = vsel %vm652_vm8, %v8147_v2, %v8133_v42 }
 0x6a3   : > { %v7523_v19 = vmul.f32 %v7510_v3, %v12323_v33  ;;  %v7524_v16 = vmul.f32 %v7509_v14, %v12328_v38  ;;  %7991 = vmatpush1.msra.mxu0 %v7521_v4  ;;  %8054 = vmatprep.mubr.f32.mxu0 %v13301_v0  ;;  %v8156_v33 = vmul.f32 %v8155_v7, %v12349_v25  ;;  %v13303_v7 = vld [vmem:[#allocation10_spill] sm:$0xff] }
 0x6a5   : > { %v8141_v12 = vpop.permute.xlu0 %8140  ;;  %8061 = vmatprep.subr.mxu0 %v7524_v16  ;;  %v8135_v52 = vpop.permute.xlu1 %8134 }
 0x6a6   : > { %v8154_v40 = vsel %vm652_vm8, %v8133_v42, %v8135_v52  ;;  %10676 = vmatmul.mubr.msk.f32.vlgmr.msra.gmra.mrb[6].mxu0 %vm402_vm3, %v11165_v27  ;;  %v8151_v42 = vsel %vm652_vm8, %v8139_v36, %v8141_v12 }
 0x6a7   : > { %v8157_v51 = vmul.f32 %v8154_v40, %v12342_v22  ;;  %8062 = vmatpush1.msra.mxu0 %v7523_v19  ;;  %8125 = vmatprep.mubr.f32.mxu0 %v13301_v0  ;;  %v8160_v44 = vmul.f32 %v8151_v42, %v12383_v41 }
 0x6a9   : > { %v8145_v38 = vpop.permute.xlu0 %8144  ;;  %8168 = vmatprep.subr.mxu0 %v8157_v51  ;;  %v8137_v10 = vpop.permute.xlu1 %8136 }
 0x6aa   : > { %v8152_v1 = vsel %vm652_vm8, %v8137_v10, %v8139_v36  ;;  %v8153_v37 = vsel %vm652_vm8, %v8135_v52, %v8137_v10  ;;  %10677 = vmatmul.mubr.msk.f32.vlgmr.msra.gmra.mrb[8].mxu0 %vm402_vm3, %v11165_v27 }
 0x6ab   : > { %v8158_v18 = vmul.f32 %v8153_v37, %v12354_v58  ;;  %v8159_v22 = vmul.f32 %v8152_v1, %v12357_v59  ;;  %8169 = vmatpush1.msra.mxu0 %v8156_v33  ;;  %8232 = vmatprep.mubr.f32.mxu0 %v13301_v0  ;;  %v8148_v58 = vsel %vm652_vm8, %v8145_v38, %v8147_v2  ;;  %v13305_v1 = vld [vmem:[#allocation12_spill] sm:$0xff] }
 0x6ac   : > { %v8163_v36 = vmul.f32 %v8148_v58, %v12388_v45  ;;  %v13307_v58 = vld [vmem:[#allocation14_spill] sm:$0xff] }
 0x6ad   : > { %v8463_v54 = vpop.permute.xlu0 %8462  ;;  %8239 = vmatprep.subr.mxu0 %v8159_v22  ;;  %v8165_v25 = vpop.permute.xlu1 %8164 }
 0x6ae   : > { %10678 = vmatmul.mubr.msk.f32.vlgmr.msra.gmra.mrb[2].mxu0 %vm402_vm3, %v8165_v25 }
 0x6af   : > { %8240 = vmatpush1.msra.mxu0 %v8158_v18  ;;  %8303 = vmatprep.mubr.f32.mxu0 %v13301_v0 }
 0x6b1   : > { %v8465_v8 = vpop.permute.xlu0 %8464  ;;  %v8143_v61 = vpop.permute.xlu1 %8142 }
 0x6b2   : > { %v8150_v59 = vsel %vm652_vm8, %v8141_v12, %v8143_v61  ;;  %10679 = vmatmul.mubr.msk.f32.vlgmr.msra.gmra.mrb[4].mxu0 %vm402_vm3, %v8165_v25  ;;  %v8149_v60 = vsel %vm652_vm8, %v8143_v61, %v8145_v38  ;;  %v13304_v38 = vld [vmem:[#allocation11_spill] sm:$0xff] }
 0x6b3   : > { %v8161_v49 = vmul.f32 %v8150_v59, %v12380_v35  ;;  %8374 = vmatprep.mubr.f32.mxu0 %v13301_v0  ;;  %v8162_v63 = vmul.f32 %v8149_v60, %v12393_v53 }
 0x6b5   : > { %v8493_v26 = vpop.permute.xlu0 %8492  ;;  %8310 = vmatprep.subr.mxu0 %v8161_v49  ;;  %v8461_v6 = vpop.permute.xlu1 %8460  ;;  %v13308_v49 = vld [vmem:[#allocation15_spill] sm:$0xff] }
 0x6b6   : > { %v8482_v4 = vsel %vm1444_vm9, %v8461_v6, %v8463_v54  ;;  %8311 = vmatpush1.msra.mxu0 %v8160_v44 }
 0x6b7   : > { %v8485_v55 = vmul.f32 %v8482_v4, %v12403_v46  ;;  %10680 = vmatmul.mubr.msk.f32.vlgmr.msra.gmra.mrb[6].mxu0 %vm402_vm3, %v8165_v25  ;;  %8381 = vmatprep.subr.mxu0 %v8163_v36  ;;  %v8481_v46 = vsel %vm1444_vm9, %v8463_v54, %v8465_v8 }
 0x6b8   : > { %8382 = vmatpush1.msra.mxu0 %v8162_v63  ;;  %8445 = vmatprep.mubr.f32.mxu0 %v13301_v0 }
 0x6b9   : > { %v8471_v35 = vpop.permute.xlu0 %8470  ;;  %8496 = vmatprep.subr.mxu0 %v8485_v55  ;;  %v8475_v41 = vpop.permute.xlu1 %8474 }
 0x6ba   : > { %v8483_v45 = vsel %vm1444_vm9, %v8475_v41, %v8461_v6  ;;  %v13309_v6 = vld [vmem:[#allocation16_spill] sm:$0xff] }
 0x6bb   : > { %v8484_v53 = vmul.f32 %v8483_v45, %v12413_v30  ;;  %10681 = vmatmul.mubr.msk.f32.vlgmr.msra.gmra.mrb[8].mxu0 %vm402_vm3, %v8165_v25  ;;  %v8486_v30 = vmul.f32 %v8481_v46, %v12424_v48 }
 0x6bc   : > { %8560 = vmatprep.mubr.f32.mxu0 %v13301_v0 }
 0x6bd   : > { %v13022_v2 = vpop.permute.xlu0 %8788  ;;  %8497 = vmatpush1.msra.mxu0 %v8484_v53  ;;  %v8467_v15 = vpop.permute.xlu1 %8466 }
 0x6be   : > { %v8480_v14 = vsel %vm1444_vm9, %v8465_v8, %v8467_v15 }
 0x6bf   : > { %v8487_v3 = vmul.f32 %v8480_v14, %v12421_v20  ;;  %10682 = vmatmul.mubr.msk.f32.vlgmr.msra.gmra.mrb[2].mxu0 %vm402_vm3, %v8493_v26 }
 0x6c0   : > { %8631 = vmatprep.mubr.f32.mxu0 %v13301_v0 }
 0x6c1   : > { %v9089_v27 = vpop.permute.xlu0 %9088  ;;  %8567 = vmatprep.subr.mxu0 %v8487_v3  ;;  %v8469_v19 = vpop.permute.xlu1 %8468  ;;  %v13311_v3 = vld [vmem:[#allocation18_spill] sm:$0xff] }
 0x6c2   : > { %v8478_v16 = vsel %vm1444_vm9, %v8469_v19, %v8471_v35  ;;  %v8479_v12 = vsel %vm1444_vm9, %v8467_v15, %v8469_v19  ;;  %8568 = vmatpush1.msra.mxu0 %v8486_v30  ;;  %v13312_v19 = vld [vmem:[#allocation19_spill] sm:$0xff] }
 0x6c3   : > { %v8488_v52 = vmul.f32 %v8479_v12, %v12434_v39  ;;  %v8489_v20 = vmul.f32 %v8478_v16, %v13303_v7  ;;  %10683 = vmatmul.mubr.msk.f32.vlgmr.msra.gmra.mrb[4].mxu0 %vm402_vm3, %v8493_v26 }
 0x6c4   : > { %8702 = vmatprep.mubr.f32.mxu0 %v13301_v0 }
 0x6c5   : > { %v9091_v48 = vpop.permute.xlu0 %9090  ;;  %8638 = vmatprep.subr.mxu0 %v8489_v20  ;;  %v8473_v40 = vpop.permute.xlu1 %8472  ;;  %v13313_v20 = vld [vmem:[#allocation20_spill] sm:$0xff] }
 0x6c6   : > { %v8476_v51 = vsel %vm1444_vm9, %v8473_v40, %v8475_v41  ;;  %v8477_v33 = vsel %vm1444_vm9, %v8471_v35, %v8473_v40  ;;  %8639 = vmatpush1.msra.mxu0 %v8488_v52  ;;  %v9104_v60 = vsel %vm1620_vm10, %v9089_v27, %v9091_v48 }
 0x6c7   : > { %v8490_v10 = vmul.f32 %v8477_v33, %v13304_v38  ;;  %v8491_v39 = vmul.f32 %v8476_v51, %v13305_v1  ;;  %10684 = vmatmul.mubr.msk.f32.vlgmr.msra.gmra.mrb[6].mxu0 %vm402_vm3, %v8493_v26  ;;  %v9110_v63 = vmul.f32 %v9104_v60, %v13309_v6  ;;  %v13314_v51 = vld [vmem:[#allocation21_spill] sm:$0xff]  ;;  %v13320_v60 = vld [vmem:[#allocation27_spill] sm:$0xff] }
 0x6c8   : > { %8773 = vmatprep.mubr.f32.mxu0 %v13301_v0 }
 0x6c9   : > { %v13046_v37 = vpop.permute.xlu0 %9116  ;;  %8709 = vmatprep.subr.mxu0 %v8491_v39  ;;  %v9087_v18 = vpop.permute.xlu1 %9086  ;;  %v13315_v39 = vld [vmem:[#allocation22_spill] sm:$0xff] }
 0x6ca   : > { %8710 = vmatpush1.msra.mxu0 %v8490_v10 }
 0x6cb   : > { %10685 = vmatmul.mubr.msk.f32.vlgmr.msra.gmra.mrb[8].mxu0 %vm402_vm3, %v8493_v26  ;;  %8792 = vmatprep.subr.mxu0 %v12752_v23 }
 0x6cc   : > { %8793 = vmatpush1.msra.mxu0 %v12750_v31  ;;  %8856 = vmatprep.mubr.f32.mxu0 %v13301_v0  ;;  %v9105_v31 = vsel %vm1620_vm10, %v9087_v18, %v9089_v27 }
 0x6cd   : > { %v9097_v22 = vpop.permute.xlu0 %9096  ;;  %8863 = vmatprep.subr.mxu0 %v12760_v56  ;;  %v9085_v54 = vpop.permute.xlu1 %9084  ;;  %v13306_v56 = vld [vmem:[#allocation13_spill] sm:$0xff] }
 0x6ce   : > { %v9109_v8 = vmul.f32 %v9105_v31, %v13306_v56 }
 0x6cf   : > { %10686 = vmatmul.mubr.msk.f32.vlgmr.msra.gmra.mrb[2].mxu0 %vm402_vm3, %v13022_v2 }
 0x6d0   : > { %8864 = vmatpush1.msra.mxu0 %v12758_v28  ;;  %8927 = vmatprep.mubr.f32.mxu0 %v13301_v0 }
 0x6d1   : > { %8934 = vmatprep.subr.mxu0 %v12766_v17  ;;  %v9415_v25 = vpop.permute.xlu0 %9414  ;;  %v9093_v42 = vpop.permute.xlu1 %9092  ;;  %v9106_v17 = vsel %vm1620_vm10, %v9085_v54, %v9087_v18 }
 0x6d2   : > { %v9103_v61 = vsel %vm1620_vm10, %v9091_v48, %v9093_v42  ;;  %v9108_v59 = vmul.f32 %v9106_v17, %v13307_v58  ;;  %v13319_v58 = vld [vmem:[#allocation26_spill] sm:$0xff] }
 0x6d3   : > { %10687 = vmatmul.mubr.msk.f32.vlgmr.msra.gmra.mrb[4].mxu0 %vm402_vm3, %v13022_v2  ;;  %v9111_v44 = vmul.f32 %v9103_v61, %v13308_v49 }
 0x6d4   : > { %8935 = vmatpush1.msra.mxu0 %v12776_v21  ;;  %8998 = vmatprep.mubr.f32.mxu0 %v13301_v0 }
 0x6d5   : > { %9005 = vmatprep.subr.mxu0 %v12770_v47  ;;  %v13065_v23 = vpop.permute.xlu0 %9412  ;;  %v9095_v28 = vpop.permute.xlu1 %9094 }
 0x6d6   : > { %v9101_v36 = vsel %vm1620_vm10, %v9095_v28, %v9097_v22  ;;  %v9102_v4 = vsel %vm1620_vm10, %v9093_v42, %v9095_v28  ;;  %v9434_v27 = vsel %vm2411_vm6, %v13065_v23, %v9415_v25  ;;  %v13317_v28 = vld [vmem:[#allocation24_spill] sm:$0xff] }
 0x6d7   : > { %10688 = vmatmul.mubr.msk.f32.vlgmr.msra.gmra.mrb[6].mxu0 %vm402_vm3, %v13022_v2  ;;  %v9113_v55 = vmul.f32 %v9101_v36, %v12512_v32  ;;  %v9112_v45 = vmul.f32 %v9102_v4, %v12527_v43  ;;  %v9436_v48 = vmul.f32 %v9434_v27, %v13313_v20  ;;  %v13322_v4 = vld [vmem:[#allocation29_spill] sm:$0xff] }
 0x6d8   : > { %9006 = vmatpush1.msra.mxu0 %v12782_v29  ;;  %9069 = vmatprep.mubr.f32.mxu0 %v13301_v0 }
 0x6d9   : > { %9120 = vmatprep.subr.mxu0 %v9109_v8  ;;  %v9421_v47 = vpop.permute.xlu0 %9420  ;;  %v9417_v21 = vpop.permute.xlu1 %9416  ;;  %v13318_v8 = vld [vmem:[#allocation25_spill] sm:$0xff] }
 0x6da   : > { %v9433_v15 = vsel %vm2411_vm6, %v9415_v25, %v9417_v21 }
 0x6db   : > { %10689 = vmatmul.mubr.msk.f32.vlgmr.msra.gmra.mrb[8].mxu0 %vm402_vm3, %v13022_v2  ;;  %v13310_v2 = vld [vmem:[#allocation17_spill] sm:$0xff]  ;;  %v9437_v16 = vmul.f32 %v9433_v15, %v13312_v19 }
 0x6dc   : > { %9121 = vmatpush1.msra.mxu0 %v9108_v59  ;;  %9184 = vmatprep.mubr.f32.mxu0 %v13301_v0 }
 0x6dd   : > { %9191 = vmatprep.subr.mxu0 %v9111_v44  ;;  %v9423_v29 = vpop.permute.xlu0 %9422  ;;  %v9419_v26 = vpop.permute.xlu1 %9418 }
 0x6de   : > { %v9431_v12 = vsel %vm2411_vm6, %v9419_v26, %v9421_v47  ;;  %v9432_v40 = vsel %vm2411_vm6, %v9417_v21, %v9419_v26  ;;  %v13321_v26 = vld [vmem:[#allocation28_spill] sm:$0xff] }
 0x6df   : > { %10690 = vmatmul.mubr.msk.f32.vlgmr.msra.gmra.mrb[2].mxu0 %vm402_vm3, %v13046_v37  ;;  %v9439_v33 = vmul.f32 %v9431_v12, %v13314_v51  ;;  %v9438_v18 = vmul.f32 %v9432_v40, %v13315_v39 }
 0x6e0   : > { %9192 = vmatpush1.msra.mxu0 %v9110_v63  ;;  %9255 = vmatprep.mubr.f32.mxu0 %v13301_v0 }
 0x6e1   : > { %9262 = vmatprep.subr.mxu0 %v9113_v55  ;;  %v13092_v35 = vpop.permute.xlu0 %9744  ;;  %v9099_v41 = vpop.permute.xlu1 %9098 }
 0x6e2   : > { %v9107_v53 = vsel %vm1620_vm10, %v9099_v41, %v9085_v54  ;;  %v9100_v46 = vsel %vm1620_vm10, %v9097_v22, %v9099_v41  ;;  %v9430_v22 = vsel %vm2411_vm6, %v9421_v47, %v9423_v29  ;;  %v13316_v54 = vld [vmem:[#allocation23_spill] sm:$0xff] }
 0x6e3   : > { %v9115_v32 = vmul.f32 %v9107_v53, %v13310_v2  ;;  %10691 = vmatmul.mubr.msk.f32.vlgmr.msra.gmra.mrb[4].mxu0 %vm402_vm3, %v13046_v37  ;;  %v9114_v30 = vmul.f32 %v9100_v46, %v13311_v3  ;;  %v9440_v56 = vmul.f32 %v9430_v22, %v13317_v28  ;;  %v13323_v46 = vld [vmem:[#allocation30_spill] sm:$0xff] }
 0x6e4   : > { %9263 = vmatpush1.msra.mxu0 %v9112_v45  ;;  %9326 = vmatprep.mubr.f32.mxu0 %v13301_v0 }
 0x6e5   : > { %v9427_v14 = vpop.permute.xlu0 %9426  ;;  %9333 = vmatprep.subr.mxu0 %v9115_v32  ;;  %v9445_v43 = vpop.permute.xlu1 %9444 }
 0x6e7   : > { %10692 = vmatmul.mubr.msk.f32.vlgmr.msra.gmra.mrb[6].mxu0 %vm402_vm3, %v13046_v37 }
 0x6e8   : > { %9334 = vmatpush1.msra.mxu0 %v9114_v30  ;;  %9397 = vmatprep.mubr.f32.mxu0 %v13301_v0 }
 0x6e9   : > { %9448 = vmatprep.subr.mxu0 %v9437_v16  ;;  %v9747_v52 = vpop.permute.xlu0 %9746  ;;  %v9425_v7 = vpop.permute.xlu1 %9424 }
 0x6ea   : > { %v9429_v38 = vsel %vm2411_vm6, %v9423_v29, %v9425_v7  ;;  %v9428_v61 = vsel %vm2411_vm6, %v9425_v7, %v9427_v14  ;;  %v9760_v63 = vsel %vm2510_vm7, %v13092_v35, %v9747_v52 }
 0x6eb   : > { %10693 = vmatmul.mubr.msk.f32.vlgmr.msra.gmra.mrb[8].mxu0 %vm402_vm3, %v13046_v37  ;;  %v9441_v25 = vmul.f32 %v9429_v38, %v13316_v54  ;;  %v9435_v37 = vsel %vm2411_vm6, %v9427_v14, %v13065_v23  ;;  %v9442_v59 = vmul.f32 %v9428_v61, %v13319_v58  ;;  %v9766_v2 = vmul.f32 %v9760_v63, %v13323_v46  ;;  %v13324_v38 = vld [vmem:[#allocation31_spill] sm:$0xff]  ;;  %v13327_v54 = vld [vmem:[#allocation34_spill] sm:$0xff] }
 0x6ec   : > { %9449 = vmatpush1.msra.mxu0 %v9436_v48  ;;  %9512 = vmatprep.mubr.f32.mxu0 %v13301_v0  ;;  %v9443_v17 = vmul.f32 %v9435_v37, %v13318_v8  ;;  %v11280_v37 = vmov 1966171168   ;;  %v13328_v8 = vld [vmem:[#allocation9_spill] sm:$0xff] }
 0x6ed   : > { %9519 = vmatprep.subr.mxu0 %v9439_v33  ;;  %v13124_v10 = vpop.permute.xlu0 %9772  ;;  %v9743_v1 = vpop.permute.xlu1 %9742 }
 0x6ee   : > { %v9761_v47 = vsel %vm2510_vm7, %v9743_v1, %v13092_v35 }
 0x6ef   : > { %10694 = vmatmul.mubr.msk.f32.vlgmr.msra.gmra.mrb[2].mxu0 %vm402_vm3, %v9445_v43  ;;  %v9765_v49 = vmul.f32 %v9761_v47, %v13320_v60 }
 0x6f0   : > { %9520 = vmatpush1.msra.mxu0 %v9438_v18  ;;  %9583 = vmatprep.mubr.f32.mxu0 %v13301_v0 }
 0x6f1   : > { %9590 = vmatprep.subr.mxu0 %v9441_v25  ;;  %v9753_v42 = vpop.permute.xlu0 %9752  ;;  %v9741_v31 = vpop.permute.xlu1 %9740 }
 0x6f2   : > { %v9762_v44 = vsel %vm2510_vm7, %v9741_v31, %v9743_v1  ;;  %v13325_v1 = vld [vmem:[#allocation32_spill] sm:$0xff] }
 0x6f3   : > { %10695 = vmatmul.mubr.msk.f32.vlgmr.msra.gmra.mrb[4].mxu0 %vm402_vm3, %v9445_v43  ;;  %v9764_v6 = vmul.f32 %v9762_v44, %v13321_v26 }
 0x6f4   : > { %9591 = vmatpush1.msra.mxu0 %v9440_v56  ;;  %9654 = vmatprep.mubr.f32.mxu0 %v13301_v0 }
 0x6f5   : > { %9661 = vmatprep.subr.mxu0 %v9443_v17  ;;  %v10071_v23 = vpop.permute.xlu0 %10070  ;;  %v9749_v21 = vpop.permute.xlu1 %9748 }
 0x6f6   : > { %v9759_v36 = vsel %vm2510_vm7, %v9747_v52, %v9749_v21 }
 0x6f7   : > { %10696 = vmatmul.mubr.msk.f32.vlgmr.msra.gmra.mrb[6].mxu0 %vm402_vm3, %v9445_v43  ;;  %v9767_v55 = vmul.f32 %v9759_v36, %v13322_v4 }
 0x6f8   : > { %9662 = vmatpush1.msra.mxu0 %v9442_v59  ;;  %9725 = vmatprep.mubr.f32.mxu0 %v13301_v0 }
 0x6f9   : > { %9776 = vmatprep.subr.mxu0 %v9765_v49  ;;  %v9751_v29 = vpop.permute.xlu1 %9750  ;;  %v10069_v41 = vpop.permute.xlu0 %10068 }
 0x6fa   : > { %v9757_v45 = vsel %vm2510_vm7, %v9751_v29, %v9753_v42  ;;  %v9758_v32 = vsel %vm2510_vm7, %v9749_v21, %v9751_v29  ;;  %v10090_v16 = vsel %vm2609_vm11, %v10069_v41, %v10071_v23 }
 0x6fb   : > { %10697 = vmatmul.mubr.msk.f32.vlgmr.msra.gmra.mrb[8].mxu0 %vm402_vm3, %v9445_v43  ;;  %v9769_v35 = vmul.f32 %v9757_v45, %v12650_v50  ;;  %v9768_v43 = vmul.f32 %v9758_v32, %v12665_v13  ;;  %v10092_v7 = vmul.f32 %v10090_v16, %v12694_v11 }
 0x6fc   : > { %9777 = vmatpush1.msra.mxu0 %v9764_v6  ;;  %9840 = vmatprep.mubr.f32.mxu0 %v13301_v0 }
 0x6fd   : > { %9847 = vmatprep.subr.mxu0 %v9767_v55  ;;  %v10073_v53 = vpop.permute.xlu1 %10072  ;;  %v10077_v15 = vpop.permute.xlu0 %10076 }
 0x6fe   : > { %v10089_v50 = vsel %vm2609_vm11, %v10071_v23, %v10073_v53 }
 0x6ff   : > { %10698 = vmatmul.mubr.msk.f32.vlgmr.msra.gmra.mrb[2].mxu0 %vm402_vm3, %v13124_v10  ;;  %v10093_v12 = vmul.f32 %v10089_v50, %v12683_v57 }
 0x700   : > { %9848 = vmatpush1.msra.mxu0 %v9766_v2  ;;  %9911 = vmatprep.mubr.f32.mxu0 %v13301_v0 }
 0x701   : > { %9918 = vmatprep.subr.mxu0 %v9769_v35  ;;  %v9755_v14 = vpop.permute.xlu1 %9754  ;;  %v10079_v52 = vpop.permute.xlu0 %10078 }
 0x702   : > { %v9763_v3 = vsel %vm2510_vm7, %v9755_v14, %v9741_v31  ;;  %v9756_v30 = vsel %vm2510_vm7, %v9753_v42, %v9755_v14  ;;  %v10086_v11 = vsel %vm2609_vm11, %v10077_v15, %v10079_v52  ;;  %v10409_v42 = vunpack.c.l.s4 %v11280_v37 }
 0x703   : > { %v9771_v27 = vmul.f32 %v9763_v3, %v12673_v24  ;;  %10699 = vmatmul.mubr.msk.f32.vlgmr.msra.gmra.mrb[4].mxu0 %vm402_vm3, %v13124_v10  ;;  %v9770_v13 = vmul.f32 %v9756_v30, %v12678_v62  ;;  %v10096_v39 = vmul.f32 %v10086_v11, %v13325_v1 }
 0x704   : > { %9919 = vmatpush1.msra.mxu0 %v9768_v43  ;;  %9982 = vmatprep.mubr.f32.mxu0 %v13301_v0  ;;  %v10410_v9 = vunpack.c.0.s8 %v10409_v42 }
 0x705   : > { %9989 = vmatprep.subr.mxu0 %v9771_v27  ;;  %v10083_v57 = vpop.permute.xlu0 %10082 }
 0x706   : > { %v10075_v19 = vpop.permute.xlu1 %10074  ;;  %v10413_v17 = vsub.s32 %v10410_v9, %v13328_v8 }
 0x707   : > { %10700 = vmatmul.mubr.msk.f32.vlgmr.msra.gmra.mrb[6].mxu0 %vm402_vm3, %v13124_v10  ;;  %v10087_v24 = vsel %vm2609_vm11, %v10075_v19, %v10077_v15  ;;  %v10088_v20 = vsel %vm2609_vm11, %v10073_v53, %v10075_v19 }
 0x708   : > { %9990 = vmatpush1.msra.mxu0 %v9770_v13  ;;  %10053 = vmatprep.mubr.f32.mxu0 %v13301_v0  ;;  %v10095_v48 = vmul.f32 %v10087_v24, %v12701_v34  ;;  %v10094_v40 = vmul.f32 %v10088_v20, %v12710_v5  ;;  %v10091_v34 = vsel %vm2609_vm11, %v10083_v57, %v10069_v41  ;;  %v13326_v5 = vld [vmem:[#allocation33_spill] sm:$0xff] }
 0x709   : > { %10104 = vmatprep.subr.mxu0 %v10093_v12  ;;  %v10099_v18 = vmul.f32 %v10091_v34, %v13326_v5 }
 0x70a   : > { %v10101_v62 = vpop.permute.xlu1 %10100 }
 0x70b   : > { %10701 = vmatmul.mubr.msk.f32.vlgmr.msra.gmra.mrb[8].mxu0 %vm402_vm3, %v13124_v10 }
 0x70c   : > { %10105 = vmatpush1.msra.mxu0 %v10092_v7  ;;  %10168 = vmatprep.mubr.f32.mxu0 %v13301_v0 }
 0x70d   : > { %10175 = vmatprep.subr.mxu0 %v10095_v48 }
 0x70e   : > { %v10081_v51 = vpop.permute.xlu1 %10080 }
 0x70f   : > { %v10085_v33 = vsel %vm2609_vm11, %v10079_v52, %v10081_v51  ;;  %10702 = vmatmul.mubr.msk.f32.vlgmr.msra.gmra.mrb[2].mxu0 %vm402_vm3, %v10101_v62  ;;  %v10084_v22 = vsel %vm2609_vm11, %v10081_v51, %v10083_v57 }
 0x710   : > { %v10097_v10 = vmul.f32 %v10085_v33, %v13324_v38  ;;  %10176 = vmatpush1.msra.mxu0 %v10094_v40  ;;  %10239 = vmatprep.mubr.f32.mxu0 %v13301_v0  ;;  %v10098_v25 = vmul.f32 %v10084_v22, %v13327_v54 }
 0x712   : > { %10246 = vmatprep.subr.mxu0 %v10097_v10 }
 0x713   : > { %10703 = vmatmul.mubr.msk.f32.vlgmr.msra.gmra.mrb[4].mxu0 %vm402_vm3, %v10101_v62 }
 0x714   : > { %10247 = vmatpush1.msra.mxu0 %v10096_v39  ;;  %10310 = vmatprep.mubr.f32.mxu0 %v13301_v0 }
 0x715   : > { %10317 = vmatprep.subr.mxu0 %v10099_v18 }
 0x717   : > { %10704 = vmatmul.mubr.msk.f32.vlgmr.msra.gmra.mrb[6].mxu0 %vm402_vm3, %v10101_v62 }
 0x718   : > { %10318 = vmatpush1.msra.mxu0 %v10098_v25  ;;  %10381 = vmatprep.mubr.f32.mxu0 %v13301_v0 }
 0x71b   : > { %10705 = vmatmul.mubr.msk.f32.vlgmr.msra.gmra.mrb[8].mxu0 %vm402_vm3, %v10101_v62 }
 0x7e2   : > { %v10170_v31 = vpop.f32.mrb[2].mxu0 }
 0x7e3   : > { %v10172_v28 = vpop.f32.mrb[3].mxu0 }
 0x7e4   : > { %v10404_v56 = vcombine.low %v10170_v31, %v10172_v28 }
 0x7e6   : > { %v10241_v61 = vpop.f32.mrb[4].mxu0  ;;  %v10414_v21 = vrot.slane %v10404_v56, %v10413_v17 }
 0x7e7   : > { %v10243_v47 = vpop.f32.mrb[5].mxu0 }
 0x7e8   : > { %v10405_v23 = vcombine.low %v10241_v61, %v10243_v47 }
 0x7ea   : > { %v10421_v58 = vrot.slane %v10405_v23, %v10413_v17  ;;  %v10312_v59 = vpop.f32.mrb[6].mxu0 }
 0x7eb   : > { %v10314_v60 = vpop.f32.mrb[7].mxu0 }
 0x7ec   : > { %v10436_v49 = vcombine.low %v10414_v21, %v10421_v58  ;;  %v10406_v0 = vcombine.low %v10312_v59, %v10314_v60 }
 0x7ee   : > { %v10383_v44 = vpop.f32.mrb[8].mxu0  ;;  %v10428_v26 = vrot.slane %v10406_v0, %v10413_v17  ;;  %v10444_v4 = vrot.slane %v10436_v49, %v10413_v17 }
 0x7ef   : > { %v10385_v36 = vpop.f32.mrb[9].mxu0 }
 0x7f0   : > { %v10407_v29 = vcombine.low %v10383_v44, %v10385_v36 }
 0x7f2   : > { %v10435_v6 = vrot.slane %v10407_v29, %v10413_v17 }
 0x7f4   : > { %v10437_v63 = vcombine.low %v10428_v26, %v10435_v6 }
 0x7f6   : > { %v10451_v55 = vrot.slane %v10437_v63, %v10413_v17 }
 0x7f8   : > { %v10452_v41 = vcombine.low %v10444_v4, %v10451_v55 }
 0x7fa   : > { %10454 = vst [vmem:[%s344_s19] sm:$0xff] %v10452_v41 }
 0x7fb PF: > { %s21_s27 = sadd.s32 1, %s11236_s27  }
 0x7fc   : > { %p18_p5 = scmp.ge.s32.totalorder %s21_s27, 4  }
 0x7fe   :  { %20 = sbr.rel (!%p18_p5) target bundleno = 2 (0x2), region = 129 }
 0x805   :  { %10490 = vsyncpa [#allocation4], 1 }
 0x806   :  { %10492 = vsyncpa [#allocation4 + $0x1], 1 }
 0x807   :  { %10493 = vsyncpa [#allocation6], 1 }

</bundles_post_ra>
